<compile_context>
chip_gen: v6e
topology: v6e:2x2x1
jax: 0.10.0
libtpu: 0.0.40
codegen_flags: <defaults>
</compile_context>

<pallas_src>
import math

import jax
import jax.numpy as jnp
from jax.experimental import pallas as pl
from jax.experimental.pallas import tpu as pltpu

# ---- small synthetic config (real DistilBERT: H=768, 12 heads, 6 layers) ----
VOCAB = 100
B = 2
S = 8
H = 128
N_HEADS = 2
D_HEAD = H // N_HEADS
FFN = 256
N_LAYERS = 2
N_CLASSES = 5
C_PAD = 128               # classifier output padded to a full lane width
LN_EPS_BACKBONE = 1e-12   # DistilBERT internal LayerNorm eps
LN_EPS_HEAD = 1e-5        # nn.LayerNorm default eps (wrapper head)
MASK_NEG = -1e30          # additive mask bias (matches masked_fill semantics)

_VMEM = pl.BlockSpec(memory_space=pltpu.MemorySpace.VMEM)


# ------------------------------ fused kernel --------------------------------

def _fused_model_kernel(
    x_ref, bias_ref,
    emb_g_ref, emb_b_ref,
    wqkv_ref, bqkv_ref, wo_ref, bo_ref, sa_g_ref, sa_b_ref,
    wf1_ref, bf1_ref, wf2_ref, bf2_ref, out_g_ref, out_b_ref,
    head_g_ref, head_b_ref, w1_ref, b1_ref, w2_ref, b2_ref, wc_ref, bc_ref,
    o_ref,
):
    def layer_norm(v, g, b, eps):
        mu = jnp.mean(v, axis=-1, keepdims=True)
        var = jnp.mean(jnp.square(v - mu), axis=-1, keepdims=True)
        return (v - mu) * jax.lax.rsqrt(var + eps) * g + b

    def erf(z):
        # Abramowitz–Stegun 7.1.26 polynomial (|err| < 1.5e-7).  Mosaic has no
        # native erf lowering; exp runs on the EUP so this is nearly free.
        a1, a2, a3, a4, a5 = (0.254829592, -0.284496736, 1.421413741,
                              -1.453152027, 1.061405429)
        pc = 0.3275911
        sgn = jnp.where(z >= 0.0, 1.0, -1.0)
        za = jnp.abs(z)
        t = 1.0 / (1.0 + pc * za)
        poly = ((((a5 * t + a4) * t + a3) * t + a2) * t + a1) * t
        return sgn * (1.0 - poly * jnp.exp(-za * za))

    def gelu(v):
        # exact (erf-based) GELU == torch.nn.functional.gelu default
        return 0.5 * v * (1.0 + erf(v * (1.0 / math.sqrt(2.0))))

    # embeddings already summed in the wrapper; embedding LayerNorm here
    x = layer_norm(x_ref[...].astype(jnp.float32),
                   emb_g_ref[...], emb_b_ref[...], LN_EPS_BACKBONE)
    bias = bias_ref[...].astype(jnp.float32)        # [B, S] additive mask bias
    scale = 1.0 / math.sqrt(D_HEAD)

    # ----------------------- transformer encoder ---------------------------
    for l in range(N_LAYERS):                       # static unroll (L=2)
        # fused QKV projection: one MXU pass with N = 3H
        qkv = (jnp.dot(x, wqkv_ref[l], preferred_element_type=jnp.float32)
               + bqkv_ref[l])                       # [B*S, 3H]
        q = qkv[:, 0 * H:1 * H] * scale
        k = qkv[:, 1 * H:2 * H]
        v = qkv[:, 2 * H:3 * H]

        # per-(batch, head) attention on lane-sliced Dh=64 chunks; ctx is
        # written straight back into a [B*S, H] slab (no head transposes)
        ctx_rows = []
        for bb in range(B):
            r0 = bb * S
            mb = bias[bb:bb + 1, :]                 # [1, S] -> bcast [S, S]
            heads = []
            for h in range(N_HEADS):
                c0 = h * D_HEAD
                qh = q[r0:r0 + S, c0:c0 + D_HEAD]   # [S, Dh]
                kh = k[r0:r0 + S, c0:c0 + D_HEAD]
                vh = v[r0:r0 + S, c0:c0 + D_HEAD]
                sc = jax.lax.dot_general(
                    qh, kh, (((1,), (1,)), ((), ())),
                    preferred_element_type=jnp.float32) + mb      # [S, S]
                sc = sc - jnp.max(sc, axis=-1, keepdims=True)
                p = jnp.exp(sc)
                p = p / jnp.sum(p, axis=-1, keepdims=True)
                heads.append(jnp.dot(p, vh,
                                     preferred_element_type=jnp.float32))
            ctx_rows.append(jnp.concatenate(heads, axis=-1))       # [S, H]
        ctx = jnp.concatenate(ctx_rows, axis=0)                    # [B*S, H]

        attn_out = (jnp.dot(ctx, wo_ref[l],
                            preferred_element_type=jnp.float32) + bo_ref[l])
        x = layer_norm(attn_out + x, sa_g_ref[l], sa_b_ref[l], LN_EPS_BACKBONE)

        hff = gelu(jnp.dot(x, wf1_ref[l],
                           preferred_element_type=jnp.float32) + bf1_ref[l])
        hff = (jnp.dot(hff, wf2_ref[l],
                       preferred_element_type=jnp.float32) + bf2_ref[l])
        x = layer_norm(hff + x, out_g_ref[l], out_b_ref[l], LN_EPS_BACKBONE)

    # -------- CLS pooling (DistilBERT has no pooler_output) + head ---------
    pooled = jnp.concatenate([x[bb * S:bb * S + 1, :] for bb in range(B)],
                             axis=0)                               # [B, H]

    # dropout1 / dropout2 are identity at inference time
    h0 = layer_norm(pooled, head_g_ref[...], head_b_ref[...], LN_EPS_HEAD)
    res = h0
    h1 = gelu(jnp.dot(h0, w1_ref[...],
                      preferred_element_type=jnp.float32) + b1_ref[...]) + res
    res = h1
    h2 = gelu(jnp.dot(h1, w2_ref[...],
                      preferred_element_type=jnp.float32) + b2_ref[...]) + res
    # lane-dense classifier store ([B, 128]); real logits are cols [:N_CLASSES]
    o_ref[...] = (jnp.dot(h2, wc_ref[...],
                          preferred_element_type=jnp.float32)
                  + bc_ref[...]).astype(o_ref.dtype)


def _fused_forward(x, bias, p):
    return pl.pallas_call(
        _fused_model_kernel,
        out_shape=jax.ShapeDtypeStruct((B, C_PAD), jnp.float32),
        in_specs=[_VMEM] * 24,
        out_specs=_VMEM,
    )(x, bias,
      p["emb_ln_g"], p["emb_ln_b"],
      p["wqkv"], p["bqkv"], p["wo"], p["bo"], p["sa_ln_g"], p["sa_ln_b"],
      p["wf1"], p["bf1"], p["wf2"], p["bf2"], p["out_ln_g"], p["out_ln_b"],
      p["head_ln_g"], p["head_ln_b"],
      p["w1"], p["b1"], p["w2"], p["b2"], p["wc_pad"], p["bc_pad"])


# ------------------------- parameter initialization ------------------------

def init_params(key):
    # TODO(synk): AutoModel.from_pretrained weights cannot be loaded offline;
    # deterministic random weights with the same structure are used instead.
    keys = iter(jax.random.split(key, 32))

    def w(shape):
        return 0.02 * jax.random.normal(next(keys), shape, jnp.float32)

    ones_h = jnp.ones((1, H), jnp.float32)
    zeros_h = jnp.zeros((1, H), jnp.float32)

    params = {
        "word_emb": w((VOCAB, H)),
        "pos_emb": w((S, H)),
        "emb_ln_g": ones_h, "emb_ln_b": zeros_h,
        # per-layer weights stacked on a leading L axis; QKV fused to [H, 3H]
        "wqkv": jnp.stack(
            [jnp.concatenate([w((H, H)), w((H, H)), w((H, H))], axis=1)
             for _ in range(N_LAYERS)]),
        "bqkv": jnp.zeros((N_LAYERS, 1, 3 * H), jnp.float32),
        "wo": jnp.stack([w((H, H)) for _ in range(N_LAYERS)]),
        "bo": jnp.zeros((N_LAYERS, 1, H), jnp.float32),
        "sa_ln_g": jnp.ones((N_LAYERS, 1, H), jnp.float32),
        "sa_ln_b": jnp.zeros((N_LAYERS, 1, H), jnp.float32),
        "wf1": jnp.stack([w((H, FFN)) for _ in range(N_LAYERS)]),
        "bf1": jnp.zeros((N_LAYERS, 1, FFN), jnp.float32),
        "wf2": jnp.stack([w((FFN, H)) for _ in range(N_LAYERS)]),
        "bf2": jnp.zeros((N_LAYERS, 1, H), jnp.float32),
        "out_ln_g": jnp.ones((N_LAYERS, 1, H), jnp.float32),
        "out_ln_b": jnp.zeros((N_LAYERS, 1, H), jnp.float32),
        # wrapper head
        "head_ln_g": ones_h, "head_ln_b": zeros_h,
        "w1": w((H, H)), "b1": zeros_h,
        "w2": w((H, H)), "b2": zeros_h,
        # classifier padded to 128 output lanes for a lane-dense store
        "wc_pad": jnp.zeros((H, C_PAD), jnp.float32)
                     .at[:, :N_CLASSES].set(w((H, N_CLASSES))),
        "bc_pad": jnp.zeros((1, C_PAD), jnp.float32),
    }
    return params


# ------------------------------ forward pass --------------------------------

def distilbert_wrapper_forward(params, input_ids, attention_mask):
    b, s = input_ids.shape
    # embedding gather is XLA glue; everything downstream is one Pallas kernel
    x = jnp.take(params["word_emb"], input_ids, axis=0) \
        + params["pos_emb"][None, :s, :]
    x = x.reshape(b * s, H).astype(jnp.float32)
    # additive mask bias: 0 for valid tokens, large-negative for padding
    bias = (1.0 - attention_mask.astype(jnp.float32)) * MASK_NEG
    logits_padded = _fused_forward(x, bias, params)
    return logits_padded[:, :N_CLASSES]


if __name__ == "__main__":
    key = jax.random.PRNGKey(0)
    pkey, ikey = jax.random.split(key)
    params = init_params(pkey)

    input_ids = jax.random.randint(ikey, (B, S), 0, VOCAB, dtype=jnp.int32)
    attention_mask = jnp.array(
        [[1] * S, [1] * 5 + [0] * (S - 5)], dtype=jnp.int32)

    logits = jax.jit(distilbert_wrapper_forward)(params, input_ids,
                                                 attention_mask)
    jax.block_until_ready(logits)
    assert logits.shape == (B, N_CLASSES) and logits.dtype == jnp.float32
    print("KERNEL_OK")
</pallas_src>

<mosaic_0001>
module attributes {stable_mosaic.version = 11 : i64} {
  func.func @_fused_model_kernel(%arg0: memref<16x128xf32, #tpu.memory_space<vmem>>, %arg1: memref<2x8xf32, #tpu.memory_space<vmem>>, %arg2: memref<1x128xf32, #tpu.memory_space<vmem>>, %arg3: memref<1x128xf32, #tpu.memory_space<vmem>>, %arg4: memref<2x128x384xf32, #tpu.memory_space<vmem>>, %arg5: memref<2x1x384xf32, #tpu.memory_space<vmem>>, %arg6: memref<2x128x128xf32, #tpu.memory_space<vmem>>, %arg7: memref<2x1x128xf32, #tpu.memory_space<vmem>>, %arg8: memref<2x1x128xf32, #tpu.memory_space<vmem>>, %arg9: memref<2x1x128xf32, #tpu.memory_space<vmem>>, %arg10: memref<2x128x256xf32, #tpu.memory_space<vmem>>, %arg11: memref<2x1x256xf32, #tpu.memory_space<vmem>>, %arg12: memref<2x256x128xf32, #tpu.memory_space<vmem>>, %arg13: memref<2x1x128xf32, #tpu.memory_space<vmem>>, %arg14: memref<2x1x128xf32, #tpu.memory_space<vmem>>, %arg15: memref<2x1x128xf32, #tpu.memory_space<vmem>>, %arg16: memref<1x128xf32, #tpu.memory_space<vmem>>, %arg17: memref<1x128xf32, #tpu.memory_space<vmem>>, %arg18: memref<128x128xf32, #tpu.memory_space<vmem>>, %arg19: memref<1x128xf32, #tpu.memory_space<vmem>>, %arg20: memref<128x128xf32, #tpu.memory_space<vmem>>, %arg21: memref<1x128xf32, #tpu.memory_space<vmem>>, %arg22: memref<128x128xf32, #tpu.memory_space<vmem>>, %arg23: memref<1x128xf32, #tpu.memory_space<vmem>>, %arg24: memref<2x128xf32, #tpu.memory_space<vmem>>) attributes {dimension_semantics = [], scalar_prefetch = 0 : i64, scratch_operands = 0 : i64, tpu.core_type = #tpu.core_type<tc>} {
    %c0 = arith.constant 0 : index
    %c0_0 = arith.constant 0 : index
    %0 = vector.load %arg0[%c0, %c0_0] : memref<16x128xf32, #tpu.memory_space<vmem>>, vector<16x128xf32>
    %c0_1 = arith.constant 0 : index
    %c0_2 = arith.constant 0 : index
    %1 = vector.load %arg2[%c0_1, %c0_2] : memref<1x128xf32, #tpu.memory_space<vmem>>, vector<1x128xf32>
    %c0_3 = arith.constant 0 : index
    %c0_4 = arith.constant 0 : index
    %2 = vector.load %arg3[%c0_3, %c0_4] : memref<1x128xf32, #tpu.memory_space<vmem>>, vector<1x128xf32>
    %cst = arith.constant dense<0.000000e+00> : vector<16xf32>
    %3 = vector.multi_reduction <add>, %0, %cst [1] : vector<16x128xf32> to vector<16xf32>
    %4 = vector.shape_cast %3 : vector<16xf32> to vector<16x1xf32>
    %cst_5 = arith.constant 1.280000e+02 : f32
    %5 = vector.broadcast %cst_5 : f32 to vector<16x1xf32>
    %6 = arith.divf %4, %5 : vector<16x1xf32>
    %7 = vector.broadcast %6 : vector<16x1xf32> to vector<16x128xf32>
    %8 = arith.subf %0, %7 : vector<16x128xf32>
    %9 = arith.mulf %8, %8 : vector<16x128xf32>
    %cst_6 = arith.constant dense<0.000000e+00> : vector<16xf32>
    %10 = vector.multi_reduction <add>, %9, %cst_6 [1] : vector<16x128xf32> to vector<16xf32>
    %11 = vector.shape_cast %10 : vector<16xf32> to vector<16x1xf32>
    %cst_7 = arith.constant 1.280000e+02 : f32
    %12 = vector.broadcast %cst_7 : f32 to vector<16x1xf32>
    %13 = arith.divf %11, %12 : vector<16x1xf32>
    %14 = vector.broadcast %6 : vector<16x1xf32> to vector<16x128xf32>
    %15 = arith.subf %0, %14 : vector<16x128xf32>
    %cst_8 = arith.constant 9.99999996E-13 : f32
    %16 = vector.broadcast %cst_8 : f32 to vector<16x1xf32>
    %17 = arith.addf %13, %16 : vector<16x1xf32>
    %18 = math.rsqrt %17 : vector<16x1xf32>
    %19 = vector.broadcast %18 : vector<16x1xf32> to vector<16x128xf32>
    %20 = arith.mulf %15, %19 : vector<16x128xf32>
    %21 = vector.broadcast %1 : vector<1x128xf32> to vector<16x128xf32>
    %22 = arith.mulf %20, %21 : vector<16x128xf32>
    %23 = vector.broadcast %2 : vector<1x128xf32> to vector<16x128xf32>
    %24 = arith.addf %22, %23 : vector<16x128xf32>
    %c0_9 = arith.constant 0 : index
    %c0_10 = arith.constant 0 : index
    %25 = vector.load %arg1[%c0_9, %c0_10] : memref<2x8xf32, #tpu.memory_space<vmem>>, vector<2x8xf32>
    %c0_11 = arith.constant 0 : index
    %c0_12 = arith.constant 0 : index
    %c0_13 = arith.constant 0 : index
    %26 = vector.load %arg4[%c0_11, %c0_12, %c0_13] : memref<2x128x384xf32, #tpu.memory_space<vmem>>, vector<1x128x384xf32>
    %27 = vector.shape_cast %26 : vector<1x128x384xf32> to vector<128x384xf32>
    %cst_14 = arith.constant dense<0.000000e+00> : vector<16x384xf32>
    %28 = tpu.matmul %24, %27, %cst_14 {dimension_numbers = #tpu.dot_dimension_numbers<[1], [0], [0], [1], [0, 0, 1, 1], [], []>} : vector<16x128xf32>, vector<128x384xf32>, vector<16x384xf32> -> vector<16x384xf32>
    %c0_15 = arith.constant 0 : index
    %c0_16 = arith.constant 0 : index
    %c0_17 = arith.constant 0 : index
    %29 = vector.load %arg5[%c0_15, %c0_16, %c0_17] : memref<2x1x384xf32, #tpu.memory_space<vmem>>, vector<1x1x384xf32>
    %30 = vector.shape_cast %29 : vector<1x1x384xf32> to vector<1x384xf32>
    %31 = vector.broadcast %30 : vector<1x384xf32> to vector<16x384xf32>
    %32 = arith.addf %28, %31 : vector<16x384xf32>
    %33 = vector.extract_strided_slice %32 {offsets = [0, 0], sizes = [16, 128], strides = [1, 1]} : vector<16x384xf32> to vector<16x128xf32>
    %cst_18 = arith.constant 1.250000e-01 : f32
    %34 = vector.broadcast %cst_18 : f32 to vector<16x128xf32>
    %35 = arith.mulf %33, %34 : vector<16x128xf32>
    %36 = vector.extract_strided_slice %32 {offsets = [0, 128], sizes = [16, 128], strides = [1, 1]} : vector<16x384xf32> to vector<16x128xf32>
    %37 = vector.extract_strided_slice %32 {offsets = [0, 256], sizes = [16, 128], strides = [1, 1]} : vector<16x384xf32> to vector<16x128xf32>
    %38 = vector.extract_strided_slice %25 {offsets = [0, 0], sizes = [1, 8], strides = [1, 1]} : vector<2x8xf32> to vector<1x8xf32>
    %39 = vector.extract_strided_slice %35 {offsets = [0, 0], sizes = [8, 64], strides = [1, 1]} : vector<16x128xf32> to vector<8x64xf32>
    %40 = vector.extract_strided_slice %36 {offsets = [0, 0], sizes = [8, 64], strides = [1, 1]} : vector<16x128xf32> to vector<8x64xf32>
    %41 = vector.extract_strided_slice %37 {offsets = [0, 0], sizes = [8, 64], strides = [1, 1]} : vector<16x128xf32> to vector<8x64xf32>
    %cst_19 = arith.constant dense<0.000000e+00> : vector<8x8xf32>
    %42 = tpu.matmul %39, %40, %cst_19 {dimension_numbers = #tpu.dot_dimension_numbers<[1], [1], [0], [0], [0, 0, 1, 0], [], []>} : vector<8x64xf32>, vector<8x64xf32>, vector<8x8xf32> -> vector<8x8xf32>
    %43 = vector.broadcast %38 : vector<1x8xf32> to vector<8x8xf32>
    %44 = arith.addf %42, %43 : vector<8x8xf32>
    %cst_20 = arith.constant dense<0xFF800000> : vector<8xf32>
    %45 = vector.multi_reduction <maximumf>, %44, %cst_20 [1] : vector<8x8xf32> to vector<8xf32>
    %46 = vector.shape_cast %45 : vector<8xf32> to vector<8x1xf32>
    %47 = vector.broadcast %46 : vector<8x1xf32> to vector<8x8xf32>
    %48 = arith.subf %44, %47 : vector<8x8xf32>
    %49 = math.exp %48 : vector<8x8xf32>
    %cst_21 = arith.constant dense<0.000000e+00> : vector<8xf32>
    %50 = vector.multi_reduction <add>, %49, %cst_21 [1] : vector<8x8xf32> to vector<8xf32>
    %51 = vector.shape_cast %50 : vector<8xf32> to vector<8x1xf32>
    %52 = vector.broadcast %51 : vector<8x1xf32> to vector<8x8xf32>
    %53 = arith.divf %49, %52 : vector<8x8xf32>
    %cst_22 = arith.constant dense<0.000000e+00> : vector<8x64xf32>
    %54 = tpu.matmul %53, %41, %cst_22 {dimension_numbers = #tpu.dot_dimension_numbers<[1], [0], [0], [1], [0, 0, 1, 1], [], []>} : vector<8x8xf32>, vector<8x64xf32>, vector<8x64xf32> -> vector<8x64xf32>
    %55 = vector.extract_strided_slice %35 {offsets = [0, 64], sizes = [8, 64], strides = [1, 1]} : vector<16x128xf32> to vector<8x64xf32>
    %56 = vector.extract_strided_slice %36 {offsets = [0, 64], sizes = [8, 64], strides = [1, 1]} : vector<16x128xf32> to vector<8x64xf32>
    %57 = vector.extract_strided_slice %37 {offsets = [0, 64], sizes = [8, 64], strides = [1, 1]} : vector<16x128xf32> to vector<8x64xf32>
    %cst_23 = arith.constant dense<0.000000e+00> : vector<8x8xf32>
    %58 = tpu.matmul %55, %56, %cst_23 {dimension_numbers = #tpu.dot_dimension_numbers<[1], [1], [0], [0], [0, 0, 1, 0], [], []>} : vector<8x64xf32>, vector<8x64xf32>, vector<8x8xf32> -> vector<8x8xf32>
    %59 = vector.broadcast %38 : vector<1x8xf32> to vector<8x8xf32>
    %60 = arith.addf %58, %59 : vector<8x8xf32>
    %cst_24 = arith.constant dense<0xFF800000> : vector<8xf32>
    %61 = vector.multi_reduction <maximumf>, %60, %cst_24 [1] : vector<8x8xf32> to vector<8xf32>
    %62 = vector.shape_cast %61 : vector<8xf32> to vector<8x1xf32>
    %63 = vector.broadcast %62 : vector<8x1xf32> to vector<8x8xf32>
    %64 = arith.subf %60, %63 : vector<8x8xf32>
    %65 = math.exp %64 : vector<8x8xf32>
    %cst_25 = arith.constant dense<0.000000e+00> : vector<8xf32>
    %66 = vector.multi_reduction <add>, %65, %cst_25 [1] : vector<8x8xf32> to vector<8xf32>
    %67 = vector.shape_cast %66 : vector<8xf32> to vector<8x1xf32>
    %68 = vector.broadcast %67 : vector<8x1xf32> to vector<8x8xf32>
    %69 = arith.divf %65, %68 : vector<8x8xf32>
    %cst_26 = arith.constant dense<0.000000e+00> : vector<8x64xf32>
    %70 = tpu.matmul %69, %57, %cst_26 {dimension_numbers = #tpu.dot_dimension_numbers<[1], [0], [0], [1], [0, 0, 1, 1], [], []>} : vector<8x8xf32>, vector<8x64xf32>, vector<8x64xf32> -> vector<8x64xf32>
    %71 = tpu.concatenate %54, %70 in 1 : vector<8x64xf32>, vector<8x64xf32> -> vector<8x128xf32>
    %72 = vector.extract_strided_slice %25 {offsets = [1, 0], sizes = [1, 8], strides = [1, 1]} : vector<2x8xf32> to vector<1x8xf32>
    %73 = vector.extract_strided_slice %35 {offsets = [8, 0], sizes = [8, 64], strides = [1, 1]} : vector<16x128xf32> to vector<8x64xf32>
    %74 = vector.extract_strided_slice %36 {offsets = [8, 0], sizes = [8, 64], strides = [1, 1]} : vector<16x128xf32> to vector<8x64xf32>
    %75 = vector.extract_strided_slice %37 {offsets = [8, 0], sizes = [8, 64], strides = [1, 1]} : vector<16x128xf32> to vector<8x64xf32>
    %cst_27 = arith.constant dense<0.000000e+00> : vector<8x8xf32>
    %76 = tpu.matmul %73, %74, %cst_27 {dimension_numbers = #tpu.dot_dimension_numbers<[1], [1], [0], [0], [0, 0, 1, 0], [], []>} : vector<8x64xf32>, vector<8x64xf32>, vector<8x8xf32> -> vector<8x8xf32>
    %77 = vector.broadcast %72 : vector<1x8xf32> to vector<8x8xf32>
    %78 = arith.addf %76, %77 : vector<8x8xf32>
    %cst_28 = arith.constant dense<0xFF800000> : vector<8xf32>
    %79 = vector.multi_reduction <maximumf>, %78, %cst_28 [1] : vector<8x8xf32> to vector<8xf32>
    %80 = vector.shape_cast %79 : vector<8xf32> to vector<8x1xf32>
    %81 = vector.broadcast %80 : vector<8x1xf32> to vector<8x8xf32>
    %82 = arith.subf %78, %81 : vector<8x8xf32>
    %83 = math.exp %82 : vector<8x8xf32>
    %cst_29 = arith.constant dense<0.000000e+00> : vector<8xf32>
    %84 = vector.multi_reduction <add>, %83, %cst_29 [1] : vector<8x8xf32> to vector<8xf32>
    %85 = vector.shape_cast %84 : vector<8xf32> to vector<8x1xf32>
    %86 = vector.broadcast %85 : vector<8x1xf32> to vector<8x8xf32>
    %87 = arith.divf %83, %86 : vector<8x8xf32>
    %cst_30 = arith.constant dense<0.000000e+00> : vector<8x64xf32>
    %88 = tpu.matmul %87, %75, %cst_30 {dimension_numbers = #tpu.dot_dimension_numbers<[1], [0], [0], [1], [0, 0, 1, 1], [], []>} : vector<8x8xf32>, vector<8x64xf32>, vector<8x64xf32> -> vector<8x64xf32>
    %89 = vector.extract_strided_slice %35 {offsets = [8, 64], sizes = [8, 64], strides = [1, 1]} : vector<16x128xf32> to vector<8x64xf32>
    %90 = vector.extract_strided_slice %36 {offsets = [8, 64], sizes = [8, 64], strides = [1, 1]} : vector<16x128xf32> to vector<8x64xf32>
    %91 = vector.extract_strided_slice %37 {offsets = [8, 64], sizes = [8, 64], strides = [1, 1]} : vector<16x128xf32> to vector<8x64xf32>
    %cst_31 = arith.constant dense<0.000000e+00> : vector<8x8xf32>
    %92 = tpu.matmul %89, %90, %cst_31 {dimension_numbers = #tpu.dot_dimension_numbers<[1], [1], [0], [0], [0, 0, 1, 0], [], []>} : vector<8x64xf32>, vector<8x64xf32>, vector<8x8xf32> -> vector<8x8xf32>
    %93 = vector.broadcast %72 : vector<1x8xf32> to vector<8x8xf32>
    %94 = arith.addf %92, %93 : vector<8x8xf32>
    %cst_32 = arith.constant dense<0xFF800000> : vector<8xf32>
    %95 = vector.multi_reduction <maximumf>, %94, %cst_32 [1] : vector<8x8xf32> to vector<8xf32>
    %96 = vector.shape_cast %95 : vector<8xf32> to vector<8x1xf32>
    %97 = vector.broadcast %96 : vector<8x1xf32> to vector<8x8xf32>
    %98 = arith.subf %94, %97 : vector<8x8xf32>
    %99 = math.exp %98 : vector<8x8xf32>
    %cst_33 = arith.constant dense<0.000000e+00> : vector<8xf32>
    %100 = vector.multi_reduction <add>, %99, %cst_33 [1] : vector<8x8xf32> to vector<8xf32>
    %101 = vector.shape_cast %100 : vector<8xf32> to vector<8x1xf32>
    %102 = vector.broadcast %101 : vector<8x1xf32> to vector<8x8xf32>
    %103 = arith.divf %99, %102 : vector<8x8xf32>
    %cst_34 = arith.constant dense<0.000000e+00> : vector<8x64xf32>
    %104 = tpu.matmul %103, %91, %cst_34 {dimension_numbers = #tpu.dot_dimension_numbers<[1], [0], [0], [1], [0, 0, 1, 1], [], []>} : vector<8x8xf32>, vector<8x64xf32>, vector<8x64xf32> -> vector<8x64xf32>
    %105 = tpu.concatenate %88, %104 in 1 : vector<8x64xf32>, vector<8x64xf32> -> vector<8x128xf32>
    %106 = tpu.concatenate %71, %105 in 0 : vector<8x128xf32>, vector<8x128xf32> -> vector<16x128xf32>
    %c0_35 = arith.constant 0 : index
    %c0_36 = arith.constant 0 : index
    %c0_37 = arith.constant 0 : index
    %107 = vector.load %arg6[%c0_35, %c0_36, %c0_37] : memref<2x128x128xf32, #tpu.memory_space<vmem>>, vector<1x128x128xf32>
    %108 = vector.shape_cast %107 : vector<1x128x128xf32> to vector<128x128xf32>
    %cst_38 = arith.constant dense<0.000000e+00> : vector<16x128xf32>
    %109 = tpu.matmul %106, %108, %cst_38 {dimension_numbers = #tpu.dot_dimension_numbers<[1], [0], [0], [1], [0, 0, 1, 1], [], []>} : vector<16x128xf32>, vector<128x128xf32>, vector<16x128xf32> -> vector<16x128xf32>
    %c0_39 = arith.constant 0 : index
    %c0_40 = arith.constant 0 : index
    %c0_41 = arith.constant 0 : index
    %110 = vector.load %arg7[%c0_39, %c0_40, %c0_41] : memref<2x1x128xf32, #tpu.memory_space<vmem>>, vector<1x1x128xf32>
    %111 = vector.shape_cast %110 : vector<1x1x128xf32> to vector<1x128xf32>
    %112 = vector.broadcast %111 : vector<1x128xf32> to vector<16x128xf32>
    %113 = arith.addf %109, %112 : vector<16x128xf32>
    %114 = arith.addf %113, %24 : vector<16x128xf32>
    %c0_42 = arith.constant 0 : index
    %c0_43 = arith.constant 0 : index
    %c0_44 = arith.constant 0 : index
    %115 = vector.load %arg8[%c0_42, %c0_43, %c0_44] : memref<2x1x128xf32, #tpu.memory_space<vmem>>, vector<1x1x128xf32>
    %116 = vector.shape_cast %115 : vector<1x1x128xf32> to vector<1x128xf32>
    %c0_45 = arith.constant 0 : index
    %c0_46 = arith.constant 0 : index
    %c0_47 = arith.constant 0 : index
    %117 = vector.load %arg9[%c0_45, %c0_46, %c0_47] : memref<2x1x128xf32, #tpu.memory_space<vmem>>, vector<1x1x128xf32>
    %118 = vector.shape_cast %117 : vector<1x1x128xf32> to vector<1x128xf32>
    %cst_48 = arith.constant dense<0.000000e+00> : vector<16xf32>
    %119 = vector.multi_reduction <add>, %114, %cst_48 [1] : vector<16x128xf32> to vector<16xf32>
    %120 = vector.shape_cast %119 : vector<16xf32> to vector<16x1xf32>
    %cst_49 = arith.constant 1.280000e+02 : f32
    %121 = vector.broadcast %cst_49 : f32 to vector<16x1xf32>
    %122 = arith.divf %120, %121 : vector<16x1xf32>
    %123 = vector.broadcast %122 : vector<16x1xf32> to vector<16x128xf32>
    %124 = arith.subf %114, %123 : vector<16x128xf32>
    %125 = arith.mulf %124, %124 : vector<16x128xf32>
    %cst_50 = arith.constant dense<0.000000e+00> : vector<16xf32>
    %126 = vector.multi_reduction <add>, %125, %cst_50 [1] : vector<16x128xf32> to vector<16xf32>
    %127 = vector.shape_cast %126 : vector<16xf32> to vector<16x1xf32>
    %cst_51 = arith.constant 1.280000e+02 : f32
    %128 = vector.broadcast %cst_51 : f32 to vector<16x1xf32>
    %129 = arith.divf %127, %128 : vector<16x1xf32>
    %130 = vector.broadcast %122 : vector<16x1xf32> to vector<16x128xf32>
    %131 = arith.subf %114, %130 : vector<16x128xf32>
    %cst_52 = arith.constant 9.99999996E-13 : f32
    %132 = vector.broadcast %cst_52 : f32 to vector<16x1xf32>
    %133 = arith.addf %129, %132 : vector<16x1xf32>
    %134 = math.rsqrt %133 : vector<16x1xf32>
    %135 = vector.broadcast %134 : vector<16x1xf32> to vector<16x128xf32>
    %136 = arith.mulf %131, %135 : vector<16x128xf32>
    %137 = vector.broadcast %116 : vector<1x128xf32> to vector<16x128xf32>
    %138 = arith.mulf %136, %137 : vector<16x128xf32>
    %139 = vector.broadcast %118 : vector<1x128xf32> to vector<16x128xf32>
    %140 = arith.addf %138, %139 : vector<16x128xf32>
    %c0_53 = arith.constant 0 : index
    %c0_54 = arith.constant 0 : index
    %c0_55 = arith.constant 0 : index
    %141 = vector.load %arg10[%c0_53, %c0_54, %c0_55] : memref<2x128x256xf32, #tpu.memory_space<vmem>>, vector<1x128x256xf32>
    %142 = vector.shape_cast %141 : vector<1x128x256xf32> to vector<128x256xf32>
    %cst_56 = arith.constant dense<0.000000e+00> : vector<16x256xf32>
    %143 = tpu.matmul %140, %142, %cst_56 {dimension_numbers = #tpu.dot_dimension_numbers<[1], [0], [0], [1], [0, 0, 1, 1], [], []>} : vector<16x128xf32>, vector<128x256xf32>, vector<16x256xf32> -> vector<16x256xf32>
    %c0_57 = arith.constant 0 : index
    %c0_58 = arith.constant 0 : index
    %c0_59 = arith.constant 0 : index
    %144 = vector.load %arg11[%c0_57, %c0_58, %c0_59] : memref<2x1x256xf32, #tpu.memory_space<vmem>>, vector<1x1x256xf32>
    %145 = vector.shape_cast %144 : vector<1x1x256xf32> to vector<1x256xf32>
    %146 = vector.broadcast %145 : vector<1x256xf32> to vector<16x256xf32>
    %147 = arith.addf %143, %146 : vector<16x256xf32>
    %cst_60 = arith.constant 5.000000e-01 : f32
    %148 = vector.broadcast %cst_60 : f32 to vector<16x256xf32>
    %149 = arith.mulf %148, %147 : vector<16x256xf32>
    %cst_61 = arith.constant 0.707106769 : f32
    %150 = vector.broadcast %cst_61 : f32 to vector<16x256xf32>
    %151 = arith.mulf %147, %150 : vector<16x256xf32>
    %cst_62 = arith.constant 0.000000e+00 : f32
    %152 = vector.broadcast %cst_62 : f32 to vector<16x256xf32>
    %153 = arith.cmpf oge, %151, %152 : vector<16x256xf32>
    %cst_63 = arith.constant 1.000000e+00 : f32
    %cst_64 = arith.constant -1.000000e+00 : f32
    %154 = vector.broadcast %cst_63 : f32 to vector<16x256xf32>
    %155 = vector.broadcast %cst_64 : f32 to vector<16x256xf32>
    %156 = arith.select %153, %154, %155 : vector<16x256xi1>, vector<16x256xf32>
    %157 = math.absf %151 : vector<16x256xf32>
    %cst_65 = arith.constant 0.327591091 : f32
    %158 = vector.broadcast %cst_65 : f32 to vector<16x256xf32>
    %159 = arith.mulf %158, %157 : vector<16x256xf32>
    %cst_66 = arith.constant 1.000000e+00 : f32
    %160 = vector.broadcast %cst_66 : f32 to vector<16x256xf32>
    %161 = arith.addf %160, %159 : vector<16x256xf32>
    %cst_67 = arith.constant 1.000000e+00 : f32
    %162 = vector.broadcast %cst_67 : f32 to vector<16x256xf32>
    %163 = arith.divf %162, %161 : vector<16x256xf32>
    %cst_68 = arith.constant 1.06140542 : f32
    %164 = vector.broadcast %cst_68 : f32 to vector<16x256xf32>
    %165 = arith.mulf %164, %163 : vector<16x256xf32>
    %cst_69 = arith.constant -1.45315206 : f32
    %166 = vector.broadcast %cst_69 : f32 to vector<16x256xf32>
    %167 = arith.addf %165, %166 : vector<16x256xf32>
    %168 = arith.mulf %167, %163 : vector<16x256xf32>
    %cst_70 = arith.constant 1.42141378 : f32
    %169 = vector.broadcast %cst_70 : f32 to vector<16x256xf32>
    %170 = arith.addf %168, %169 : vector<16x256xf32>
    %171 = arith.mulf %170, %163 : vector<16x256xf32>
    %cst_71 = arith.constant -0.284496725 : f32
    %172 = vector.broadcast %cst_71 : f32 to vector<16x256xf32>
    %173 = arith.addf %171, %172 : vector<16x256xf32>
    %174 = arith.mulf %173, %163 : vector<16x256xf32>
    %cst_72 = arith.constant 0.254829586 : f32
    %175 = vector.broadcast %cst_72 : f32 to vector<16x256xf32>
    %176 = arith.addf %174, %175 : vector<16x256xf32>
    %177 = arith.mulf %176, %163 : vector<16x256xf32>
    %cst_73 = arith.constant 0.000000e+00 : f32
    %178 = vector.broadcast %cst_73 : f32 to vector<16x256xf32>
    %179 = arith.subf %178, %157 : vector<16x256xf32>
    %180 = arith.mulf %179, %157 : vector<16x256xf32>
    %181 = math.exp %180 : vector<16x256xf32>
    %182 = arith.mulf %177, %181 : vector<16x256xf32>
    %cst_74 = arith.constant 1.000000e+00 : f32
    %183 = vector.broadcast %cst_74 : f32 to vector<16x256xf32>
    %184 = arith.subf %183, %182 : vector<16x256xf32>
    %185 = arith.mulf %156, %184 : vector<16x256xf32>
    %cst_75 = arith.constant 1.000000e+00 : f32
    %186 = vector.broadcast %cst_75 : f32 to vector<16x256xf32>
    %187 = arith.addf %186, %185 : vector<16x256xf32>
    %188 = arith.mulf %149, %187 : vector<16x256xf32>
    %c0_76 = arith.constant 0 : index
    %c0_77 = arith.constant 0 : index
    %c0_78 = arith.constant 0 : index
    %189 = vector.load %arg12[%c0_76, %c0_77, %c0_78] : memref<2x256x128xf32, #tpu.memory_space<vmem>>, vector<1x256x128xf32>
    %190 = vector.shape_cast %189 : vector<1x256x128xf32> to vector<256x128xf32>
    %cst_79 = arith.constant dense<0.000000e+00> : vector<16x128xf32>
    %191 = tpu.matmul %188, %190, %cst_79 {dimension_numbers = #tpu.dot_dimension_numbers<[1], [0], [0], [1], [0, 0, 1, 1], [], []>} : vector<16x256xf32>, vector<256x128xf32>, vector<16x128xf32> -> vector<16x128xf32>
    %c0_80 = arith.constant 0 : index
    %c0_81 = arith.constant 0 : index
    %c0_82 = arith.constant 0 : index
    %192 = vector.load %arg13[%c0_80, %c0_81, %c0_82] : memref<2x1x128xf32, #tpu.memory_space<vmem>>, vector<1x1x128xf32>
    %193 = vector.shape_cast %192 : vector<1x1x128xf32> to vector<1x128xf32>
    %194 = vector.broadcast %193 : vector<1x128xf32> to vector<16x128xf32>
    %195 = arith.addf %191, %194 : vector<16x128xf32>
    %196 = arith.addf %195, %140 : vector<16x128xf32>
    %c0_83 = arith.constant 0 : index
    %c0_84 = arith.constant 0 : index
    %c0_85 = arith.constant 0 : index
    %197 = vector.load %arg14[%c0_83, %c0_84, %c0_85] : memref<2x1x128xf32, #tpu.memory_space<vmem>>, vector<1x1x128xf32>
    %198 = vector.shape_cast %197 : vector<1x1x128xf32> to vector<1x128xf32>
    %c0_86 = arith.constant 0 : index
    %c0_87 = arith.constant 0 : index
    %c0_88 = arith.constant 0 : index
    %199 = vector.load %arg15[%c0_86, %c0_87, %c0_88] : memref<2x1x128xf32, #tpu.memory_space<vmem>>, vector<1x1x128xf32>
    %200 = vector.shape_cast %199 : vector<1x1x128xf32> to vector<1x128xf32>
    %cst_89 = arith.constant dense<0.000000e+00> : vector<16xf32>
    %201 = vector.multi_reduction <add>, %196, %cst_89 [1] : vector<16x128xf32> to vector<16xf32>
    %202 = vector.shape_cast %201 : vector<16xf32> to vector<16x1xf32>
    %cst_90 = arith.constant 1.280000e+02 : f32
    %203 = vector.broadcast %cst_90 : f32 to vector<16x1xf32>
    %204 = arith.divf %202, %203 : vector<16x1xf32>
    %205 = vector.broadcast %204 : vector<16x1xf32> to vector<16x128xf32>
    %206 = arith.subf %196, %205 : vector<16x128xf32>
    %207 = arith.mulf %206, %206 : vector<16x128xf32>
    %cst_91 = arith.constant dense<0.000000e+00> : vector<16xf32>
    %208 = vector.multi_reduction <add>, %207, %cst_91 [1] : vector<16x128xf32> to vector<16xf32>
    %209 = vector.shape_cast %208 : vector<16xf32> to vector<16x1xf32>
    %cst_92 = arith.constant 1.280000e+02 : f32
    %210 = vector.broadcast %cst_92 : f32 to vector<16x1xf32>
    %211 = arith.divf %209, %210 : vector<16x1xf32>
    %212 = vector.broadcast %204 : vector<16x1xf32> to vector<16x128xf32>
    %213 = arith.subf %196, %212 : vector<16x128xf32>
    %cst_93 = arith.constant 9.99999996E-13 : f32
    %214 = vector.broadcast %cst_93 : f32 to vector<16x1xf32>
    %215 = arith.addf %211, %214 : vector<16x1xf32>
    %216 = math.rsqrt %215 : vector<16x1xf32>
    %217 = vector.broadcast %216 : vector<16x1xf32> to vector<16x128xf32>
    %218 = arith.mulf %213, %217 : vector<16x128xf32>
    %219 = vector.broadcast %198 : vector<1x128xf32> to vector<16x128xf32>
    %220 = arith.mulf %218, %219 : vector<16x128xf32>
    %221 = vector.broadcast %200 : vector<1x128xf32> to vector<16x128xf32>
    %222 = arith.addf %220, %221 : vector<16x128xf32>
    %c1 = arith.constant 1 : index
    %c0_94 = arith.constant 0 : index
    %c0_95 = arith.constant 0 : index
    %223 = vector.load %arg4[%c1, %c0_94, %c0_95] : memref<2x128x384xf32, #tpu.memory_space<vmem>>, vector<1x128x384xf32>
    %224 = vector.shape_cast %223 : vector<1x128x384xf32> to vector<128x384xf32>
    %cst_96 = arith.constant dense<0.000000e+00> : vector<16x384xf32>
    %225 = tpu.matmul %222, %224, %cst_96 {dimension_numbers = #tpu.dot_dimension_numbers<[1], [0], [0], [1], [0, 0, 1, 1], [], []>} : vector<16x128xf32>, vector<128x384xf32>, vector<16x384xf32> -> vector<16x384xf32>
    %c1_97 = arith.constant 1 : index
    %c0_98 = arith.constant 0 : index
    %c0_99 = arith.constant 0 : index
    %226 = vector.load %arg5[%c1_97, %c0_98, %c0_99] : memref<2x1x384xf32, #tpu.memory_space<vmem>>, vector<1x1x384xf32>
    %227 = vector.shape_cast %226 : vector<1x1x384xf32> to vector<1x384xf32>
    %228 = vector.broadcast %227 : vector<1x384xf32> to vector<16x384xf32>
    %229 = arith.addf %225, %228 : vector<16x384xf32>
    %230 = vector.extract_strided_slice %229 {offsets = [0, 0], sizes = [16, 128], strides = [1, 1]} : vector<16x384xf32> to vector<16x128xf32>
    %cst_100 = arith.constant 1.250000e-01 : f32
    %231 = vector.broadcast %cst_100 : f32 to vector<16x128xf32>
    %232 = arith.mulf %230, %231 : vector<16x128xf32>
    %233 = vector.extract_strided_slice %229 {offsets = [0, 128], sizes = [16, 128], strides = [1, 1]} : vector<16x384xf32> to vector<16x128xf32>
    %234 = vector.extract_strided_slice %229 {offsets = [0, 256], sizes = [16, 128], strides = [1, 1]} : vector<16x384xf32> to vector<16x128xf32>
    %235 = vector.extract_strided_slice %25 {offsets = [0, 0], sizes = [1, 8], strides = [1, 1]} : vector<2x8xf32> to vector<1x8xf32>
    %236 = vector.extract_strided_slice %232 {offsets = [0, 0], sizes = [8, 64], strides = [1, 1]} : vector<16x128xf32> to vector<8x64xf32>
    %237 = vector.extract_strided_slice %233 {offsets = [0, 0], sizes = [8, 64], strides = [1, 1]} : vector<16x128xf32> to vector<8x64xf32>
    %238 = vector.extract_strided_slice %234 {offsets = [0, 0], sizes = [8, 64], strides = [1, 1]} : vector<16x128xf32> to vector<8x64xf32>
    %cst_101 = arith.constant dense<0.000000e+00> : vector<8x8xf32>
    %239 = tpu.matmul %236, %237, %cst_101 {dimension_numbers = #tpu.dot_dimension_numbers<[1], [1], [0], [0], [0, 0, 1, 0], [], []>} : vector<8x64xf32>, vector<8x64xf32>, vector<8x8xf32> -> vector<8x8xf32>
    %240 = vector.broadcast %235 : vector<1x8xf32> to vector<8x8xf32>
    %241 = arith.addf %239, %240 : vector<8x8xf32>
    %cst_102 = arith.constant dense<0xFF800000> : vector<8xf32>
    %242 = vector.multi_reduction <maximumf>, %241, %cst_102 [1] : vector<8x8xf32> to vector<8xf32>
    %243 = vector.shape_cast %242 : vector<8xf32> to vector<8x1xf32>
    %244 = vector.broadcast %243 : vector<8x1xf32> to vector<8x8xf32>
    %245 = arith.subf %241, %244 : vector<8x8xf32>
    %246 = math.exp %245 : vector<8x8xf32>
    %cst_103 = arith.constant dense<0.000000e+00> : vector<8xf32>
    %247 = vector.multi_reduction <add>, %246, %cst_103 [1] : vector<8x8xf32> to vector<8xf32>
    %248 = vector.shape_cast %247 : vector<8xf32> to vector<8x1xf32>
    %249 = vector.broadcast %248 : vector<8x1xf32> to vector<8x8xf32>
    %250 = arith.divf %246, %249 : vector<8x8xf32>
    %cst_104 = arith.constant dense<0.000000e+00> : vector<8x64xf32>
    %251 = tpu.matmul %250, %238, %cst_104 {dimension_numbers = #tpu.dot_dimension_numbers<[1], [0], [0], [1], [0, 0, 1, 1], [], []>} : vector<8x8xf32>, vector<8x64xf32>, vector<8x64xf32> -> vector<8x64xf32>
    %252 = vector.extract_strided_slice %232 {offsets = [0, 64], sizes = [8, 64], strides = [1, 1]} : vector<16x128xf32> to vector<8x64xf32>
    %253 = vector.extract_strided_slice %233 {offsets = [0, 64], sizes = [8, 64], strides = [1, 1]} : vector<16x128xf32> to vector<8x64xf32>
    %254 = vector.extract_strided_slice %234 {offsets = [0, 64], sizes = [8, 64], strides = [1, 1]} : vector<16x128xf32> to vector<8x64xf32>
    %cst_105 = arith.constant dense<0.000000e+00> : vector<8x8xf32>
    %255 = tpu.matmul %252, %253, %cst_105 {dimension_numbers = #tpu.dot_dimension_numbers<[1], [1], [0], [0], [0, 0, 1, 0], [], []>} : vector<8x64xf32>, vector<8x64xf32>, vector<8x8xf32> -> vector<8x8xf32>
    %256 = vector.broadcast %235 : vector<1x8xf32> to vector<8x8xf32>
    %257 = arith.addf %255, %256 : vector<8x8xf32>
    %cst_106 = arith.constant dense<0xFF800000> : vector<8xf32>
    %258 = vector.multi_reduction <maximumf>, %257, %cst_106 [1] : vector<8x8xf32> to vector<8xf32>
    %259 = vector.shape_cast %258 : vector<8xf32> to vector<8x1xf32>
    %260 = vector.broadcast %259 : vector<8x1xf32> to vector<8x8xf32>
    %261 = arith.subf %257, %260 : vector<8x8xf32>
    %262 = math.exp %261 : vector<8x8xf32>
    %cst_107 = arith.constant dense<0.000000e+00> : vector<8xf32>
    %263 = vector.multi_reduction <add>, %262, %cst_107 [1] : vector<8x8xf32> to vector<8xf32>
    %264 = vector.shape_cast %263 : vector<8xf32> to vector<8x1xf32>
    %265 = vector.broadcast %264 : vector<8x1xf32> to vector<8x8xf32>
    %266 = arith.divf %262, %265 : vector<8x8xf32>
    %cst_108 = arith.constant dense<0.000000e+00> : vector<8x64xf32>
    %267 = tpu.matmul %266, %254, %cst_108 {dimension_numbers = #tpu.dot_dimension_numbers<[1], [0], [0], [1], [0, 0, 1, 1], [], []>} : vector<8x8xf32>, vector<8x64xf32>, vector<8x64xf32> -> vector<8x64xf32>
    %268 = tpu.concatenate %251, %267 in 1 : vector<8x64xf32>, vector<8x64xf32> -> vector<8x128xf32>
    %269 = vector.extract_strided_slice %25 {offsets = [1, 0], sizes = [1, 8], strides = [1, 1]} : vector<2x8xf32> to vector<1x8xf32>
    %270 = vector.extract_strided_slice %232 {offsets = [8, 0], sizes = [8, 64], strides = [1, 1]} : vector<16x128xf32> to vector<8x64xf32>
    %271 = vector.extract_strided_slice %233 {offsets = [8, 0], sizes = [8, 64], strides = [1, 1]} : vector<16x128xf32> to vector<8x64xf32>
    %272 = vector.extract_strided_slice %234 {offsets = [8, 0], sizes = [8, 64], strides = [1, 1]} : vector<16x128xf32> to vector<8x64xf32>
    %cst_109 = arith.constant dense<0.000000e+00> : vector<8x8xf32>
    %273 = tpu.matmul %270, %271, %cst_109 {dimension_numbers = #tpu.dot_dimension_numbers<[1], [1], [0], [0], [0, 0, 1, 0], [], []>} : vector<8x64xf32>, vector<8x64xf32>, vector<8x8xf32> -> vector<8x8xf32>
    %274 = vector.broadcast %269 : vector<1x8xf32> to vector<8x8xf32>
    %275 = arith.addf %273, %274 : vector<8x8xf32>
    %cst_110 = arith.constant dense<0xFF800000> : vector<8xf32>
    %276 = vector.multi_reduction <maximumf>, %275, %cst_110 [1] : vector<8x8xf32> to vector<8xf32>
    %277 = vector.shape_cast %276 : vector<8xf32> to vector<8x1xf32>
    %278 = vector.broadcast %277 : vector<8x1xf32> to vector<8x8xf32>
    %279 = arith.subf %275, %278 : vector<8x8xf32>
    %280 = math.exp %279 : vector<8x8xf32>
    %cst_111 = arith.constant dense<0.000000e+00> : vector<8xf32>
    %281 = vector.multi_reduction <add>, %280, %cst_111 [1] : vector<8x8xf32> to vector<8xf32>
    %282 = vector.shape_cast %281 : vector<8xf32> to vector<8x1xf32>
    %283 = vector.broadcast %282 : vector<8x1xf32> to vector<8x8xf32>
    %284 = arith.divf %280, %283 : vector<8x8xf32>
    %cst_112 = arith.constant dense<0.000000e+00> : vector<8x64xf32>
    %285 = tpu.matmul %284, %272, %cst_112 {dimension_numbers = #tpu.dot_dimension_numbers<[1], [0], [0], [1], [0, 0, 1, 1], [], []>} : vector<8x8xf32>, vector<8x64xf32>, vector<8x64xf32> -> vector<8x64xf32>
    %286 = vector.extract_strided_slice %232 {offsets = [8, 64], sizes = [8, 64], strides = [1, 1]} : vector<16x128xf32> to vector<8x64xf32>
    %287 = vector.extract_strided_slice %233 {offsets = [8, 64], sizes = [8, 64], strides = [1, 1]} : vector<16x128xf32> to vector<8x64xf32>
    %288 = vector.extract_strided_slice %234 {offsets = [8, 64], sizes = [8, 64], strides = [1, 1]} : vector<16x128xf32> to vector<8x64xf32>
    %cst_113 = arith.constant dense<0.000000e+00> : vector<8x8xf32>
    %289 = tpu.matmul %286, %287, %cst_113 {dimension_numbers = #tpu.dot_dimension_numbers<[1], [1], [0], [0], [0, 0, 1, 0], [], []>} : vector<8x64xf32>, vector<8x64xf32>, vector<8x8xf32> -> vector<8x8xf32>
    %290 = vector.broadcast %269 : vector<1x8xf32> to vector<8x8xf32>
    %291 = arith.addf %289, %290 : vector<8x8xf32>
    %cst_114 = arith.constant dense<0xFF800000> : vector<8xf32>
    %292 = vector.multi_reduction <maximumf>, %291, %cst_114 [1] : vector<8x8xf32> to vector<8xf32>
    %293 = vector.shape_cast %292 : vector<8xf32> to vector<8x1xf32>
    %294 = vector.broadcast %293 : vector<8x1xf32> to vector<8x8xf32>
    %295 = arith.subf %291, %294 : vector<8x8xf32>
    %296 = math.exp %295 : vector<8x8xf32>
    %cst_115 = arith.constant dense<0.000000e+00> : vector<8xf32>
    %297 = vector.multi_reduction <add>, %296, %cst_115 [1] : vector<8x8xf32> to vector<8xf32>
    %298 = vector.shape_cast %297 : vector<8xf32> to vector<8x1xf32>
    %299 = vector.broadcast %298 : vector<8x1xf32> to vector<8x8xf32>
    %300 = arith.divf %296, %299 : vector<8x8xf32>
    %cst_116 = arith.constant dense<0.000000e+00> : vector<8x64xf32>
    %301 = tpu.matmul %300, %288, %cst_116 {dimension_numbers = #tpu.dot_dimension_numbers<[1], [0], [0], [1], [0, 0, 1, 1], [], []>} : vector<8x8xf32>, vector<8x64xf32>, vector<8x64xf32> -> vector<8x64xf32>
    %302 = tpu.concatenate %285, %301 in 1 : vector<8x64xf32>, vector<8x64xf32> -> vector<8x128xf32>
    %303 = tpu.concatenate %268, %302 in 0 : vector<8x128xf32>, vector<8x128xf32> -> vector<16x128xf32>
    %c1_117 = arith.constant 1 : index
    %c0_118 = arith.constant 0 : index
    %c0_119 = arith.constant 0 : index
    %304 = vector.load %arg6[%c1_117, %c0_118, %c0_119] : memref<2x128x128xf32, #tpu.memory_space<vmem>>, vector<1x128x128xf32>
    %305 = vector.shape_cast %304 : vector<1x128x128xf32> to vector<128x128xf32>
    %cst_120 = arith.constant dense<0.000000e+00> : vector<16x128xf32>
    %306 = tpu.matmul %303, %305, %cst_120 {dimension_numbers = #tpu.dot_dimension_numbers<[1], [0], [0], [1], [0, 0, 1, 1], [], []>} : vector<16x128xf32>, vector<128x128xf32>, vector<16x128xf32> -> vector<16x128xf32>
    %c1_121 = arith.constant 1 : index
    %c0_122 = arith.constant 0 : index
    %c0_123 = arith.constant 0 : index
    %307 = vector.load %arg7[%c1_121, %c0_122, %c0_123] : memref<2x1x128xf32, #tpu.memory_space<vmem>>, vector<1x1x128xf32>
    %308 = vector.shape_cast %307 : vector<1x1x128xf32> to vector<1x128xf32>
    %309 = vector.broadcast %308 : vector<1x128xf32> to vector<16x128xf32>
    %310 = arith.addf %306, %309 : vector<16x128xf32>
    %311 = arith.addf %310, %222 : vector<16x128xf32>
    %c1_124 = arith.constant 1 : index
    %c0_125 = arith.constant 0 : index
    %c0_126 = arith.constant 0 : index
    %312 = vector.load %arg8[%c1_124, %c0_125, %c0_126] : memref<2x1x128xf32, #tpu.memory_space<vmem>>, vector<1x1x128xf32>
    %313 = vector.shape_cast %312 : vector<1x1x128xf32> to vector<1x128xf32>
    %c1_127 = arith.constant 1 : index
    %c0_128 = arith.constant 0 : index
    %c0_129 = arith.constant 0 : index
    %314 = vector.load %arg9[%c1_127, %c0_128, %c0_129] : memref<2x1x128xf32, #tpu.memory_space<vmem>>, vector<1x1x128xf32>
    %315 = vector.shape_cast %314 : vector<1x1x128xf32> to vector<1x128xf32>
    %cst_130 = arith.constant dense<0.000000e+00> : vector<16xf32>
    %316 = vector.multi_reduction <add>, %311, %cst_130 [1] : vector<16x128xf32> to vector<16xf32>
    %317 = vector.shape_cast %316 : vector<16xf32> to vector<16x1xf32>
    %cst_131 = arith.constant 1.280000e+02 : f32
    %318 = vector.broadcast %cst_131 : f32 to vector<16x1xf32>
    %319 = arith.divf %317, %318 : vector<16x1xf32>
    %320 = vector.broadcast %319 : vector<16x1xf32> to vector<16x128xf32>
    %321 = arith.subf %311, %320 : vector<16x128xf32>
    %322 = arith.mulf %321, %321 : vector<16x128xf32>
    %cst_132 = arith.constant dense<0.000000e+00> : vector<16xf32>
    %323 = vector.multi_reduction <add>, %322, %cst_132 [1] : vector<16x128xf32> to vector<16xf32>
    %324 = vector.shape_cast %323 : vector<16xf32> to vector<16x1xf32>
    %cst_133 = arith.constant 1.280000e+02 : f32
    %325 = vector.broadcast %cst_133 : f32 to vector<16x1xf32>
    %326 = arith.divf %324, %325 : vector<16x1xf32>
    %327 = vector.broadcast %319 : vector<16x1xf32> to vector<16x128xf32>
    %328 = arith.subf %311, %327 : vector<16x128xf32>
    %cst_134 = arith.constant 9.99999996E-13 : f32
    %329 = vector.broadcast %cst_134 : f32 to vector<16x1xf32>
    %330 = arith.addf %326, %329 : vector<16x1xf32>
    %331 = math.rsqrt %330 : vector<16x1xf32>
    %332 = vector.broadcast %331 : vector<16x1xf32> to vector<16x128xf32>
    %333 = arith.mulf %328, %332 : vector<16x128xf32>
    %334 = vector.broadcast %313 : vector<1x128xf32> to vector<16x128xf32>
    %335 = arith.mulf %333, %334 : vector<16x128xf32>
    %336 = vector.broadcast %315 : vector<1x128xf32> to vector<16x128xf32>
    %337 = arith.addf %335, %336 : vector<16x128xf32>
    %c1_135 = arith.constant 1 : index
    %c0_136 = arith.constant 0 : index
    %c0_137 = arith.constant 0 : index
    %338 = vector.load %arg10[%c1_135, %c0_136, %c0_137] : memref<2x128x256xf32, #tpu.memory_space<vmem>>, vector<1x128x256xf32>
    %339 = vector.shape_cast %338 : vector<1x128x256xf32> to vector<128x256xf32>
    %cst_138 = arith.constant dense<0.000000e+00> : vector<16x256xf32>
    %340 = tpu.matmul %337, %339, %cst_138 {dimension_numbers = #tpu.dot_dimension_numbers<[1], [0], [0], [1], [0, 0, 1, 1], [], []>} : vector<16x128xf32>, vector<128x256xf32>, vector<16x256xf32> -> vector<16x256xf32>
    %c1_139 = arith.constant 1 : index
    %c0_140 = arith.constant 0 : index
    %c0_141 = arith.constant 0 : index
    %341 = vector.load %arg11[%c1_139, %c0_140, %c0_141] : memref<2x1x256xf32, #tpu.memory_space<vmem>>, vector<1x1x256xf32>
    %342 = vector.shape_cast %341 : vector<1x1x256xf32> to vector<1x256xf32>
    %343 = vector.broadcast %342 : vector<1x256xf32> to vector<16x256xf32>
    %344 = arith.addf %340, %343 : vector<16x256xf32>
    %cst_142 = arith.constant 5.000000e-01 : f32
    %345 = vector.broadcast %cst_142 : f32 to vector<16x256xf32>
    %346 = arith.mulf %345, %344 : vector<16x256xf32>
    %cst_143 = arith.constant 0.707106769 : f32
    %347 = vector.broadcast %cst_143 : f32 to vector<16x256xf32>
    %348 = arith.mulf %344, %347 : vector<16x256xf32>
    %cst_144 = arith.constant 0.000000e+00 : f32
    %349 = vector.broadcast %cst_144 : f32 to vector<16x256xf32>
    %350 = arith.cmpf oge, %348, %349 : vector<16x256xf32>
    %cst_145 = arith.constant 1.000000e+00 : f32
    %cst_146 = arith.constant -1.000000e+00 : f32
    %351 = vector.broadcast %cst_145 : f32 to vector<16x256xf32>
    %352 = vector.broadcast %cst_146 : f32 to vector<16x256xf32>
    %353 = arith.select %350, %351, %352 : vector<16x256xi1>, vector<16x256xf32>
    %354 = math.absf %348 : vector<16x256xf32>
    %cst_147 = arith.constant 0.327591091 : f32
    %355 = vector.broadcast %cst_147 : f32 to vector<16x256xf32>
    %356 = arith.mulf %355, %354 : vector<16x256xf32>
    %cst_148 = arith.constant 1.000000e+00 : f32
    %357 = vector.broadcast %cst_148 : f32 to vector<16x256xf32>
    %358 = arith.addf %357, %356 : vector<16x256xf32>
    %cst_149 = arith.constant 1.000000e+00 : f32
    %359 = vector.broadcast %cst_149 : f32 to vector<16x256xf32>
    %360 = arith.divf %359, %358 : vector<16x256xf32>
    %cst_150 = arith.constant 1.06140542 : f32
    %361 = vector.broadcast %cst_150 : f32 to vector<16x256xf32>
    %362 = arith.mulf %361, %360 : vector<16x256xf32>
    %cst_151 = arith.constant -1.45315206 : f32
    %363 = vector.broadcast %cst_151 : f32 to vector<16x256xf32>
    %364 = arith.addf %362, %363 : vector<16x256xf32>
    %365 = arith.mulf %364, %360 : vector<16x256xf32>
    %cst_152 = arith.constant 1.42141378 : f32
    %366 = vector.broadcast %cst_152 : f32 to vector<16x256xf32>
    %367 = arith.addf %365, %366 : vector<16x256xf32>
    %368 = arith.mulf %367, %360 : vector<16x256xf32>
    %cst_153 = arith.constant -0.284496725 : f32
    %369 = vector.broadcast %cst_153 : f32 to vector<16x256xf32>
    %370 = arith.addf %368, %369 : vector<16x256xf32>
    %371 = arith.mulf %370, %360 : vector<16x256xf32>
    %cst_154 = arith.constant 0.254829586 : f32
    %372 = vector.broadcast %cst_154 : f32 to vector<16x256xf32>
    %373 = arith.addf %371, %372 : vector<16x256xf32>
    %374 = arith.mulf %373, %360 : vector<16x256xf32>
    %cst_155 = arith.constant 0.000000e+00 : f32
    %375 = vector.broadcast %cst_155 : f32 to vector<16x256xf32>
    %376 = arith.subf %375, %354 : vector<16x256xf32>
    %377 = arith.mulf %376, %354 : vector<16x256xf32>
    %378 = math.exp %377 : vector<16x256xf32>
    %379 = arith.mulf %374, %378 : vector<16x256xf32>
    %cst_156 = arith.constant 1.000000e+00 : f32
    %380 = vector.broadcast %cst_156 : f32 to vector<16x256xf32>
    %381 = arith.subf %380, %379 : vector<16x256xf32>
    %382 = arith.mulf %353, %381 : vector<16x256xf32>
    %cst_157 = arith.constant 1.000000e+00 : f32
    %383 = vector.broadcast %cst_157 : f32 to vector<16x256xf32>
    %384 = arith.addf %383, %382 : vector<16x256xf32>
    %385 = arith.mulf %346, %384 : vector<16x256xf32>
    %c1_158 = arith.constant 1 : index
    %c0_159 = arith.constant 0 : index
    %c0_160 = arith.constant 0 : index
    %386 = vector.load %arg12[%c1_158, %c0_159, %c0_160] : memref<2x256x128xf32, #tpu.memory_space<vmem>>, vector<1x256x128xf32>
    %387 = vector.shape_cast %386 : vector<1x256x128xf32> to vector<256x128xf32>
    %cst_161 = arith.constant dense<0.000000e+00> : vector<16x128xf32>
    %388 = tpu.matmul %385, %387, %cst_161 {dimension_numbers = #tpu.dot_dimension_numbers<[1], [0], [0], [1], [0, 0, 1, 1], [], []>} : vector<16x256xf32>, vector<256x128xf32>, vector<16x128xf32> -> vector<16x128xf32>
    %c1_162 = arith.constant 1 : index
    %c0_163 = arith.constant 0 : index
    %c0_164 = arith.constant 0 : index
    %389 = vector.load %arg13[%c1_162, %c0_163, %c0_164] : memref<2x1x128xf32, #tpu.memory_space<vmem>>, vector<1x1x128xf32>
    %390 = vector.shape_cast %389 : vector<1x1x128xf32> to vector<1x128xf32>
    %391 = vector.broadcast %390 : vector<1x128xf32> to vector<16x128xf32>
    %392 = arith.addf %388, %391 : vector<16x128xf32>
    %393 = arith.addf %392, %337 : vector<16x128xf32>
    %c1_165 = arith.constant 1 : index
    %c0_166 = arith.constant 0 : index
    %c0_167 = arith.constant 0 : index
    %394 = vector.load %arg14[%c1_165, %c0_166, %c0_167] : memref<2x1x128xf32, #tpu.memory_space<vmem>>, vector<1x1x128xf32>
    %395 = vector.shape_cast %394 : vector<1x1x128xf32> to vector<1x128xf32>
    %c1_168 = arith.constant 1 : index
    %c0_169 = arith.constant 0 : index
    %c0_170 = arith.constant 0 : index
    %396 = vector.load %arg15[%c1_168, %c0_169, %c0_170] : memref<2x1x128xf32, #tpu.memory_space<vmem>>, vector<1x1x128xf32>
    %397 = vector.shape_cast %396 : vector<1x1x128xf32> to vector<1x128xf32>
    %cst_171 = arith.constant dense<0.000000e+00> : vector<16xf32>
    %398 = vector.multi_reduction <add>, %393, %cst_171 [1] : vector<16x128xf32> to vector<16xf32>
    %399 = vector.shape_cast %398 : vector<16xf32> to vector<16x1xf32>
    %cst_172 = arith.constant 1.280000e+02 : f32
    %400 = vector.broadcast %cst_172 : f32 to vector<16x1xf32>
    %401 = arith.divf %399, %400 : vector<16x1xf32>
    %402 = vector.broadcast %401 : vector<16x1xf32> to vector<16x128xf32>
    %403 = arith.subf %393, %402 : vector<16x128xf32>
    %404 = arith.mulf %403, %403 : vector<16x128xf32>
    %cst_173 = arith.constant dense<0.000000e+00> : vector<16xf32>
    %405 = vector.multi_reduction <add>, %404, %cst_173 [1] : vector<16x128xf32> to vector<16xf32>
    %406 = vector.shape_cast %405 : vector<16xf32> to vector<16x1xf32>
    %cst_174 = arith.constant 1.280000e+02 : f32
    %407 = vector.broadcast %cst_174 : f32 to vector<16x1xf32>
    %408 = arith.divf %406, %407 : vector<16x1xf32>
    %409 = vector.broadcast %401 : vector<16x1xf32> to vector<16x128xf32>
    %410 = arith.subf %393, %409 : vector<16x128xf32>
    %cst_175 = arith.constant 9.99999996E-13 : f32
    %411 = vector.broadcast %cst_175 : f32 to vector<16x1xf32>
    %412 = arith.addf %408, %411 : vector<16x1xf32>
    %413 = math.rsqrt %412 : vector<16x1xf32>
    %414 = vector.broadcast %413 : vector<16x1xf32> to vector<16x128xf32>
    %415 = arith.mulf %410, %414 : vector<16x128xf32>
    %416 = vector.broadcast %395 : vector<1x128xf32> to vector<16x128xf32>
    %417 = arith.mulf %415, %416 : vector<16x128xf32>
    %418 = vector.broadcast %397 : vector<1x128xf32> to vector<16x128xf32>
    %419 = arith.addf %417, %418 : vector<16x128xf32>
    %420 = vector.extract_strided_slice %419 {offsets = [0, 0], sizes = [1, 128], strides = [1, 1]} : vector<16x128xf32> to vector<1x128xf32>
    %421 = vector.extract_strided_slice %419 {offsets = [8, 0], sizes = [1, 128], strides = [1, 1]} : vector<16x128xf32> to vector<1x128xf32>
    %422 = tpu.concatenate %420, %421 in 0 : vector<1x128xf32>, vector<1x128xf32> -> vector<2x128xf32>
    %c0_176 = arith.constant 0 : index
    %c0_177 = arith.constant 0 : index
    %423 = vector.load %arg16[%c0_176, %c0_177] : memref<1x128xf32, #tpu.memory_space<vmem>>, vector<1x128xf32>
    %c0_178 = arith.constant 0 : index
    %c0_179 = arith.constant 0 : index
    %424 = vector.load %arg17[%c0_178, %c0_179] : memref<1x128xf32, #tpu.memory_space<vmem>>, vector<1x128xf32>
    %cst_180 = arith.constant dense<0.000000e+00> : vector<2xf32>
    %425 = vector.multi_reduction <add>, %422, %cst_180 [1] : vector<2x128xf32> to vector<2xf32>
    %426 = vector.shape_cast %425 : vector<2xf32> to vector<2x1xf32>
    %cst_181 = arith.constant 1.280000e+02 : f32
    %427 = vector.broadcast %cst_181 : f32 to vector<2x1xf32>
    %428 = arith.divf %426, %427 : vector<2x1xf32>
    %429 = vector.broadcast %428 : vector<2x1xf32> to vector<2x128xf32>
    %430 = arith.subf %422, %429 : vector<2x128xf32>
    %431 = arith.mulf %430, %430 : vector<2x128xf32>
    %cst_182 = arith.constant dense<0.000000e+00> : vector<2xf32>
    %432 = vector.multi_reduction <add>, %431, %cst_182 [1] : vector<2x128xf32> to vector<2xf32>
    %433 = vector.shape_cast %432 : vector<2xf32> to vector<2x1xf32>
    %cst_183 = arith.constant 1.280000e+02 : f32
    %434 = vector.broadcast %cst_183 : f32 to vector<2x1xf32>
    %435 = arith.divf %433, %434 : vector<2x1xf32>
    %436 = vector.broadcast %428 : vector<2x1xf32> to vector<2x128xf32>
    %437 = arith.subf %422, %436 : vector<2x128xf32>
    %cst_184 = arith.constant 9.99999974E-6 : f32
    %438 = vector.broadcast %cst_184 : f32 to vector<2x1xf32>
    %439 = arith.addf %435, %438 : vector<2x1xf32>
    %440 = math.rsqrt %439 : vector<2x1xf32>
    %441 = vector.broadcast %440 : vector<2x1xf32> to vector<2x128xf32>
    %442 = arith.mulf %437, %441 : vector<2x128xf32>
    %443 = vector.broadcast %423 : vector<1x128xf32> to vector<2x128xf32>
    %444 = arith.mulf %442, %443 : vector<2x128xf32>
    %445 = vector.broadcast %424 : vector<1x128xf32> to vector<2x128xf32>
    %446 = arith.addf %444, %445 : vector<2x128xf32>
    %c0_185 = arith.constant 0 : index
    %c0_186 = arith.constant 0 : index
    %447 = vector.load %arg18[%c0_185, %c0_186] : memref<128x128xf32, #tpu.memory_space<vmem>>, vector<128x128xf32>
    %cst_187 = arith.constant dense<0.000000e+00> : vector<2x128xf32>
    %448 = tpu.matmul %446, %447, %cst_187 {dimension_numbers = #tpu.dot_dimension_numbers<[1], [0], [0], [1], [0, 0, 1, 1], [], []>} : vector<2x128xf32>, vector<128x128xf32>, vector<2x128xf32> -> vector<2x128xf32>
    %c0_188 = arith.constant 0 : index
    %c0_189 = arith.constant 0 : index
    %449 = vector.load %arg19[%c0_188, %c0_189] : memref<1x128xf32, #tpu.memory_space<vmem>>, vector<1x128xf32>
    %450 = vector.broadcast %449 : vector<1x128xf32> to vector<2x128xf32>
    %451 = arith.addf %448, %450 : vector<2x128xf32>
    %cst_190 = arith.constant 5.000000e-01 : f32
    %452 = vector.broadcast %cst_190 : f32 to vector<2x128xf32>
    %453 = arith.mulf %452, %451 : vector<2x128xf32>
    %cst_191 = arith.constant 0.707106769 : f32
    %454 = vector.broadcast %cst_191 : f32 to vector<2x128xf32>
    %455 = arith.mulf %451, %454 : vector<2x128xf32>
    %cst_192 = arith.constant 0.000000e+00 : f32
    %456 = vector.broadcast %cst_192 : f32 to vector<2x128xf32>
    %457 = arith.cmpf oge, %455, %456 : vector<2x128xf32>
    %cst_193 = arith.constant 1.000000e+00 : f32
    %cst_194 = arith.constant -1.000000e+00 : f32
    %458 = vector.broadcast %cst_193 : f32 to vector<2x128xf32>
    %459 = vector.broadcast %cst_194 : f32 to vector<2x128xf32>
    %460 = arith.select %457, %458, %459 : vector<2x128xi1>, vector<2x128xf32>
    %461 = math.absf %455 : vector<2x128xf32>
    %cst_195 = arith.constant 0.327591091 : f32
    %462 = vector.broadcast %cst_195 : f32 to vector<2x128xf32>
    %463 = arith.mulf %462, %461 : vector<2x128xf32>
    %cst_196 = arith.constant 1.000000e+00 : f32
    %464 = vector.broadcast %cst_196 : f32 to vector<2x128xf32>
    %465 = arith.addf %464, %463 : vector<2x128xf32>
    %cst_197 = arith.constant 1.000000e+00 : f32
    %466 = vector.broadcast %cst_197 : f32 to vector<2x128xf32>
    %467 = arith.divf %466, %465 : vector<2x128xf32>
    %cst_198 = arith.constant 1.06140542 : f32
    %468 = vector.broadcast %cst_198 : f32 to vector<2x128xf32>
    %469 = arith.mulf %468, %467 : vector<2x128xf32>
    %cst_199 = arith.constant -1.45315206 : f32
    %470 = vector.broadcast %cst_199 : f32 to vector<2x128xf32>
    %471 = arith.addf %469, %470 : vector<2x128xf32>
    %472 = arith.mulf %471, %467 : vector<2x128xf32>
    %cst_200 = arith.constant 1.42141378 : f32
    %473 = vector.broadcast %cst_200 : f32 to vector<2x128xf32>
    %474 = arith.addf %472, %473 : vector<2x128xf32>
    %475 = arith.mulf %474, %467 : vector<2x128xf32>
    %cst_201 = arith.constant -0.284496725 : f32
    %476 = vector.broadcast %cst_201 : f32 to vector<2x128xf32>
    %477 = arith.addf %475, %476 : vector<2x128xf32>
    %478 = arith.mulf %477, %467 : vector<2x128xf32>
    %cst_202 = arith.constant 0.254829586 : f32
    %479 = vector.broadcast %cst_202 : f32 to vector<2x128xf32>
    %480 = arith.addf %478, %479 : vector<2x128xf32>
    %481 = arith.mulf %480, %467 : vector<2x128xf32>
    %cst_203 = arith.constant 0.000000e+00 : f32
    %482 = vector.broadcast %cst_203 : f32 to vector<2x128xf32>
    %483 = arith.subf %482, %461 : vector<2x128xf32>
    %484 = arith.mulf %483, %461 : vector<2x128xf32>
    %485 = math.exp %484 : vector<2x128xf32>
    %486 = arith.mulf %481, %485 : vector<2x128xf32>
    %cst_204 = arith.constant 1.000000e+00 : f32
    %487 = vector.broadcast %cst_204 : f32 to vector<2x128xf32>
    %488 = arith.subf %487, %486 : vector<2x128xf32>
    %489 = arith.mulf %460, %488 : vector<2x128xf32>
    %cst_205 = arith.constant 1.000000e+00 : f32
    %490 = vector.broadcast %cst_205 : f32 to vector<2x128xf32>
    %491 = arith.addf %490, %489 : vector<2x128xf32>
    %492 = arith.mulf %453, %491 : vector<2x128xf32>
    %493 = arith.addf %492, %446 : vector<2x128xf32>
    %c0_206 = arith.constant 0 : index
    %c0_207 = arith.constant 0 : index
    %494 = vector.load %arg20[%c0_206, %c0_207] : memref<128x128xf32, #tpu.memory_space<vmem>>, vector<128x128xf32>
    %cst_208 = arith.constant dense<0.000000e+00> : vector<2x128xf32>
    %495 = tpu.matmul %493, %494, %cst_208 {dimension_numbers = #tpu.dot_dimension_numbers<[1], [0], [0], [1], [0, 0, 1, 1], [], []>} : vector<2x128xf32>, vector<128x128xf32>, vector<2x128xf32> -> vector<2x128xf32>
    %c0_209 = arith.constant 0 : index
    %c0_210 = arith.constant 0 : index
    %496 = vector.load %arg21[%c0_209, %c0_210] : memref<1x128xf32, #tpu.memory_space<vmem>>, vector<1x128xf32>
    %497 = vector.broadcast %496 : vector<1x128xf32> to vector<2x128xf32>
    %498 = arith.addf %495, %497 : vector<2x128xf32>
    %cst_211 = arith.constant 5.000000e-01 : f32
    %499 = vector.broadcast %cst_211 : f32 to vector<2x128xf32>
    %500 = arith.mulf %499, %498 : vector<2x128xf32>
    %cst_212 = arith.constant 0.707106769 : f32
    %501 = vector.broadcast %cst_212 : f32 to vector<2x128xf32>
    %502 = arith.mulf %498, %501 : vector<2x128xf32>
    %cst_213 = arith.constant 0.000000e+00 : f32
    %503 = vector.broadcast %cst_213 : f32 to vector<2x128xf32>
    %504 = arith.cmpf oge, %502, %503 : vector<2x128xf32>
    %cst_214 = arith.constant 1.000000e+00 : f32
    %cst_215 = arith.constant -1.000000e+00 : f32
    %505 = vector.broadcast %cst_214 : f32 to vector<2x128xf32>
    %506 = vector.broadcast %cst_215 : f32 to vector<2x128xf32>
    %507 = arith.select %504, %505, %506 : vector<2x128xi1>, vector<2x128xf32>
    %508 = math.absf %502 : vector<2x128xf32>
    %cst_216 = arith.constant 0.327591091 : f32
    %509 = vector.broadcast %cst_216 : f32 to vector<2x128xf32>
    %510 = arith.mulf %509, %508 : vector<2x128xf32>
    %cst_217 = arith.constant 1.000000e+00 : f32
    %511 = vector.broadcast %cst_217 : f32 to vector<2x128xf32>
    %512 = arith.addf %511, %510 : vector<2x128xf32>
    %cst_218 = arith.constant 1.000000e+00 : f32
    %513 = vector.broadcast %cst_218 : f32 to vector<2x128xf32>
    %514 = arith.divf %513, %512 : vector<2x128xf32>
    %cst_219 = arith.constant 1.06140542 : f32
    %515 = vector.broadcast %cst_219 : f32 to vector<2x128xf32>
    %516 = arith.mulf %515, %514 : vector<2x128xf32>
    %cst_220 = arith.constant -1.45315206 : f32
    %517 = vector.broadcast %cst_220 : f32 to vector<2x128xf32>
    %518 = arith.addf %516, %517 : vector<2x128xf32>
    %519 = arith.mulf %518, %514 : vector<2x128xf32>
    %cst_221 = arith.constant 1.42141378 : f32
    %520 = vector.broadcast %cst_221 : f32 to vector<2x128xf32>
    %521 = arith.addf %519, %520 : vector<2x128xf32>
    %522 = arith.mulf %521, %514 : vector<2x128xf32>
    %cst_222 = arith.constant -0.284496725 : f32
    %523 = vector.broadcast %cst_222 : f32 to vector<2x128xf32>
    %524 = arith.addf %522, %523 : vector<2x128xf32>
    %525 = arith.mulf %524, %514 : vector<2x128xf32>
    %cst_223 = arith.constant 0.254829586 : f32
    %526 = vector.broadcast %cst_223 : f32 to vector<2x128xf32>
    %527 = arith.addf %525, %526 : vector<2x128xf32>
    %528 = arith.mulf %527, %514 : vector<2x128xf32>
    %cst_224 = arith.constant 0.000000e+00 : f32
    %529 = vector.broadcast %cst_224 : f32 to vector<2x128xf32>
    %530 = arith.subf %529, %508 : vector<2x128xf32>
    %531 = arith.mulf %530, %508 : vector<2x128xf32>
    %532 = math.exp %531 : vector<2x128xf32>
    %533 = arith.mulf %528, %532 : vector<2x128xf32>
    %cst_225 = arith.constant 1.000000e+00 : f32
    %534 = vector.broadcast %cst_225 : f32 to vector<2x128xf32>
    %535 = arith.subf %534, %533 : vector<2x128xf32>
    %536 = arith.mulf %507, %535 : vector<2x128xf32>
    %cst_226 = arith.constant 1.000000e+00 : f32
    %537 = vector.broadcast %cst_226 : f32 to vector<2x128xf32>
    %538 = arith.addf %537, %536 : vector<2x128xf32>
    %539 = arith.mulf %500, %538 : vector<2x128xf32>
    %540 = arith.addf %539, %493 : vector<2x128xf32>
    %c0_227 = arith.constant 0 : index
    %c0_228 = arith.constant 0 : index
    %541 = vector.load %arg22[%c0_227, %c0_228] : memref<128x128xf32, #tpu.memory_space<vmem>>, vector<128x128xf32>
    %cst_229 = arith.constant dense<0.000000e+00> : vector<2x128xf32>
    %542 = tpu.matmul %540, %541, %cst_229 {dimension_numbers = #tpu.dot_dimension_numbers<[1], [0], [0], [1], [0, 0, 1, 1], [], []>} : vector<2x128xf32>, vector<128x128xf32>, vector<2x128xf32> -> vector<2x128xf32>
    %c0_230 = arith.constant 0 : index
    %c0_231 = arith.constant 0 : index
    %543 = vector.load %arg23[%c0_230, %c0_231] : memref<1x128xf32, #tpu.memory_space<vmem>>, vector<1x128xf32>
    %544 = vector.broadcast %543 : vector<1x128xf32> to vector<2x128xf32>
    %545 = arith.addf %542, %544 : vector<2x128xf32>
    %c0_232 = arith.constant 0 : index
    %c0_233 = arith.constant 0 : index
    %546 = vector.load %arg24[%c0_232, %c0_233] : memref<2x128xf32, #tpu.memory_space<vmem>>, vector<2x128xf32>
    tpu.vector_store %arg24[%c0_232, %c0_233], %545 {strides = array<i32>} : memref<2x128xf32, #tpu.memory_space<vmem>>, vector<2x128xf32>,
    return
  }
}

</mosaic_0001>

<bundles_post_ra>
// kernel: distilbert_wrapper_forward.1
= control target key start
LH: loop header
LB: loop body
LE: loop exit
PB: predicated region body
PF: predicated region fallthrough
CT: control target
= control target key end

     0   :  { %s4977_s0 = inlined_call_operand.vmem [shape: f32[16,128], index: 0, kind: input, shape index: {}]   ;;  %s4978_s1 = inlined_call_operand.vmem [shape: f32[2,8], index: 1, kind: input, shape index: {}]   ;;  %s4979_s2 = inlined_call_operand.vmem [shape: f32[1,128], index: 2, kind: input, shape index: {}]   ;;  %s4980_s3 = inlined_call_operand.vmem [shape: f32[1,128], index: 3, kind: input, shape index: {}]   ;;  %s4981_s4 = inlined_call_operand.hbm [shape: f32[2,128,384], index: 4, kind: input, shape index: {}]   ;;  %s4982_s5 = inlined_call_operand.vmem [shape: f32[2,1,384], index: 5, kind: input, shape index: {}]   ;;  %s4983_s6 = inlined_call_operand.hbm [shape: f32[2,128,128], index: 6, kind: input, shape index: {}]   ;;  %s4984_s7 = inlined_call_operand.vmem [shape: f32[2,1,128], index: 7, kind: input, shape index: {}]   ;;  %s4985_s8 = inlined_call_operand.vmem [shape: f32[2,1,128], index: 8, kind: input, shape index: {}]   ;;  %s4986_s9 = inlined_call_operand.vmem [shape: f32[2,1,128], index: 9, kind: input, shape index: {}]   ;;  %s4987_s10 = inlined_call_operand.hbm [shape: f32[2,128,256], index: 10, kind: input, shape index: {}]   ;;  %s4988_s11 = inlined_call_operand.vmem [shape: f32[2,1,256], index: 11, kind: input, shape index: {}]   ;;  %s4989_s12 = inlined_call_operand.hbm [shape: f32[2,256,128], index: 12, kind: input, shape index: {}]   ;;  %s4990_s13 = inlined_call_operand.vmem [shape: f32[2,1,128], index: 13, kind: input, shape index: {}]   ;;  %s4991_s14 = inlined_call_operand.vmem [shape: f32[2,1,128], index: 14, kind: input, shape index: {}]   ;;  %s4992_s15 = inlined_call_operand.vmem [shape: f32[2,1,128], index: 15, kind: input, shape index: {}]   ;;  %s4993_s16 = inlined_call_operand.vmem [shape: f32[1,128], index: 16, kind: input, shape index: {}]   ;;  %s4994_s17 = inlined_call_operand.vmem [shape: f32[1,128], index: 17, kind: input, shape index: {}]   ;;  %s4995_s18 = inlined_call_operand.vmem [shape: f32[128,128], index: 18, kind: input, shape index: {}]   ;;  %s4996_s19 = inlined_call_operand.vmem [shape: f32[1,128], index: 19, kind: input, shape index: {}]   ;;  %s4997_s20 = inlined_call_operand.hbm [shape: f32[128,128], index: 20, kind: input, shape index: {}]   ;;  %s4998_s21 = inlined_call_operand.vmem [shape: f32[1,128], index: 21, kind: input, shape index: {}]   ;;  %s4999_s22 = inlined_call_operand.hbm [shape: f32[128,128], index: 22, kind: input, shape index: {}]   ;;  %s5000_s23 = inlined_call_operand.vmem [shape: f32[1,128], index: 23, kind: input, shape index: {}]   ;;  %s5001_s24 = inlined_call_operand.hbm [shape: f32[2,128], index: 24, kind: output, shape index: {}]  }
   0x1   :  { %5008 = sst [smem:[#allocation19_spill]] %s4977_s0 }
   0x2   :  { %5009 = sst [smem:[#allocation20_spill]] %s4978_s1 }
   0x3   :  { %5010 = sst [smem:[#allocation21_spill]] %s4979_s2 }
   0x4   :  { %5011 = sst [smem:[#allocation22_spill]] %s4980_s3 }
   0x5   :  { %5012 = sst [smem:[#allocation23_spill]] %s4981_s4 }
   0x6   :  { %5013 = sst [smem:[#allocation24_spill]] %s4982_s5 }
   0x7   :  { %5014 = sst [smem:[#allocation25_spill]] %s4983_s6 }
   0x8   :  { %5015 = sst [smem:[#allocation26_spill]] %s4984_s7 }
   0x9   :  { %5016 = sst [smem:[#allocation27_spill]] %s4985_s8 }
   0xa   :  { %29 = vsyncpa [#allocation3], 0 }
   0xb   :  { %30 = vsyncpa [#allocation6], 0 }
   0xc   :  { %31 = vsyncpa [#allocation9], 0 }
   0xd   :  { %32 = vsyncpa [#allocation12], 0 }
   0xe   :  { %33 = vsyncpa [#allocation4], 0  ;;  %s4305_s5 = smov [#allocation5]  }
   0xf   :  { %s61_s26 = sshll.u32 %s4305_s5, 4  ;;  %s62_s26 = int_to_ptr.vmem [resolvable:$true] %s61_s26 }
  0x10   :  { %s4163_s27 = scalar_lea.vmem %s62_s26, 4096  ;;  %p4168_p1 = scmp.lt.s32.totalorder %s62_s26, %s62_s26 }
  0x11   :  { %p4164_p0 = scmp.ne.s32.totalorder %s62_s26, %s4163_s27  ;;  %p4169_p2 = scmp.lt.s32.totalorder %s4163_s27, %s4163_s27 }
  0x13   :  { %p4170_p3 = por %p4169_p2, %p4168_p1 }
  0x15   :  { %p4171_p4 = pnand %p4170_p3, %p4164_p0 }
  0x17   :  { %4174 = shalt.err (!%p4171_p4)
}
  0x18   :  { %s5006_s28 = smov 128   ;;  %s4307_s6 = smov 8  }
  0x19   :  { %s5017_s0 = sld [smem:[#allocation25_spill]]  ;;  %s4308_s7 = smov [#allocation8]  }
  0x1a   :  { %s93_s30 = sshll.u32 %s4308_s7, 4  ;;  %s4309_s3 = smov [#allocation2]   ;;  %s94_s30 = int_to_ptr.vmem [resolvable:$true] %s93_s30 }
  0x1b   :  { %s47_s25 = sshll.u32 %s4309_s3, 4  ;;  %s4183_s8 = scalar_lea.vmem %s94_s30, 8192  ;;  %s48_s25 = int_to_ptr.vmem [resolvable:$true] %s47_s25 }
  0x1c   :  { %p4184_p5 = scmp.ne.s32.totalorder %s94_s30, %s4183_s8  ;;  %p4188_p6 = scmp.lt.s32.totalorder %s94_s30, %s94_s30 }
  0x1d   :  { %p4189_p7 = scmp.lt.s32.totalorder %s4183_s8, %s4183_s8 }
  0x1f   :  { %67 = dma.hbm_to_vmem [thread:$0]  %s5017_s0, 4096, %s62_s26, [#allocation6], %s5006_s28, %s5006_s28, %s4307_s6  }
  0x20   :  { %p4190_p8 = por %p4189_p7, %p4188_p6 }
  0x22   :  { %p4191_p9 = pnand %p4190_p8, %p4184_p5 }
  0x24   :  { %4194 = shalt.err (!%p4191_p9)
}
  0x25   :  { %99 = dma.hbm_to_vmem [thread:$0]  %s4989_s12, 8192, %s94_s30, [#allocation9], %s5006_s28, %s5006_s28, %s4307_s6  }
  0x26   :  { %s4203_s5 = scalar_lea.vmem %s48_s25, 12288  ;;  %p4208_p11 = scmp.lt.s32.totalorder %s48_s25, %s48_s25 }
  0x27   :  { %p4204_p10 = scmp.ne.s32.totalorder %s48_s25, %s4203_s5  ;;  %p4209_p12 = scmp.lt.s32.totalorder %s4203_s5, %s4203_s5 }
  0x29   :  { %p4210_p13 = por %p4209_p12, %p4208_p11 }
  0x2b   :  { %p4211_p0 = pnand %p4210_p13, %p4204_p10 }
  0x2d   :  { %4214 = shalt.err (!%p4211_p0)
}
  0x2e   :  { %s4310_s26 = smov 384   ;;  %s4311_s27 = smov 24  }
  0x2f   :  { %s5018_s0 = sld [smem:[#allocation23_spill]]  ;;  %s4312_s7 = smov [#allocation7]  }
  0x30   :  { %s79_s3 = sshll.u32 %s4312_s7, 4  ;;  %s80_s3 = int_to_ptr.vmem [resolvable:$true] %s79_s3 }
  0x31   :  { %s4223_s8 = scalar_lea.vmem %s80_s3, 8192  ;;  %p4228_p2 = scmp.lt.s32.totalorder %s80_s3, %s80_s3 }
  0x32   :  { %p4224_p1 = scmp.ne.s32.totalorder %s80_s3, %s4223_s8  ;;  %p4229_p3 = scmp.lt.s32.totalorder %s4223_s8, %s4223_s8 }
  0x34   :  { %p4230_p4 = por %p4229_p3, %p4228_p2 }
  0x35   :  { %53 = dma.hbm_to_vmem [thread:$0]  %s5018_s0, 12288, %s48_s25, [#allocation3], %s4310_s26, %s4310_s26, %s4311_s27  }
  0x36   :  { %p4231_p5 = pnand %p4230_p4, %p4224_p1 }
  0x38   :  { %4234 = shalt.err (!%p4231_p5)
}
  0x39   :  { %s4313_s12 = smov 256   ;;  %s4314_s30 = smov 16  }
  0x3a   :  { %85 = dma.hbm_to_vmem [thread:$0]  %s4987_s10, 8192, %s80_s3, [#allocation6], %s4313_s12, %s4313_s12, %s4314_s30  }
  0x3b   :  { %s4315_s5 = smov [#allocation10]   ;;  %s4316_s2 = smov [#allocation11]  }
  0x3c   :  { %s119_s28 = sshll.u32 %s4315_s5, 4  ;;  %s133_s25 = sshll.u32 %s4316_s2, 4  ;;  %s120_s28 = int_to_ptr.vmem [resolvable:$true] %s119_s28  ;;  %s134_s25 = int_to_ptr.vmem [resolvable:$true] %s133_s25 }
  0x3d   :  { %s4243_s26 = scalar_lea.vmem %s120_s28, 2048  ;;  %p4248_p7 = scmp.lt.s32.totalorder %s120_s28, %s120_s28 }
  0x3e   :  { %p4244_p6 = scmp.ne.s32.totalorder %s120_s28, %s4243_s26  ;;  %p4249_p8 = scmp.lt.s32.totalorder %s4243_s26, %s4243_s26 }
  0x40   :  { %p4250_p9 = por %p4249_p8, %p4248_p7 }
  0x42   :  { %p4251_p10 = pnand %p4250_p9, %p4244_p6 }
  0x44   :  { %4254 = shalt.err (!%p4251_p10)
}
  0x45   :  { %s5019_s27 = smov 128   ;;  %s4263_s10 = scalar_lea.vmem %s134_s25, 2048 }
  0x46   :  { %125 = dma.hbm_to_vmem [thread:$0]  %s4997_s20, 2048, %s120_s28, [#allocation9], %s5019_s27, %s5019_s27, %s4307_s6  }
  0x47   :  { %p4264_p11 = scmp.ne.s32.totalorder %s134_s25, %s4263_s10  ;;  %p4268_p12 = scmp.lt.s32.totalorder %s134_s25, %s134_s25 }
  0x48   :  { %p4269_p13 = scmp.lt.s32.totalorder %s4263_s10, %s4263_s10 }
  0x4a   :  { %p4270_p0 = por %p4269_p13, %p4268_p12 }
  0x4c   :  { %p4271_p1 = pnand %p4270_p0, %p4264_p11 }
  0x4e   :  { %4274 = shalt.err (!%p4271_p1)
}
  0x4f   :  { %139 = dma.hbm_to_vmem [thread:$0]  %s4999_s22, 2048, %s134_s25, [#allocation12], %s5019_s27, %s5019_s27, %s4307_s6  }
  0x50   :  { %4295 = dma.done.wait [#allocation3], 12288  }
  0x51   :  { %4296 = vsyncadd [#allocation3], 4294955008 }
  0x52   :  { %4297 = dma.done.wait [#allocation6], 12288  }
  0x53   :  { %4298 = vsyncadd [#allocation6], 4294955008 }
  0x54   :  { %4299 = dma.done.wait [#allocation9], 10240  }
  0x55   :  { %4300 = vsyncadd [#allocation9], 4294957056 }
  0x56   :  { %4301 = dma.done.wait [#allocation12], 2048  }
  0x57   :  { %4302 = vsyncadd [#allocation12], 4294965248  ;;  %s5020_s8 = sld [smem:[#allocation19_spill]]  ;;  %v250_v2 = vld [vmem:[#allocation2 + $0x170] sm:$0xff]  ;;  %v249_v3 = vld [vmem:[#allocation2 + $0x168] sm:$0xff]  ;;  %v4317_v56 = vmov 0.0  }
  0x58   :  { %v247_v4 = vld [vmem:[#allocation2 + $0x158] sm:$0xff]  ;;  %269 = vmatprep.subr.mxu0 %v250_v2  ;;  %v246_v5 = vld [vmem:[#allocation2 + $0x150] sm:$0xff]  ;;  %v244_v7 = vld [vmem:[#allocation2 + $0x140] sm:$0xff]  ;;  %333 = vmatprep.mubr.f32.mxu0 %v4317_v56  ;;  %s5021_s4 = sld [smem:[#allocation21_spill]]  ;;  %vm4318_vm0 = vmmov 0   ;;  %vm427_vm1 = vcmask 523264  }
  0x59   :  { %v251_v6 = vld [vmem:[#allocation2 + $0x178] sm:$0xff]  ;;  %270 = vmatpush1.msra.mxu0 %v249_v3  ;;  %v248_v8 = vld [vmem:[#allocation2 + $0x160] sm:$0xff]  ;;  %v241_v10 = vld [vmem:[#allocation2 + $0x128] sm:$0xff]  ;;  %s5022_s2 = sld [smem:[#allocation22_spill]]  ;;  %s4319_s29 = smov 64   ;;  %vm504_vm2 = vcmask 64512  }
  0x5a   :  { %3709 = vmatprep.subr.mxu1 %v251_v6  ;;  %271 = vmatprep.subr.mxu0 %v247_v4  ;;  %v243_v9 = vld [vmem:[#allocation2 + $0x138] sm:$0xff]  ;;  %v240_v11 = vld [vmem:[#allocation2 + $0x120] sm:$0xff]  ;;  %v238_v20 = vld [vmem:[#allocation2 + $0x110] sm:$0xff]  ;;  %s5023_s27 = sld [smem:[#allocation24_spill]]  ;;  %vm3041_vm11 = vcmask 1040384   ;;  %vm3045_vm12 = vcmask 1041408  }
  0x5b   :  { %3710 = vmatpush3.msra.mxu1 %v251_v6  ;;  %272 = vmatpush1.msra.mxu0 %v246_v5  ;;  %v245_v21 = vld [vmem:[#allocation2 + $0x148] sm:$0xff]  ;;  %v235_v23 = vld [vmem:[#allocation2 + $0xf8] sm:$0xff]  ;;  %v242_v24 = vld [vmem:[#allocation2 + $0x130] sm:$0xff]  ;;  %s5024_s7 = sld [smem:[#allocation20_spill]] }
  0x5c   :  { %3711 = vmatprep.subr.mxu1 %v248_v8  ;;  %273 = vmatprep.subr.mxu0 %v244_v7  ;;  %v237_v22 = vld [vmem:[#allocation2 + $0x108] sm:$0xff]  ;;  %v234_v25 = vld [vmem:[#allocation2 + $0xf0] sm:$0xff]  ;;  %v232_v26 = vld [vmem:[#allocation2 + $0xe0] sm:$0xff]  ;;  %s5025_s28 = sld [smem:[#allocation26_spill]] }
  0x5d   :  { %v160_v0 = vld [vmem:[%s5020_s8] sm:$0xff]  ;;  %v161_v1 = vld [vmem:[%s5020_s8 + $0x8] sm:$0xff]  ;;  %3712 = vmatpush3.msra.mxu1 %v248_v8  ;;  %274 = vmatpush1.msra.mxu0 %v243_v9  ;;  %v239_v27 = vld [vmem:[#allocation2 + $0x118] sm:$0xff]  ;;  %s5026_s30 = sld [smem:[#allocation27_spill]] }
  0x5e   :  { %164 = vadd.xlane.f32.xlu0 %v160_v0  ;;  %275 = vmatprep.subr.mxu0 %v241_v10  ;;  %v231_v28 = vld [vmem:[#allocation2 + $0xd8] sm:$0xff]  ;;  %v229_v29 = vld [vmem:[#allocation2 + $0xc8] sm:$0xff]  ;;  %v236_v30 = vld [vmem:[#allocation2 + $0x100] sm:$0xff] }
  0x5f   :  { %276 = vmatpush1.msra.mxu0 %v240_v11  ;;  %3713 = vmatprep.subr.mxu1 %v245_v21  ;;  %v228_v31 = vld [vmem:[#allocation2 + $0xc0] sm:$0xff]  ;;  %v226_v32 = vld [vmem:[#allocation2 + $0xb0] sm:$0xff]  ;;  %v233_v33 = vld [vmem:[#allocation2 + $0xe8] sm:$0xff]  ;;  %v254_v11 = vlaneseq }
  0x60   :  { %277 = vmatprep.subr.mxu0 %v238_v20  ;;  %3714 = vmatpush3.msra.mxu1 %v245_v21  ;;  %v225_v34 = vld [vmem:[#allocation2 + $0xa8] sm:$0xff]  ;;  %v223_v35 = vld [vmem:[#allocation2 + $0x98] sm:$0xff]  ;;  %v230_v36 = vld [vmem:[#allocation2 + $0xd0] sm:$0xff] }
  0x61   :  { %278 = vmatpush1.msra.mxu0 %v237_v22  ;;  %3715 = vmatprep.subr.mxu1 %v242_v24  ;;  %v222_v37 = vld [vmem:[#allocation2 + $0x90] sm:$0xff]  ;;  %v220_v38 = vld [vmem:[#allocation2 + $0x80] sm:$0xff]  ;;  %v227_v39 = vld [vmem:[#allocation2 + $0xb8] sm:$0xff] }
  0x62   :  { %166 = vadd.xlane.f32.xlu0 %v161_v1  ;;  %279 = vmatprep.subr.mxu0 %v235_v23  ;;  %v219_v40 = vld [vmem:[#allocation2 + $0x78] sm:$0xff]  ;;  %v217_v41 = vld [vmem:[#allocation2 + $0x68] sm:$0xff]  ;;  %v224_v42 = vld [vmem:[#allocation2 + $0xa0] sm:$0xff] }
  0x63   :  { %280 = vmatpush1.msra.mxu0 %v234_v25  ;;  %3716 = vmatpush3.msra.mxu1 %v242_v24  ;;  %v216_v43 = vld [vmem:[#allocation2 + $0x60] sm:$0xff]  ;;  %v214_v44 = vld [vmem:[#allocation2 + $0x50] sm:$0xff]  ;;  %v221_v45 = vld [vmem:[#allocation2 + $0x88] sm:$0xff] }
  0x64   :  { %281 = vmatprep.subr.mxu0 %v232_v26  ;;  %3717 = vmatprep.subr.mxu1 %v239_v27  ;;  %v213_v46 = vld [vmem:[#allocation2 + $0x48] sm:$0xff]  ;;  %v211_v47 = vld [vmem:[#allocation2 + $0x38] sm:$0xff]  ;;  %v218_v48 = vld [vmem:[#allocation2 + $0x70] sm:$0xff] }
  0x65   :  { %282 = vmatpush1.msra.mxu0 %v231_v28  ;;  %3718 = vmatpush3.msra.mxu1 %v239_v27  ;;  %v210_v49 = vld [vmem:[#allocation2 + $0x30] sm:$0xff]  ;;  %v208_v50 = vld [vmem:[#allocation2 + $0x20] sm:$0xff]  ;;  %v215_v51 = vld [vmem:[#allocation2 + $0x58] sm:$0xff] }
  0x66   :  { %283 = vmatprep.subr.mxu0 %v229_v29  ;;  %3719 = vmatprep.subr.mxu1 %v236_v30  ;;  %v207_v52 = vld [vmem:[#allocation2 + $0x18] sm:$0xff]  ;;  %v205_v53 = vld [vmem:[#allocation2 + $0x8] sm:$0xff]  ;;  %v212_v54 = vld [vmem:[#allocation2 + $0x40] sm:$0xff] }
  0x67   :  { %284 = vmatpush1.msra.mxu0 %v228_v31  ;;  %3720 = vmatpush3.msra.mxu1 %v236_v30  ;;  %v204_v55 = vld [vmem:[#allocation2] sm:$0xff]  ;;  %v209_v57 = vld [vmem:[#allocation2 + $0x28] sm:$0xff]  ;;  %v206_v58 = vld [vmem:[#allocation2 + $0x10] sm:$0xff] }
  0x68   :  { %285 = vmatprep.subr.mxu0 %v226_v32  ;;  %3721 = vmatprep.subr.mxu1 %v233_v33  ;;  %v3427_v2 = vld [vmem:[%s5021_s4] ss:$0 sm:$0xff] }
  0x69   :  { %286 = vmatpush1.msra.mxu0 %v225_v34  ;;  %3722 = vmatpush3.msra.mxu1 %v233_v33  ;;  %v3428_v4 = vld [vmem:[%s5022_s2] ss:$0 sm:$0xff] }
  0x6a   :  { %287 = vmatprep.subr.mxu0 %v223_v35  ;;  %3723 = vmatprep.subr.mxu1 %v230_v36 }
  0x6b   :  { %288 = vmatpush1.msra.mxu0 %v222_v37  ;;  %3724 = vmatpush3.msra.mxu1 %v230_v36 }
  0x6c   :  { %289 = vmatprep.subr.mxu0 %v220_v38  ;;  %3725 = vmatprep.subr.mxu1 %v227_v39  ;;  %v203_v38 = vld [vmem:[%s5024_s7] sm:$0x3] }
  0x6d   :  { %290 = vmatpush1.msra.mxu0 %v219_v40  ;;  %3726 = vmatpush3.msra.mxu1 %v227_v39 }
  0x6e   :  { %291 = vmatprep.subr.mxu0 %v217_v41  ;;  %3727 = vmatprep.subr.mxu1 %v224_v42 }
  0x6f   :  { %292 = vmatpush1.msra.mxu0 %v216_v43  ;;  %3728 = vmatpush3.msra.mxu1 %v224_v42 }
  0x70   :  { %293 = vmatprep.subr.mxu0 %v214_v44  ;;  %3729 = vmatprep.subr.mxu1 %v221_v45 }
  0x71   :  { %294 = vmatpush1.msra.mxu0 %v213_v46  ;;  %3730 = vmatpush3.msra.mxu1 %v221_v45 }
  0x72   :  { %295 = vmatprep.subr.mxu0 %v211_v47  ;;  %3731 = vmatprep.subr.mxu1 %v218_v48 }
  0x73   :  { %296 = vmatpush1.msra.mxu0 %v210_v49  ;;  %3732 = vmatpush3.msra.mxu1 %v218_v48 }
  0x74   :  { %297 = vmatprep.subr.mxu0 %v208_v50  ;;  %3733 = vmatprep.subr.mxu1 %v215_v51 }
  0x75   :  { %298 = vmatpush1.msra.mxu0 %v207_v52  ;;  %3734 = vmatpush3.msra.mxu1 %v215_v51 }
  0x76   :  { %299 = vmatprep.subr.mxu0 %v205_v53  ;;  %3735 = vmatprep.subr.mxu1 %v212_v54 }
  0x77   :  { %300 = vmatpush1.msra.mxu0 %v204_v55  ;;  %3736 = vmatpush3.msra.mxu1 %v212_v54 }
  0x78   :  { %3749 = vmatprep.subr.mxu0 %v4317_v56  ;;  %3737 = vmatprep.subr.mxu1 %v209_v57 }
  0x79   :  { %3738 = vmatpush3.msra.mxu1 %v209_v57 }
  0x7a   :  { %3739 = vmatprep.subr.mxu1 %v206_v58 }
  0x7b   :  { %3740 = vmatpush3.msra.mxu1 %v206_v58 }
  0x7c   :  { %3744 = vmatprep.subr.mxu1 %v4317_v56 }
  0xe7   :  { %v165_v12 = vpop.xlane.xlu0 %164 }
  0xe8   :  { %v169_v13 = vmul.f32 0.0078125, %v165_v12  ;;  %v4515_v12 = vshrl.u32 %v254_v11, 7 }
  0xea   :  { %v4483_v14 = vsub.f32 %v160_v0, %v169_v13  ;;  %v4518_v13 = vsub.s32 0, %v4515_v12 }
  0xeb   :  { %v167_v15 = vpop.xlane.xlu0 %166 }
  0xec   :  { %v170_v16 = vmul.f32 0.0078125, %v167_v15  ;;  %v173_v17 = vmul.f32 %v4483_v14, %v4483_v14  ;;  %v4524_v15 = vsub.s32 1, %v4515_v12  ;;  %v4562_v39 = vrot.slane %v203_v38, %v4518_v13 }
  0xee   :  { %v4487_v18 = vsub.f32 %v161_v1, %v170_v16  ;;  %175 = vadd.xlane.f32.xlu1 %v173_v17  ;;  %v264_v17 = vsub.s32 2, %v4515_v12  ;;  %v4568_v46 = vrot.slane %v203_v38, %v4524_v15  ;;  %v1107_v38 = vld [vmem:[#allocation5 + $0x60] sm:$0xff] }
  0xf0   :  { %v174_v19 = vmul.f32 %v4487_v18, %v4487_v18 }
  0xf2   :  { %177 = vadd.xlane.f32.xlu1 %v174_v19 }
 0x177   :  { %v176_v59 = vpop.xlane.xlu1 %175 }
 0x178   :  { %v179_v60 = vmul.f32 0.0078125, %v176_v59 }
 0x17a   :  { %v181_v61 = vadd.f32 1e-12, %v179_v60 }
 0x17b   :  { %v178_v62 = vpop.xlane.xlu1 %177 }
 0x17c   :  { %4061 = vrsqrt.f32 %v181_v61  ;;  %v180_v63 = vmul.f32 0.0078125, %v178_v62 }
 0x17e   :  { %v182_v0 = vadd.f32 1e-12, %v180_v63 }
 0x180   :  { %4063 = vrsqrt.f32 %v182_v0 }
 0x189   :  { %v4062_v1 = vpop.eup %4061 }
 0x18a   :  { %v185_v3 = vmul.f32 %v4062_v1, %v4483_v14  ;;  %v252_v14 = vld [vmem:[%s5023_s27] sm:$0x7] }
 0x18b   :  { %v257_v16 = vrot.slane %v252_v14, %v4518_v13  ;;  %v265_v21 = vrot.slane %v252_v14, %v264_v17 }
 0x18c   :  { %v193_v5 = vmul.f32 %v3427_v2, %v185_v3 }
 0x18d   :  { %v4064_v6 = vpop.eup %4063 }
 0x18e   :  { %v4501_v7 = vadd.f32 %v3428_v4, %v193_v5  ;;  %v186_v8 = vmul.f32 %v4064_v6, %v4487_v18  ;;  %v261_v18 = vrot.slane %v252_v14, %v4524_v15 }
 0x190   :  { %334 = vmatmul.mubr.f32.vlgmr.msra.gmra.mxu0 %v4501_v7  ;;  %3741 = vmatprep.mubr.f32.mxu1 %v4501_v7  ;;  %v194_v9 = vmul.f32 %v3427_v2, %v186_v8 }
 0x191   :  { %339 = vmatprep.mubr.f32.mxu0 %v4317_v56 }
 0x192   :  { %v4507_v10 = vadd.f32 %v3428_v4, %v194_v9 }
 0x194   :  { %340 = vmatmul.mubr.f32.gmra.mxu0 %v4507_v10  ;;  %3742 = vmatmul.mubr.f32.vlgmr.msra.gmra.mxu1 %v4507_v10 }
 0x195   :  { %3746 = vmatprep.mubr.msk.f32.mxu1 %vm4318_vm0, %v4317_v56  ;;  %3751 = vmatprep.mubr.msk.f32.mxu0 %vm4318_vm0, %v4317_v56 }
 0x250   :  { %v335_v19 = vpop.f32.mrf.mxu0 }
 0x251   :  { %v336_v20 = vadd.f32 %v335_v19, %v257_v16 }
 0x252   :  { %v337_v22 = vpop.f32.mrf.mxu0 }
 0x253   :  { %v421_v23 = vmul.f32 0.125, %v336_v20  ;;  %v338_v24 = vadd.f32 %v337_v22, %v261_v18 }
 0x254   :  { %v341_v25 = vpop.f32.mrf.mxu0  ;;  %v3743_v26 = vpop.f32.mrf.mxu1 }
 0x255   :  { %v4531_v27 = vadd.f32 %v3743_v26, %v265_v21  ;;  %591 = vrot.lane.b32.xlu0 %v338_v24, %s4319_s29  ;;  %589 = vrot.lane.b32.xlu1 %v421_v23, %s4319_s29  ;;  %v342_v32 = vadd.f32 %v341_v25, %v257_v16 }
 0x256   :  { %3745 = vmatpush3.xpose.msk.msra.mxu1 %vm427_vm1, %v338_v24  ;;  %v343_v28 = vpop.f32.mrf.mxu0  ;;  %v412_v29 = vpop.f32.mrf.mxu1 }
 0x257   :  { %v344_v30 = vadd.f32 %v343_v28, %v261_v18  ;;  %v4536_v31 = vadd.f32 %v412_v29, %v265_v21  ;;  %3754 = vmatprep.subr.mxu1 %v4317_v56  ;;  %v422_v33 = vmul.f32 0.125, %v342_v32 }
 0x259   :  { %3747 = vmatmul.mubr.msk.f32.vlgmr.msra.gmra.mxu1 %vm427_vm1, %v421_v23  ;;  %3750 = vmatpush3.msra.mxu0 %v4536_v31 }
 0x25a   :  { %926 = vrot.lane.b32.xlu1 %v344_v30, %s4319_s29  ;;  %3756 = vmatprep.mubr.msk.f32.mxu1 %vm4318_vm0, %v4317_v56 }
 0x25b   :  { %3759 = vmatprep.subr.mxu0 %v4317_v56 }
 0x25e   :  { %924 = vrot.lane.b32.xlu1 %v422_v33, %s4319_s29 }
 0x2c7   :  { %v590_v34 = vpop.permute.xlu1 %589  ;;  %v592_v35 = vpop.permute.xlu0 %591 }
 0x2c8   :  { %3755 = vmatpush3.xpose.msk.msra.mxu1 %vm427_vm1, %v592_v35  ;;  %v1109_v35 = vld [vmem:[#allocation5 + $0x70] sm:$0xff] }
 0x2c9   :  { %3764 = vmatprep.subr.mxu1 %v4317_v56 }
 0x2cb   :  { %3757 = vmatmul.mubr.msk.f32.vlgmr.msra.gmra.mxu1 %vm427_vm1, %v590_v34 }
 0x2cc   :  { %v927_v36 = vpop.permute.xlu1 %926  ;;  %3765 = vmatpush3.xpose.msk.msra.mxu1 %vm427_vm1, %v344_v30  ;;  %3766 = vmatprep.mubr.msk.f32.mxu1 %vm4318_vm0, %v4317_v56 }
 0x2cd   :  { %3774 = vmatprep.subr.mxu1 %v4317_v56 }
 0x2cf   :  { %3767 = vmatmul.mubr.msk.f32.vlgmr.msra.gmra.mxu1 %vm427_vm1, %v422_v33 }
 0x2d0   :  { %3775 = vmatpush3.xpose.msk.msra.mxu1 %vm427_vm1, %v927_v36  ;;  %3776 = vmatprep.mubr.msk.f32.mxu1 %vm4318_vm0, %v4317_v56  ;;  %v925_v37 = vpop.permute.xlu1 %924  ;;  %v1108_v36 = vld [vmem:[#allocation5 + $0x68] sm:$0xff] }
 0x2d3   :  { %3777 = vmatmul.mubr.msk.f32.vlgmr.msra.gmra.mxu1 %vm427_vm1, %v925_v37 }
 0x319   :  { %v500_v40 = vpop.f32.mrf.mxu1 }
 0x31a   :  { %v501_v41 = vadd.f32 %v500_v40, %v4562_v39 }
 0x31b   :  { %v3748_v42 = vpop.f32.mrf.mxu1 }
 0x31c   :  { %v505_v43 = vsel %vm504_vm2, %v501_v41, -inf  ;;  %v1105_v42 = vld [vmem:[#allocation5 + $0x50] sm:$0xff] }
 0x31d   :  { %506 = vmax.xlane.f32.xlu0 %v505_v43  ;;  %v1104_v43 = vld [vmem:[#allocation5 + $0x48] sm:$0xff] }
 0x38b   :  { %v663_v44 = vpop.f32.mrf.mxu1 }
 0x38c   :  { %v664_v45 = vadd.f32 %v663_v44, %v4562_v39  ;;  %v1103_v44 = vld [vmem:[#allocation5 + $0x40] sm:$0xff] }
 0x38d   :  { %v3758_v47 = vpop.f32.mrf.mxu1 }
 0x38e   :  { %v667_v48 = vsel %vm504_vm2, %v664_v45, -inf  ;;  %v1101_v47 = vld [vmem:[#allocation5 + $0x30] sm:$0xff] }
 0x38f   :  { %668 = vmax.xlane.f32.xlu1 %v667_v48  ;;  %v836_v49 = vpop.f32.mrf.mxu1  ;;  %v1100_v48 = vld [vmem:[#allocation5 + $0x28] sm:$0xff] }
 0x390   :  { %v837_v50 = vadd.f32 %v836_v49, %v4568_v46  ;;  %v1099_v49 = vld [vmem:[#allocation5 + $0x20] sm:$0xff] }
 0x391   :  { %v3768_v51 = vpop.f32.mrf.mxu1 }
 0x392   :  { %v840_v52 = vsel %vm504_vm2, %v837_v50, -inf  ;;  %v1097_v51 = vld [vmem:[#allocation5 + $0x10] sm:$0xff] }
 0x393   :  { %841 = vmax.xlane.f32.xlu0 %v840_v52  ;;  %v998_v53 = vpop.f32.mrf.mxu1  ;;  %v1096_v52 = vld [vmem:[#allocation5 + $0x8] sm:$0xff] }
 0x394   :  { %v999_v54 = vadd.f32 %v998_v53, %v4568_v46  ;;  %v1095_v53 = vld [vmem:[#allocation5] sm:$0xff] }
 0x395   :  { %v3778_v55 = vpop.f32.mrf.mxu1 }
 0x396   :  { %v1002_v57 = vsel %vm504_vm2, %v999_v54, -inf }
 0x397   :  { %1003 = vmax.xlane.f32.xlu0 %v1002_v57 }
 0x3a6   :  { %v507_v58 = vpop.xlane.xlu0 %506 }
 0x3a7   :  { %v508_v59 = vsub.f32 %v501_v41, %v507_v58  ;;  %v1106_v41 = vld [vmem:[#allocation5 + $0x58] sm:$0xff] }
 0x3a9   :  { %v509_v60 = vmul.f32 1.442695, %v508_v59 }
 0x3ab   :  { %4065 = vpow2.f32 %v509_v60 }
 0x3b8   :  { %v4066_v61 = vpop.eup %4065 }
 0x3b9   :  { %v511_v62 = vsel %vm504_vm2, %v4066_v61, 0.0 }
 0x3ba   :  { %512 = vadd.xlane.f32.xlu0 %v511_v62 }
 0x418   :  { %v669_v63 = vpop.xlane.xlu1 %668 }
 0x419   :  { %v670_v0 = vsub.f32 %v664_v45, %v669_v63  ;;  %v1102_v45 = vld [vmem:[#allocation5 + $0x38] sm:$0xff] }
 0x41b   :  { %v671_v1 = vmul.f32 1.442695, %v670_v0 }
 0x41c   :  { %v842_v2 = vpop.xlane.xlu0 %841 }
 0x41d   :  { %4067 = vpow2.f32 %v671_v1  ;;  %v843_v3 = vsub.f32 %v837_v50, %v842_v2  ;;  %v1098_v50 = vld [vmem:[#allocation5 + $0x18] sm:$0xff] }
 0x41f   :  { %v844_v4 = vmul.f32 1.442695, %v843_v3  ;;  %v3441_v3 = vld [vmem:[%s5025_s28] ss:$0 sm:$0xff] }
 0x420   :  { %v1004_v5 = vpop.xlane.xlu0 %1003 }
 0x421   :  { %4069 = vpow2.f32 %v844_v4  ;;  %v1005_v6 = vsub.f32 %v999_v54, %v1004_v5 }
 0x423   :  { %v1006_v8 = vmul.f32 1.442695, %v1005_v6 }
 0x425   :  { %4071 = vpow2.f32 %v1006_v8 }
 0x42a   :  { %v4068_v9 = vpop.eup %4067 }
 0x42b   :  { %v673_v11 = vsel %vm504_vm2, %v4068_v9, 0.0 }
 0x42c   :  { %674 = vadd.xlane.f32.xlu1 %v673_v11  ;;  %v1266_v11 = vld [vmem:[#allocation7 + $0xf8] sm:$0xff] }
 0x42e   :  { %v4070_v14 = vpop.eup %4069 }
 0x42f   :  { %v846_v16 = vsel %vm504_vm2, %v4070_v14, 0.0 }
 0x430   :  { %847 = vadd.xlane.f32.xlu0 %v846_v16  ;;  %v1264_v16 = vld [vmem:[#allocation7 + $0xe8] sm:$0xff] }
 0x432   :  { %v4072_v18 = vpop.eup %4071 }
 0x433   :  { %v1008_v19 = vsel %vm504_vm2, %v4072_v18, 0.0 }
 0x434   :  { %1009 = vadd.xlane.f32.xlu1 %v1008_v19  ;;  %v1262_v19 = vld [vmem:[#allocation7 + $0xd8] sm:$0xff] }
 0x443   :  { %v513_v20 = vpop.xlane.xlu0 %512 }
 0x444   :  { %4073 = vrcp.f32 %v513_v20  ;;  %v1261_v20 = vld [vmem:[#allocation7 + $0xd0] sm:$0xff] }
 0x445   :  { %1014 = vrot.lane.b32.xlu1 %v4531_v27, %s4319_s29 }
 0x446   :  { %679 = vrot.lane.b32.xlu0 %v4536_v31, %s4319_s29 }
 0x451   :  { %v4074_v21 = vpop.eup %4073 }
 0x452   :  { %v515_v22 = vmul.f32 %v4074_v21, %v4066_v61  ;;  %v1260_v21 = vld [vmem:[#allocation7 + $0xc8] sm:$0xff] }
 0x454   :  { %3752 = vmatmul.mubr.msk.f32.vlgmr.msra.gmra.mxu0 %vm504_vm2, %v515_v22  ;;  %v1259_v22 = vld [vmem:[#allocation7 + $0xc0] sm:$0xff] }
 0x455   :  { %3761 = vmatprep.mubr.msk.f32.mxu0 %vm4318_vm0, %v4317_v56 }
 0x4b5   :  { %v675_v23 = vpop.xlane.xlu1 %674 }
 0x4b6   :  { %4075 = vrcp.f32 %v675_v23 }
 0x4b9   :  { %v848_v24 = vpop.xlane.xlu0 %847 }
 0x4ba   :  { %4077 = vrcp.f32 %v848_v24 }
 0x4bd   :  { %v1010_v25 = vpop.xlane.xlu1 %1009  ;;  %v680_v26 = vpop.permute.xlu0 %679 }
 0x4be   :  { %4079 = vrcp.f32 %v1010_v25  ;;  %3760 = vmatpush3.msra.mxu0 %v680_v26 }
 0x4bf   :  { %3769 = vmatprep.subr.mxu0 %v4317_v56 }
 0x4c1   :  { %v1015_v32 = vpop.permute.xlu1 %1014 }
 0x4c3   :  { %v4076_v28 = vpop.eup %4075 }
 0x4c4   :  { %v677_v29 = vmul.f32 %v4076_v28, %v4068_v9  ;;  %v1258_v28 = vld [vmem:[#allocation7 + $0xb8] sm:$0xff] }
 0x4c6   :  { %3762 = vmatmul.mubr.msk.f32.vlgmr.msra.gmra.mxu0 %vm504_vm2, %v677_v29  ;;  %v1257_v29 = vld [vmem:[#allocation7 + $0xb0] sm:$0xff] }
 0x4c7   :  { %v4078_v30 = vpop.eup %4077  ;;  %3770 = vmatpush3.msra.mxu0 %v4531_v27  ;;  %3771 = vmatprep.mubr.msk.f32.mxu0 %vm4318_vm0, %v4317_v56  ;;  %v1110_v27 = vld [vmem:[#allocation5 + $0x78] sm:$0xff] }
 0x4c8   :  { %3779 = vmatprep.subr.mxu0 %v4317_v56  ;;  %v850_v31 = vmul.f32 %v4078_v30, %v4070_v14  ;;  %3784 = vmatprep.subr.mxu1 %v1110_v27  ;;  %v1265_v14 = vld [vmem:[#allocation7 + $0xf0] sm:$0xff]  ;;  %v1256_v30 = vld [vmem:[#allocation7 + $0xa8] sm:$0xff] }
 0x4c9   :  { %3785 = vmatpush3.msra.mxu1 %v1110_v27  ;;  %v1251_v27 = vld [vmem:[#allocation7 + $0x80] sm:$0xff] }
 0x4ca   :  { %3772 = vmatmul.mubr.msk.f32.vlgmr.msra.gmra.mxu0 %vm504_vm2, %v850_v31  ;;  %3786 = vmatprep.subr.mxu1 %v1109_v35  ;;  %v1255_v31 = vld [vmem:[#allocation7 + $0xa0] sm:$0xff] }
 0x4cb   :  { %v4080_v33 = vpop.eup %4079  ;;  %3780 = vmatpush3.msra.mxu0 %v1015_v32  ;;  %3781 = vmatprep.mubr.msk.f32.mxu0 %vm4318_vm0, %v4317_v56  ;;  %v1254_v32 = vld [vmem:[#allocation7 + $0x98] sm:$0xff] }
 0x4cc   :  { %v1012_v34 = vmul.f32 %v4080_v33, %v4072_v18  ;;  %3787 = vmatpush3.msra.mxu1 %v1109_v35  ;;  %1279 = vmatprep.subr.mxu0 %v1266_v11  ;;  %v1263_v18 = vld [vmem:[#allocation7 + $0xe0] sm:$0xff]  ;;  %v1253_v33 = vld [vmem:[#allocation7 + $0x90] sm:$0xff]  ;;  %v1250_v35 = vld [vmem:[#allocation7 + $0x78] sm:$0xff] }
 0x4cd   :  { %3788 = vmatprep.subr.mxu1 %v1108_v36  ;;  %v1476_v11 = vld [vmem:[#allocation8 + $0x60] sm:$0xff] }
 0x4ce   :  { %3782 = vmatmul.mubr.msk.f32.vlgmr.msra.gmra.mxu0 %vm504_vm2, %v1012_v34  ;;  %3789 = vmatpush3.msra.mxu1 %v1108_v36  ;;  %v1252_v34 = vld [vmem:[#allocation7 + $0x88] sm:$0xff]  ;;  %v1249_v36 = vld [vmem:[#allocation7 + $0x70] sm:$0xff] }
 0x4cf   :  { %1343 = vmatprep.mubr.f32.mxu0 %v4317_v56  ;;  %3790 = vmatprep.subr.mxu1 %v1107_v38 }
 0x4d0   :  { %3791 = vmatpush3.msra.mxu1 %v1107_v38  ;;  %1280 = vmatpush1.msra.mxu0 %v1265_v14  ;;  %v1246_v38 = vld [vmem:[#allocation7 + $0x58] sm:$0xff] }
 0x4d1   :  { %3792 = vmatprep.subr.mxu1 %v1106_v41  ;;  %1281 = vmatprep.subr.mxu0 %v1264_v16  ;;  %v1491_v14 = vld [vmem:[#allocation8 + $0xd8] sm:$0xff] }
 0x4d2   :  { %3793 = vmatpush3.msra.mxu1 %v1106_v41  ;;  %1282 = vmatpush1.msra.mxu0 %v1263_v18  ;;  %v1244_v41 = vld [vmem:[#allocation7 + $0x48] sm:$0xff]  ;;  %v1475_v16 = vld [vmem:[#allocation8 + $0x58] sm:$0xff]  ;;  %v1490_v18 = vld [vmem:[#allocation8 + $0xd0] sm:$0xff] }
 0x4d3   :  { %3794 = vmatprep.subr.mxu1 %v1105_v42  ;;  %1283 = vmatprep.subr.mxu0 %v1262_v19  ;;  %v1474_v19 = vld [vmem:[#allocation8 + $0x50] sm:$0xff] }
 0x4d4   :  { %3795 = vmatpush3.msra.mxu1 %v1105_v42  ;;  %1284 = vmatpush1.msra.mxu0 %v1261_v20  ;;  %v1243_v42 = vld [vmem:[#allocation7 + $0x40] sm:$0xff]  ;;  %v1489_v20 = vld [vmem:[#allocation8 + $0xc8] sm:$0xff] }
 0x4d5   :  { %3796 = vmatprep.subr.mxu1 %v1104_v43  ;;  %1285 = vmatprep.subr.mxu0 %v1260_v21  ;;  %v1473_v21 = vld [vmem:[#allocation8 + $0x48] sm:$0xff] }
 0x4d6   :  { %3797 = vmatpush3.msra.mxu1 %v1104_v43  ;;  %1286 = vmatpush1.msra.mxu0 %v1259_v22  ;;  %v1242_v43 = vld [vmem:[#allocation7 + $0x38] sm:$0xff]  ;;  %v1488_v22 = vld [vmem:[#allocation8 + $0xc0] sm:$0xff] }
 0x4d7   :  { %3798 = vmatprep.subr.mxu1 %v1103_v44  ;;  %1287 = vmatprep.subr.mxu0 %v1258_v28  ;;  %v1485_v28 = vld [vmem:[#allocation8 + $0xa8] sm:$0xff] }
 0x4d8   :  { %3799 = vmatpush3.msra.mxu1 %v1103_v44  ;;  %1288 = vmatpush1.msra.mxu0 %v1257_v29  ;;  %v1241_v44 = vld [vmem:[#allocation7 + $0x30] sm:$0xff]  ;;  %v1469_v29 = vld [vmem:[#allocation8 + $0x28] sm:$0xff] }
 0x4d9   :  { %3800 = vmatprep.subr.mxu1 %v1102_v45  ;;  %1289 = vmatprep.subr.mxu0 %v1256_v30  ;;  %v1484_v30 = vld [vmem:[#allocation8 + $0xa0] sm:$0xff] }
 0x4da   :  { %3801 = vmatpush3.msra.mxu1 %v1102_v45  ;;  %1290 = vmatpush1.msra.mxu0 %v1255_v31  ;;  %v1240_v45 = vld [vmem:[#allocation7 + $0x28] sm:$0xff]  ;;  %v1468_v31 = vld [vmem:[#allocation8 + $0x20] sm:$0xff] }
 0x4db   :  { %3802 = vmatprep.subr.mxu1 %v1101_v47  ;;  %1291 = vmatprep.subr.mxu0 %v1254_v32  ;;  %v1483_v32 = vld [vmem:[#allocation8 + $0x98] sm:$0xff] }
 0x4dc   :  { %3803 = vmatpush3.msra.mxu1 %v1101_v47  ;;  %1292 = vmatpush1.msra.mxu0 %v1253_v33  ;;  %v1239_v47 = vld [vmem:[#allocation7 + $0x20] sm:$0xff]  ;;  %v1467_v33 = vld [vmem:[#allocation8 + $0x18] sm:$0xff] }
 0x4dd   :  { %3804 = vmatprep.subr.mxu1 %v1100_v48  ;;  %1293 = vmatprep.subr.mxu0 %v1252_v34  ;;  %v1482_v34 = vld [vmem:[#allocation8 + $0x90] sm:$0xff] }
 0x4de   :  { %3805 = vmatpush3.msra.mxu1 %v1100_v48  ;;  %1294 = vmatpush1.msra.mxu0 %v1251_v27  ;;  %v1238_v48 = vld [vmem:[#allocation7 + $0x18] sm:$0xff]  ;;  %v1466_v27 = vld [vmem:[#allocation8 + $0x10] sm:$0xff] }
 0x4df   :  { %3806 = vmatprep.subr.mxu1 %v1099_v49  ;;  %1295 = vmatprep.subr.mxu0 %v1250_v35  ;;  %v1481_v35 = vld [vmem:[#allocation8 + $0x88] sm:$0xff] }
 0x4e0   :  { %3807 = vmatpush3.msra.mxu1 %v1099_v49  ;;  %1296 = vmatpush1.msra.mxu0 %v1249_v36  ;;  %v1237_v49 = vld [vmem:[#allocation7 + $0x10] sm:$0xff]  ;;  %v1465_v36 = vld [vmem:[#allocation8 + $0x8] sm:$0xff] }
 0x4e1   :  { %3808 = vmatprep.subr.mxu1 %v1098_v50 }
 0x4e2   :  { %3809 = vmatpush3.msra.mxu1 %v1098_v50  ;;  %v1236_v50 = vld [vmem:[#allocation7 + $0x8] sm:$0xff] }
 0x4e3   :  { %3810 = vmatprep.subr.mxu1 %v1097_v51 }
 0x4e4   :  { %3811 = vmatpush3.msra.mxu1 %v1097_v51  ;;  %v1235_v51 = vld [vmem:[#allocation7] sm:$0xff] }
 0x4e5   :  { %3812 = vmatprep.subr.mxu1 %v1096_v52 }
 0x4e6   :  { %3813 = vmatpush3.msra.mxu1 %v1096_v52 }
 0x4e7   :  { %3814 = vmatprep.subr.mxu1 %v1095_v53 }
 0x4e8   :  { %3815 = vmatpush3.msra.mxu1 %v1095_v53 }
 0x514   :  { %v585_v37 = vpop.f32.mrf.mxu0 }
 0x516   :  { %v3753_v40 = vpop.f32.mrf.mxu0 }
 0x517   :  { %v1245_v40 = vld [vmem:[#allocation7 + $0x50] sm:$0xff] }
 0x586   :  { %v751_v54 = vpop.f32.mrf.mxu0 }
 0x588   :  { %v3763_v55 = vpop.f32.mrf.mxu0 }
 0x58a   :  { %v920_v57 = vpop.f32.mrf.mxu0 }
 0x58c   :  { %v3773_v58 = vpop.f32.mrf.mxu0 }
 0x58e   :  { %v1086_v59 = vpop.f32.mrf.mxu0 }
 0x58f   :  { %v4051_v60 = vpack.i.bf16 %v1086_v59, %v751_v54 }
 0x590   :  { %v3783_v61 = vpop.f32.mrf.mxu0 }
 0x591   :  { %4052 = vrot.lane.b32.xlu1 %v4051_v60, %s4319_s29  ;;  %v4616_v61 = vld [vmem:[%s5026_s30] ss:$0 sm:$0xff] }
 0x603   :  { %v4053_v62 = vpop.permute.xlu1 %4052 }
 0x604   :  { %v4055_v63 = vunpack.i.h.bf16 %v4053_v62  ;;  %v4054_v0 = vunpack.i.l.bf16 %v4053_v62 }
 0x606   :  { %v759_v1 = vsel %vm427_vm1, %v585_v37, %v4054_v0  ;;  %v1094_v2 = vsel %vm427_vm1, %v920_v57, %v4055_v63  ;;  %v1247_v37 = vld [vmem:[#allocation7 + $0x60] sm:$0xff] }
 0x607   :  { %3816 = vmatprep.mubr.f32.mxu1 %v759_v1  ;;  %v4622_v63 = vld [vmem:[%s4986_s9] ss:$0 sm:$0xff] }
 0x608   :  { %3817 = vmatmul.mubr.f32.vlgmr.msra.gmra.mxu1 %v1094_v2  ;;  %v1495_v2 = vld [vmem:[#allocation8 + $0xf8] sm:$0xff] }
 0x609   :  { %3530 = vmatprep.subr.mxu1 %v1495_v2 }
 0x6c8   :  { %v3818_v4 = vpop.f32.mrf.mxu1 }
 0x6c9   :  { %v1190_v5 = vadd.f32 %v3818_v4, %v3441_v3  ;;  %v1494_v4 = vld [vmem:[#allocation8 + $0xf0] sm:$0xff] }
 0x6ca   :  { %v1184_v6 = vpop.f32.mrf.mxu1 }
 0x6cb   :  { %v1185_v8 = vadd.f32 %v3441_v3, %v1184_v6  ;;  %v1194_v26 = vadd.f32 %v1190_v5, %v4507_v10  ;;  %v1248_v10 = vld [vmem:[#allocation7 + $0x68] sm:$0xff]  ;;  %v1479_v3 = vld [vmem:[#allocation8 + $0x78] sm:$0xff]  ;;  %v1478_v5 = vld [vmem:[#allocation8 + $0x70] sm:$0xff] }
 0x6cc   :  { %1297 = vmatprep.subr.mxu0 %v1248_v10  ;;  %3531 = vmatpush3.msra.mxu1 %v1479_v3  ;;  %v1493_v6 = vld [vmem:[#allocation8 + $0xe8] sm:$0xff]  ;;  %v1480_v10 = vld [vmem:[#allocation8 + $0x80] sm:$0xff] }
 0x6cd   :  { %v1193_v9 = vadd.f32 %v1185_v8, %v4501_v7  ;;  %1298 = vmatpush1.msra.mxu0 %v1247_v37  ;;  %3532 = vmatprep.subr.mxu1 %v1494_v4  ;;  %v1477_v8 = vld [vmem:[#allocation8 + $0x68] sm:$0xff]  ;;  %v1464_v37 = vld [vmem:[#allocation8] sm:$0xff] }
 0x6ce   :  { %1299 = vmatprep.subr.mxu0 %v1246_v38  ;;  %3533 = vmatpush3.msra.mxu1 %v1478_v5 }
 0x6cf   :  { %1197 = vadd.xlane.f32.xlu1 %v1193_v9  ;;  %1300 = vmatpush1.msra.mxu0 %v1245_v40 }
 0x6d0   :  { %1301 = vmatprep.subr.mxu0 %v1244_v41  ;;  %3534 = vmatprep.subr.mxu1 %v1493_v6 }
 0x6d1   :  { %1302 = vmatpush1.msra.mxu0 %v1243_v42  ;;  %3535 = vmatpush3.msra.mxu1 %v1477_v8 }
 0x6d2   :  { %1303 = vmatprep.subr.mxu0 %v1242_v43 }
 0x6d3   :  { %1304 = vmatpush1.msra.mxu0 %v1241_v44 }
 0x6d4   :  { %1305 = vmatprep.subr.mxu0 %v1240_v45 }
 0x6d5   :  { %1306 = vmatpush1.msra.mxu0 %v1239_v47  ;;  %v1267_v47 = vld [vmem:[%s4988_s11] sm:$0x3] }
 0x6d6   :  { %1307 = vmatprep.subr.mxu0 %v1238_v48  ;;  %v4641_v48 = vrot.slane %v1267_v47, %v4518_v13 }
 0x6d7   :  { %1308 = vmatpush1.msra.mxu0 %v1237_v49  ;;  %v4644_v49 = vrot.slane %v1267_v47, %v4524_v15 }
 0x6d8   :  { %1309 = vmatprep.subr.mxu0 %v1236_v50 }
 0x6d9   :  { %1310 = vmatpush1.msra.mxu0 %v1235_v51 }
 0x758   :  { %v1198_v23 = vpop.xlane.xlu1 %1197 }
 0x759   :  { %v1201_v24 = vmul.f32 0.0078125, %v1198_v23  ;;  %v1472_v23 = vld [vmem:[#allocation8 + $0x40] sm:$0xff] }
 0x75b   :  { %v4604_v7 = vsub.f32 %v1193_v9, %v1201_v24  ;;  %v1492_v9 = vld [vmem:[#allocation8 + $0xe0] sm:$0xff]  ;;  %v1487_v24 = vld [vmem:[#allocation8 + $0xb8] sm:$0xff] }
 0x75c   :  { %3536 = vmatprep.subr.mxu1 %v1492_v9 }
 0x75d   :  { %v1205_v25 = vmul.f32 %v4604_v7, %v4604_v7  ;;  %3537 = vmatpush3.msra.mxu1 %v1476_v11 }
 0x75e   :  { %3538 = vmatprep.subr.mxu1 %v1491_v14 }
 0x75f   :  { %1207 = vadd.xlane.f32.xlu0 %v1205_v25  ;;  %3539 = vmatpush3.msra.mxu1 %v1475_v16  ;;  %v1486_v25 = vld [vmem:[#allocation8 + $0xb0] sm:$0xff] }
 0x760   :  { %3540 = vmatprep.subr.mxu1 %v1490_v18 }
 0x761   :  { %3541 = vmatpush3.msra.mxu1 %v1474_v19 }
 0x762   :  { %3542 = vmatprep.subr.mxu1 %v1489_v20 }
 0x763   :  { %1199 = vadd.xlane.f32.xlu0 %v1194_v26  ;;  %3543 = vmatpush3.msra.mxu1 %v1473_v21 }
 0x764   :  { %3544 = vmatprep.subr.mxu1 %v1488_v22 }
 0x765   :  { %3545 = vmatpush3.msra.mxu1 %v1472_v23 }
 0x766   :  { %3546 = vmatprep.subr.mxu1 %v1487_v24 }
 0x7e8   :  { %v1208_v52 = vpop.xlane.xlu0 %1207 }
 0x7e9   :  { %v1211_v53 = vmul.f32 0.0078125, %v1208_v52 }
 0x7eb   :  { %v1213_v54 = vadd.f32 1e-12, %v1211_v53 }
 0x7ec   :  { %v1200_v55 = vpop.xlane.xlu0 %1199 }
 0x7ed   :  { %4081 = vrsqrt.f32 %v1213_v54  ;;  %v1202_v57 = vmul.f32 0.0078125, %v1200_v55 }
 0x7ef   :  { %v4609_v58 = vsub.f32 %v1194_v26, %v1202_v57  ;;  %v1470_v26 = vld [vmem:[#allocation8 + $0x30] sm:$0xff] }
 0x7f1   :  { %v1206_v59 = vmul.f32 %v4609_v58, %v4609_v58 }
 0x7f3   :  { %1209 = vadd.xlane.f32.xlu0 %v1206_v59 }
 0x7fa   :  { %v4082_v60 = vpop.eup %4081 }
 0x7fb   :  { %v1217_v62 = vmul.f32 %v4082_v60, %v4604_v7  ;;  %v1471_v7 = vld [vmem:[#allocation8 + $0x38] sm:$0xff] }
 0x7fc   :  { %3547 = vmatpush3.msra.mxu1 %v1471_v7 }
 0x7fd   :  { %v1225_v0 = vmul.f32 %v4616_v61, %v1217_v62  ;;  %3548 = vmatprep.subr.mxu1 %v1486_v25 }
 0x7fe   :  { %3549 = vmatpush3.msra.mxu1 %v1470_v26 }
 0x7ff   :  { %v4626_v1 = vadd.f32 %v4622_v63, %v1225_v0  ;;  %3550 = vmatprep.subr.mxu1 %v1485_v28 }
 0x800   :  { %3551 = vmatpush3.msra.mxu1 %v1469_v29 }
 0x801   :  { %1344 = vmatmul.mubr.f32.vlgmr.msra.gmra.mxu0 %v4626_v1  ;;  %3552 = vmatprep.subr.mxu1 %v1484_v30 }
 0x802   :  { %1349 = vmatprep.mubr.f32.mxu0 %v4317_v56  ;;  %3553 = vmatpush3.msra.mxu1 %v1468_v31 }
 0x803   :  { %3554 = vmatprep.subr.mxu1 %v1483_v32 }
 0x804   :  { %3555 = vmatpush3.msra.mxu1 %v1467_v33 }
 0x805   :  { %3556 = vmatprep.subr.mxu1 %v1482_v34 }
 0x806   :  { %3557 = vmatpush3.msra.mxu1 %v1466_v27 }
 0x807   :  { %3558 = vmatprep.subr.mxu1 %v1481_v35  ;;  %v4320_v35 = vmov -1.0  }
 0x808   :  { %3559 = vmatpush3.msra.mxu1 %v1465_v36 }
 0x809   :  { %3560 = vmatprep.subr.mxu1 %v1480_v10 }
 0x80a   :  { %3561 = vmatpush3.msra.mxu1 %v1464_v37 }
 0x87c   :  { %v1210_v38 = vpop.xlane.xlu0 %1209 }
 0x87d   :  { %v1212_v40 = vmul.f32 0.0078125, %v1210_v38 }
 0x87f   :  { %v1214_v41 = vadd.f32 1e-12, %v1212_v40 }
 0x881   :  { %4083 = vrsqrt.f32 %v1214_v41 }
 0x88e   :  { %v4084_v42 = vpop.eup %4083 }
 0x88f   :  { %v1218_v43 = vmul.f32 %v4084_v42, %v4609_v58 }
 0x891   :  { %v1226_v44 = vmul.f32 %v4616_v61, %v1218_v43 }
 0x893   :  { %v4633_v45 = vadd.f32 %v4622_v63, %v1226_v44 }
 0x895   :  { %1350 = vmatmul.mubr.f32.gmra.mxu0 %v4633_v45 }
 0x896   :  { %1751 = vmatprep.mubr.f32.mxu0 %v4317_v56 }
 0x8c1   :  { %v1345_v50 = vpop.f32.mrf.mxu0 }
 0x8c2   :  { %v1346_v51 = vadd.f32 %v1345_v50, %v4641_v48 }
 0x8c3   :  { %v1347_v52 = vpop.f32.mrf.mxu0 }
 0x8c4   :  { %v1360_v53 = vmul.f32 0.70710677, %v1346_v51  ;;  %v1348_v54 = vadd.f32 %v1347_v52, %v4644_v49  ;;  %v1356_v47 = vmul.f32 0.5, %v1346_v51 }
 0x8c6   :  { %v1372_v55 = vand.u32 2147483647, %v1360_v53  ;;  %v1361_v57 = vmul.f32 0.70710677, %v1348_v54  ;;  %vm1364_vm3 = vcmp.ge.f32.partialorder %v1360_v53, 0.0  ;;  %v1357_v43 = vmul.f32 0.5, %v1348_v54 }
 0x8c7   :  { %v1368_v36 = vsel %vm1364_vm3, 1.0, %v4320_v35 }
 0x8c8   :  { %v1376_v58 = vmul.f32 0.3275911, %v1372_v55  ;;  %v1373_v59 = vand.u32 2147483647, %v1361_v57  ;;  %v1428_v63 = vsub.f32 0.0, %v1372_v55  ;;  %vm1365_vm4 = vcmp.ge.f32.partialorder %v1361_v57, 0.0 }
 0x8c9   :  { %v1369_v40 = vsel %vm1365_vm4, 1.0, %v4320_v35 }
 0x8ca   :  { %v1380_v60 = vadd.f32 1.0, %v1376_v58  ;;  %v1377_v61 = vmul.f32 0.3275911, %v1373_v59  ;;  %v1429_v0 = vsub.f32 0.0, %v1373_v59  ;;  %v1432_v2 = vmul.f32 %v1428_v63, %v1372_v55 }
 0x8cc   :  { %4085 = vrcp.f32 %v1380_v60  ;;  %v1381_v62 = vadd.f32 1.0, %v1377_v61  ;;  %v1433_v4 = vmul.f32 %v1429_v0, %v1373_v59  ;;  %v1436_v6 = vmul.f32 1.442695, %v1432_v2 }
 0x8ce   :  { %4087 = vrcp.f32 %v1381_v62  ;;  %v1438_v11 = vmul.f32 1.442695, %v1433_v4 }
 0x8cf   :  { %4089 = vpow2.f32 %v1436_v6 }
 0x8d0   :  { %4091 = vpow2.f32 %v1438_v11 }
 0x8d9   :  { %v4086_v3 = vpop.eup %4085 }
 0x8da   :  { %v1392_v5 = vmul.f32 1.0614054, %v4086_v3 }
 0x8db   :  { %v4088_v8 = vpop.eup %4087 }
 0x8dc   :  { %v1396_v9 = vadd.f32 -1.4531521, %v1392_v5  ;;  %v1393_v14 = vmul.f32 1.0614054, %v4088_v8  ;;  %v4090_v30 = vpop.eup %4089 }
 0x8dd   :  { %v4092_v34 = vpop.eup %4091 }
 0x8de   :  { %v1400_v16 = vmul.f32 %v4086_v3, %v1396_v9  ;;  %v1397_v18 = vadd.f32 -1.4531521, %v1393_v14 }
 0x8e0   :  { %v1404_v19 = vadd.f32 1.4214138, %v1400_v16  ;;  %v1401_v20 = vmul.f32 %v4088_v8, %v1397_v18 }
 0x8e2   :  { %v1408_v21 = vmul.f32 %v4086_v3, %v1404_v19  ;;  %v1405_v22 = vadd.f32 1.4214138, %v1401_v20 }
 0x8e4   :  { %v1412_v23 = vadd.f32 -0.28449672, %v1408_v21  ;;  %v1409_v24 = vmul.f32 %v4088_v8, %v1405_v22 }
 0x8e6   :  { %v1416_v7 = vmul.f32 %v4086_v3, %v1412_v23  ;;  %v1413_v25 = vadd.f32 -0.28449672, %v1409_v24 }
 0x8e8   :  { %v1420_v26 = vadd.f32 0.2548296, %v1416_v7  ;;  %v1417_v28 = vmul.f32 %v4088_v8, %v1413_v25 }
 0x8ea   :  { %v1424_v29 = vmul.f32 %v4086_v3, %v1420_v26  ;;  %v1421_v31 = vadd.f32 0.2548296, %v1417_v28 }
 0x8ec   :  { %v1444_v32 = vmul.f32 %v4090_v30, %v1424_v29  ;;  %v1425_v33 = vmul.f32 %v4088_v8, %v1421_v31 }
 0x8ee   :  { %v1448_v27 = vsub.f32 1.0, %v1444_v32  ;;  %v1445_v10 = vmul.f32 %v4092_v34, %v1425_v33 }
 0x8f0   :  { %v1452_v37 = vmul.f32 %v1448_v27, %v1368_v36  ;;  %v1449_v38 = vsub.f32 1.0, %v1445_v10 }
 0x8f2   :  { %v1453_v41 = vmul.f32 %v1449_v38, %v1369_v40  ;;  %v1456_v42 = vadd.f32 1.0, %v1452_v37 }
 0x8f4   :  { %v1457_v44 = vadd.f32 1.0, %v1453_v41  ;;  %v1460_v52 = vmul.f32 %v1456_v42, %v1356_v47 }
 0x8f6   :  { %v1461_v50 = vmul.f32 %v1457_v44, %v1357_v43 }
 0x8f8   :  { %1567 = vmatprep.mubr.f32.mxu1 %v1461_v50 }
 0x8f9   :  { %1568 = vmatmul.mubr.f32.vlgmr.msra.gmra.mxu1 %v1460_v52 }
 0x955   :  { %v1351_v53 = vpop.f32.mrf.mxu0 }
 0x956   :  { %v1352_v55 = vadd.f32 %v1351_v53, %v4641_v48 }
 0x957   :  { %v1353_v58 = vpop.f32.mrf.mxu0 }
 0x958   :  { %v1362_v59 = vmul.f32 0.70710677, %v1352_v55  ;;  %v1354_v57 = vadd.f32 %v1353_v58, %v4644_v49  ;;  %v1358_v47 = vmul.f32 0.5, %v1352_v55  ;;  %v3444_v58 = vld [vmem:[%s4990_s13] ss:$0 sm:$0xff]  ;;  %v1663_v55 = vld [vmem:[#allocation2 + $0x2d0] sm:$0xff] }
 0x95a   :  { %v1374_v60 = vand.u32 2147483647, %v1362_v59  ;;  %v1363_v61 = vmul.f32 0.70710677, %v1354_v57  ;;  %vm1366_vm5 = vcmp.ge.f32.partialorder %v1362_v59, 0.0  ;;  %v1359_v43 = vmul.f32 0.5, %v1354_v57 }
 0x95b   :  { %v1370_v36 = vsel %vm1366_vm5, 1.0, %v4320_v35  ;;  %v1664_v57 = vld [vmem:[#allocation2 + $0x2d8] sm:$0xff] }
 0x95c   :  { %v1378_v62 = vmul.f32 0.3275911, %v1374_v60  ;;  %v1375_v63 = vand.u32 2147483647, %v1363_v61  ;;  %v1430_v51 = vsub.f32 0.0, %v1374_v60  ;;  %vm1367_vm6 = vcmp.ge.f32.partialorder %v1363_v61, 0.0 }
 0x95d   :  { %v1371_v40 = vsel %vm1367_vm6, 1.0, %v4320_v35 }
 0x95e   :  { %v1382_v0 = vadd.f32 1.0, %v1378_v62  ;;  %v1379_v2 = vmul.f32 0.3275911, %v1375_v63  ;;  %v1431_v3 = vsub.f32 0.0, %v1375_v63  ;;  %v1434_v4 = vmul.f32 %v1430_v51, %v1374_v60  ;;  %v1658_v51 = vld [vmem:[#allocation2 + $0x2a8] sm:$0xff] }
 0x960   :  { %4093 = vrcp.f32 %v1382_v0  ;;  %v1383_v54 = vadd.f32 1.0, %v1379_v2  ;;  %v1435_v6 = vmul.f32 %v1431_v3, %v1375_v63  ;;  %v1440_v8 = vmul.f32 1.442695, %v1434_v4  ;;  %v1667_v63 = vld [vmem:[#allocation2 + $0x2f0] sm:$0xff]  ;;  %v1666_v0 = vld [vmem:[#allocation2 + $0x2e8] sm:$0xff]  ;;  %v1661_v2 = vld [vmem:[#allocation2 + $0x2c0] sm:$0xff] }
 0x961   :  { %1687 = vmatprep.subr.mxu0 %v1667_v63  ;;  %v1657_v3 = vld [vmem:[#allocation2 + $0x2a0] sm:$0xff]  ;;  %v1656_v63 = vld [vmem:[#allocation2 + $0x298] sm:$0xff] }
 0x962   :  { %4095 = vrcp.f32 %v1383_v54  ;;  %v1442_v14 = vmul.f32 1.442695, %v1435_v6  ;;  %1688 = vmatpush1.msra.mxu0 %v1666_v0  ;;  %v1660_v54 = vld [vmem:[#allocation2 + $0x2b8] sm:$0xff] }
 0x963   :  { %4097 = vpow2.f32 %v1440_v8  ;;  %1689 = vmatprep.subr.mxu0 %v1664_v57  ;;  %v1653_v57 = vld [vmem:[#allocation2 + $0x280] sm:$0xff] }
 0x964   :  { %4099 = vpow2.f32 %v1442_v14  ;;  %1690 = vmatpush1.msra.mxu0 %v1663_v55 }
 0x965   :  { %1691 = vmatprep.subr.mxu0 %v1661_v2  ;;  %v1650_v2 = vld [vmem:[#allocation2 + $0x268] sm:$0xff] }
 0x966   :  { %1692 = vmatpush1.msra.mxu0 %v1660_v54  ;;  %v1647_v54 = vld [vmem:[#allocation2 + $0x250] sm:$0xff] }
 0x967   :  { %1693 = vmatprep.subr.mxu0 %v1658_v51  ;;  %v1644_v51 = vld [vmem:[#allocation2 + $0x238] sm:$0xff] }
 0x968   :  { %1694 = vmatpush1.msra.mxu0 %v1657_v3  ;;  %v1641_v3 = vld [vmem:[#allocation2 + $0x220] sm:$0xff] }
 0x96d   :  { %v4094_v5 = vpop.eup %4093 }
 0x96e   :  { %v1394_v48 = vmul.f32 1.0614054, %v4094_v5 }
 0x96f   :  { %v4096_v9 = vpop.eup %4095 }
 0x970   :  { %v1398_v11 = vadd.f32 -1.4531521, %v1394_v48  ;;  %v1395_v49 = vmul.f32 1.0614054, %v4096_v9  ;;  %v4098_v30 = vpop.eup %4097 }
 0x971   :  { %v4100_v34 = vpop.eup %4099 }
 0x972   :  { %v1402_v16 = vmul.f32 %v4094_v5, %v1398_v11  ;;  %v1399_v18 = vadd.f32 -1.4531521, %v1395_v49  ;;  %v1655_v49 = vld [vmem:[#allocation2 + $0x290] sm:$0xff] }
 0x973   :  { %1695 = vmatprep.subr.mxu0 %v1655_v49 }
 0x974   :  { %v1406_v19 = vadd.f32 1.4214138, %v1402_v16  ;;  %v1403_v20 = vmul.f32 %v4096_v9, %v1399_v18  ;;  %v1654_v16 = vld [vmem:[#allocation2 + $0x288] sm:$0xff]  ;;  %v1652_v18 = vld [vmem:[#allocation2 + $0x278] sm:$0xff] }
 0x975   :  { %1696 = vmatpush1.msra.mxu0 %v1654_v16 }
 0x976   :  { %v1410_v21 = vmul.f32 %v4094_v5, %v1406_v19  ;;  %v1407_v22 = vadd.f32 1.4214138, %v1403_v20  ;;  %1697 = vmatprep.subr.mxu0 %v1652_v18  ;;  %v1651_v19 = vld [vmem:[#allocation2 + $0x270] sm:$0xff]  ;;  %v1649_v20 = vld [vmem:[#allocation2 + $0x260] sm:$0xff] }
 0x977   :  { %1698 = vmatpush1.msra.mxu0 %v1651_v19 }
 0x978   :  { %v1414_v23 = vadd.f32 -0.28449672, %v1410_v21  ;;  %v1411_v24 = vmul.f32 %v4096_v9, %v1407_v22  ;;  %1699 = vmatprep.subr.mxu0 %v1649_v20  ;;  %v1648_v21 = vld [vmem:[#allocation2 + $0x258] sm:$0xff]  ;;  %v1646_v22 = vld [vmem:[#allocation2 + $0x248] sm:$0xff]  ;;  %v3447_v20 = vld [vmem:[%s5023_s27 + $0x3] sm:$0x7] }
 0x979   :  { %1700 = vmatpush1.msra.mxu0 %v1648_v21  ;;  %v1675_v21 = vrot.slane %v3447_v20, %v4518_v13 }
 0x97a   :  { %v1418_v7 = vmul.f32 %v4094_v5, %v1414_v23  ;;  %v1415_v25 = vadd.f32 -0.28449672, %v1411_v24  ;;  %1701 = vmatprep.subr.mxu0 %v1646_v22  ;;  %v1645_v23 = vld [vmem:[#allocation2 + $0x240] sm:$0xff]  ;;  %v1642_v24 = vld [vmem:[#allocation2 + $0x228] sm:$0xff]  ;;  %v4694_v22 = vrot.slane %v3447_v20, %v4524_v15 }
 0x97b   :  { %1702 = vmatpush1.msra.mxu0 %v1645_v23 }
 0x97c   :  { %v1422_v26 = vadd.f32 0.2548296, %v1418_v7  ;;  %v1419_v28 = vmul.f32 %v4096_v9, %v1415_v25  ;;  %v1640_v7 = vld [vmem:[#allocation2 + $0x218] sm:$0xff]  ;;  %v1639_v25 = vld [vmem:[#allocation2 + $0x210] sm:$0xff] }
 0x97e   :  { %v1426_v29 = vmul.f32 %v4094_v5, %v1422_v26  ;;  %v1423_v31 = vadd.f32 0.2548296, %v1419_v28  ;;  %v1637_v26 = vld [vmem:[#allocation2 + $0x200] sm:$0xff]  ;;  %v1636_v28 = vld [vmem:[#allocation2 + $0x1f8] sm:$0xff] }
 0x980   :  { %v1446_v32 = vmul.f32 %v4098_v30, %v1426_v29  ;;  %v1427_v33 = vmul.f32 %v4096_v9, %v1423_v31  ;;  %v1634_v29 = vld [vmem:[#allocation2 + $0x1e8] sm:$0xff]  ;;  %v1633_v30 = vld [vmem:[#allocation2 + $0x1e0] sm:$0xff]  ;;  %v1631_v31 = vld [vmem:[#allocation2 + $0x1d0] sm:$0xff] }
 0x982   :  { %v1450_v27 = vsub.f32 1.0, %v1446_v32  ;;  %v1447_v10 = vmul.f32 %v4100_v34, %v1427_v33  ;;  %v1630_v32 = vld [vmem:[#allocation2 + $0x1c8] sm:$0xff]  ;;  %v1628_v33 = vld [vmem:[#allocation2 + $0x1b8] sm:$0xff]  ;;  %v1627_v34 = vld [vmem:[#allocation2 + $0x1b0] sm:$0xff] }
 0x984   :  { %v1454_v37 = vmul.f32 %v1450_v27, %v1370_v36  ;;  %v1451_v38 = vsub.f32 1.0, %v1447_v10  ;;  %v1625_v27 = vld [vmem:[#allocation2 + $0x1a0] sm:$0xff]  ;;  %v1624_v36 = vld [vmem:[#allocation2 + $0x198] sm:$0xff]  ;;  %v1622_v10 = vld [vmem:[#allocation2 + $0x188] sm:$0xff] }
 0x986   :  { %v1455_v41 = vmul.f32 %v1451_v38, %v1371_v40  ;;  %v1458_v42 = vadd.f32 1.0, %v1454_v37  ;;  %v1621_v37 = vld [vmem:[#allocation2 + $0x180] sm:$0xff]  ;;  %v1668_v38 = vld [vmem:[#allocation2 + $0x2f8] sm:$0xff] }
 0x987   :  { %v1665_v40 = vld [vmem:[#allocation2 + $0x2e0] sm:$0xff]  ;;  %3819 = vmatprep.subr.mxu1 %v1668_v38 }
 0x988   :  { %v1459_v44 = vadd.f32 1.0, %v1455_v41  ;;  %v1462_v52 = vmul.f32 %v1458_v42, %v1358_v47  ;;  %3820 = vmatpush3.msra.mxu1 %v1668_v38  ;;  %v1662_v41 = vld [vmem:[#allocation2 + $0x2c8] sm:$0xff]  ;;  %v1659_v42 = vld [vmem:[#allocation2 + $0x2b0] sm:$0xff] }
 0x989   :  { %3821 = vmatprep.subr.mxu1 %v1665_v40 }
 0x98a   :  { %v1463_v50 = vmul.f32 %v1459_v44, %v1359_v43  ;;  %3822 = vmatpush3.msra.mxu1 %v1665_v40 }
 0x98b   :  { %3823 = vmatprep.subr.mxu1 %v1662_v41 }
 0x98c   :  { %1572 = vmatprep.mubr.f32.mxu1 %v1463_v50  ;;  %3824 = vmatpush3.msra.mxu1 %v1662_v41 }
 0x98d   :  { %1573 = vmatmul.mubr.f32.gmra.mxu1 %v1462_v52  ;;  %3825 = vmatprep.subr.mxu1 %v1659_v42 }
 0x98e   :  { %3826 = vmatpush3.msra.mxu1 %v1659_v42 }
 0x98f   :  { %3827 = vmatprep.subr.mxu1 %v1656_v63 }
 0x990   :  { %3828 = vmatpush3.msra.mxu1 %v1656_v63 }
 0x991   :  { %3829 = vmatprep.subr.mxu1 %v1653_v57 }
 0x992   :  { %3830 = vmatpush3.msra.mxu1 %v1653_v57 }
 0x993   :  { %3831 = vmatprep.subr.mxu1 %v1650_v2 }
 0x994   :  { %3832 = vmatpush3.msra.mxu1 %v1650_v2 }
 0x995   :  { %3833 = vmatprep.subr.mxu1 %v1647_v54 }
 0x996   :  { %3834 = vmatpush3.msra.mxu1 %v1647_v54 }
 0x997   :  { %3835 = vmatprep.subr.mxu1 %v1644_v51 }
 0x998   :  { %3836 = vmatpush3.msra.mxu1 %v1644_v51 }
 0x999   :  { %3837 = vmatprep.subr.mxu1 %v1641_v3 }
 0x99a   :  { %3838 = vmatpush3.msra.mxu1 %v1641_v3 }
 0x9b9   :  { %v3562_v53 = vpop.f32.mrf.mxu1 }
 0x9bb   :  { %v3563_v59 = vpop.f32.mrf.mxu1 }
 0x9bc   :  { %v3564_v60 = vadd.f32 %v3563_v59, %v3562_v53 }
 0x9be   :  { %v1570_v61 = vadd.f32 %v3564_v60, %v3444_v58  ;;  %v3445_v60 = vld [vmem:[%s4991_s14] ss:$0 sm:$0xff] }
 0x9c0   :  { %v1578_v62 = vadd.f32 %v1570_v61, %v4626_v1 }
 0x9c2   :  { %1582 = vadd.xlane.f32.xlu1 %v1578_v62 }
 0xa4b   :  { %v1583_v4 = vpop.xlane.xlu1 %1582 }
 0xa4c   :  { %v1586_v5 = vmul.f32 0.0078125, %v1583_v4  ;;  %v1638_v4 = vld [vmem:[#allocation2 + $0x208] sm:$0xff] }
 0xa4d   :  { %v3565_v1 = vpop.f32.mrf.mxu1  ;;  %3839 = vmatprep.subr.mxu1 %v1638_v4 }
 0xa4e   :  { %v4658_v6 = vsub.f32 %v1578_v62, %v1586_v5  ;;  %v3446_v62 = vld [vmem:[%s4992_s15] ss:$0 sm:$0xff]  ;;  %v1635_v5 = vld [vmem:[#allocation2 + $0x1f0] sm:$0xff]  ;;  %3840 = vmatpush3.msra.mxu1 %v1638_v4 }
 0xa4f   :  { %v3566_v8 = vpop.f32.mrf.mxu1  ;;  %3841 = vmatprep.subr.mxu1 %v1635_v5 }
 0xa50   :  { %v3567_v48 = vadd.f32 %v3566_v8, %v3565_v1  ;;  %v1590_v9 = vmul.f32 %v4658_v6, %v4658_v6  ;;  %v1632_v1 = vld [vmem:[#allocation2 + $0x1d8] sm:$0xff]  ;;  %3842 = vmatpush3.msra.mxu1 %v1635_v5  ;;  %v1626_v8 = vld [vmem:[#allocation2 + $0x1a8] sm:$0xff] }
 0xa51   :  { %3843 = vmatprep.subr.mxu1 %v1632_v1 }
 0xa52   :  { %v1575_v11 = vadd.f32 %v3567_v48, %v3444_v58  ;;  %1592 = vadd.xlane.f32.xlu0 %v1590_v9  ;;  %3844 = vmatpush3.msra.mxu1 %v1632_v1  ;;  %v1623_v48 = vld [vmem:[#allocation2 + $0x190] sm:$0xff] }
 0xa54   :  { %v4663_v14 = vadd.f32 %v1575_v11, %v4633_v45  ;;  %v1643_v45 = vld [vmem:[#allocation2 + $0x230] sm:$0xff] }
 0xa55   :  { %1703 = vmatprep.subr.mxu0 %v1643_v45 }
 0xa56   :  { %1584 = vadd.xlane.f32.xlu1 %v4663_v14  ;;  %1704 = vmatpush1.msra.mxu0 %v1642_v24 }
 0xa57   :  { %1705 = vmatprep.subr.mxu0 %v1640_v7 }
 0xa58   :  { %1706 = vmatpush1.msra.mxu0 %v1639_v25 }
 0xa59   :  { %1707 = vmatprep.subr.mxu0 %v1637_v26  ;;  %v1683_v26 = vrot.slane %v3447_v20, %v264_v17 }
 0xa5a   :  { %1708 = vmatpush1.msra.mxu0 %v1636_v28 }
 0xa5b   :  { %1709 = vmatprep.subr.mxu0 %v1634_v29 }
 0xa5c   :  { %1710 = vmatpush1.msra.mxu0 %v1633_v30 }
 0xa5d   :  { %1711 = vmatprep.subr.mxu0 %v1631_v31 }
 0xa5e   :  { %1712 = vmatpush1.msra.mxu0 %v1630_v32 }
 0xa5f   :  { %1713 = vmatprep.subr.mxu0 %v1628_v33 }
 0xa60   :  { %1714 = vmatpush1.msra.mxu0 %v1627_v34 }
 0xa61   :  { %1715 = vmatprep.subr.mxu0 %v1625_v27 }
 0xa62   :  { %1716 = vmatpush1.msra.mxu0 %v1624_v36 }
 0xa63   :  { %1717 = vmatprep.subr.mxu0 %v1622_v10 }
 0xa64   :  { %1718 = vmatpush1.msra.mxu0 %v1621_v37 }
 0xa65   :  { %3854 = vmatprep.subr.mxu0 %v4317_v56 }
 0xadb   :  { %v1593_v43 = vpop.xlane.xlu0 %1592 }
 0xadc   :  { %v1596_v44 = vmul.f32 0.0078125, %v1593_v43 }
 0xade   :  { %v1598_v47 = vadd.f32 1e-12, %v1596_v44 }
 0xadf   :  { %v1585_v50 = vpop.xlane.xlu1 %1584 }
 0xae0   :  { %4101 = vrsqrt.f32 %v1598_v47  ;;  %v1587_v52 = vmul.f32 0.0078125, %v1585_v50 }
 0xae2   :  { %v1589_v53 = vsub.f32 %v4663_v14, %v1587_v52 }
 0xae4   :  { %v1591_v58 = vmul.f32 %v1589_v53, %v1589_v53 }
 0xae6   :  { %1594 = vadd.xlane.f32.xlu0 %v1591_v58 }
 0xaed   :  { %v4102_v59 = vpop.eup %4101 }
 0xaee   :  { %v1602_v61 = vmul.f32 %v4102_v59, %v4658_v6  ;;  %v1629_v6 = vld [vmem:[#allocation2 + $0x1c0] sm:$0xff] }
 0xaef   :  { %3845 = vmatprep.subr.mxu1 %v1629_v6 }
 0xaf0   :  { %v1610_v0 = vmul.f32 %v3445_v60, %v1602_v61  ;;  %3846 = vmatpush3.msra.mxu1 %v1629_v6 }
 0xaf1   :  { %3847 = vmatprep.subr.mxu1 %v1626_v8 }
 0xaf2   :  { %v4675_v55 = vadd.f32 %v3446_v62, %v1610_v0  ;;  %3848 = vmatpush3.msra.mxu1 %v1626_v8 }
 0xaf3   :  { %3849 = vmatprep.subr.mxu1 %v1623_v48 }
 0xaf4   :  { %1752 = vmatmul.mubr.f32.vlgmr.msra.gmra.mxu0 %v4675_v55  ;;  %3851 = vmatprep.mubr.f32.mxu1 %v4675_v55 }
 0xaf5   :  { %1757 = vmatprep.mubr.f32.mxu0 %v4317_v56  ;;  %3850 = vmatpush3.msra.mxu1 %v1623_v48 }
 0xaf6   :  { %3889 = vmatprep.subr.mxu1 %v4317_v56 }
 0xb6f   :  { %v1595_v9 = vpop.xlane.xlu0 %1594 }
 0xb70   :  { %v1597_v11 = vmul.f32 0.0078125, %v1595_v9 }
 0xb72   :  { %v1599_v14 = vadd.f32 1e-12, %v1597_v11 }
 0xb74   :  { %4103 = vrsqrt.f32 %v1599_v14 }
 0xb81   :  { %v4104_v49 = vpop.eup %4103 }
 0xb82   :  { %v1603_v16 = vmul.f32 %v4104_v49, %v1589_v53 }
 0xb84   :  { %v1611_v18 = vmul.f32 %v3445_v60, %v1603_v16 }
 0xb86   :  { %v4681_v19 = vadd.f32 %v3446_v62, %v1611_v18 }
 0xb88   :  { %1758 = vmatmul.mubr.f32.gmra.mxu0 %v4681_v19  ;;  %3852 = vmatmul.mubr.f32.vlgmr.msra.gmra.mxu1 %v4681_v19 }
 0xb89   :  { %3856 = vmatprep.mubr.msk.f32.mxu0 %vm4318_vm0, %v4317_v56  ;;  %3891 = vmatprep.mubr.msk.f32.mxu1 %vm4318_vm0, %v4317_v56 }
 0xbb4   :  { %v1753_v23 = vpop.f32.mrf.mxu0 }
 0xbb5   :  { %v1754_v45 = vadd.f32 %v1753_v23, %v1675_v21 }
 0xbb6   :  { %v1755_v24 = vpop.f32.mrf.mxu0 }
 0xbb7   :  { %v1756_v7 = vadd.f32 %v1755_v24, %v4694_v22  ;;  %v1839_v25 = vmul.f32 0.125, %v1754_v45 }
 0xbb9   :  { %3855 = vmatpush3.xpose.msk.msra.mxu0 %vm427_vm1, %v1756_v7 }
 0xbba   :  { %3859 = vmatprep.subr.mxu0 %v4317_v56 }
 0xbbc   :  { %3857 = vmatmul.mubr.msk.f32.vlgmr.msra.gmra.mxu0 %vm427_vm1, %v1839_v25 }
 0xbbd   :  { %3861 = vmatprep.mubr.msk.f32.mxu0 %vm4318_vm0, %v4317_v56 }
 0xc48   :  { %v3853_v28 = vpop.f32.mrf.mxu1  ;;  %v1759_v32 = vpop.f32.mrf.mxu0 }
 0xc49   :  { %v4704_v29 = vadd.f32 %v3853_v28, %v1683_v26  ;;  %v1760_v61 = vadd.f32 %v1759_v32, %v1675_v21 }
 0xc4a   :  { %v1830_v30 = vpop.f32.mrf.mxu1  ;;  %v1761_v33 = vpop.f32.mrf.mxu0 }
 0xc4b   :  { %v1831_v31 = vadd.f32 %v1830_v30, %v1683_v26  ;;  %v1840_v62 = vmul.f32 0.125, %v1760_v61  ;;  %v1762_v5 = vadd.f32 %v1761_v33, %v4694_v22  ;;  %v2505_v61 = vld [vmem:[#allocation5 + $0x88] sm:$0xff] }
 0xc4d   :  { %3860 = vmatpush3.msra.mxu0 %v1831_v31 }
 0xc4e   :  { %3864 = vmatprep.subr.mxu0 %v4317_v56 }
 0xc7c   :  { %v1913_v34 = vpop.f32.mrf.mxu0 }
 0xc7d   :  { %v1914_v27 = vadd.f32 %v1913_v34, %v4562_v39 }
 0xc7e   :  { %v3858_v36 = vpop.f32.mrf.mxu0 }
 0xc7f   :  { %v1917_v10 = vsel %vm504_vm2, %v1914_v27, -inf }
 0xc80   :  { %1918 = vmax.xlane.f32.xlu1 %v1917_v10 }
 0xc91   :  { %2003 = vrot.lane.b32.xlu1 %v1756_v7, %s4319_s29 }
 0xd09   :  { %v1919_v12 = vpop.xlane.xlu1 %1918 }
 0xd0a   :  { %v1920_v17 = vsub.f32 %v1914_v27, %v1919_v12 }
 0xd0c   :  { %v1921_v37 = vmul.f32 1.442695, %v1920_v17 }
 0xd0d   :  { %v2004_v44 = vpop.permute.xlu1 %2003 }
 0xd0e   :  { %4105 = vpow2.f32 %v1921_v37  ;;  %v2519_v37 = vld [vmem:[#allocation5 + $0xf8] sm:$0xff] }
 0xd1b   :  { %v4106_v38 = vpop.eup %4105 }
 0xd1c   :  { %v1923_v40 = vsel %vm504_vm2, %v4106_v38, 0.0 }
 0xd1d   :  { %1924 = vadd.xlane.f32.xlu0 %v1923_v40  ;;  %v2516_v40 = vld [vmem:[#allocation5 + $0xe0] sm:$0xff] }
 0xd33   :  { %2001 = vrot.lane.b32.xlu0 %v1839_v25, %s4319_s29 }
 0xda6   :  { %v1925_v41 = vpop.xlane.xlu0 %1924 }
 0xda7   :  { %4107 = vrcp.f32 %v1925_v41  ;;  %v2515_v41 = vld [vmem:[#allocation5 + $0xd8] sm:$0xff] }
 0xdaa   :  { %v2002_v47 = vpop.permute.xlu0 %2001 }
 0xdb4   :  { %v4108_v42 = vpop.eup %4107 }
 0xdb5   :  { %v1927_v43 = vmul.f32 %v4108_v42, %v4106_v38  ;;  %v2517_v38 = vld [vmem:[#allocation5 + $0xe8] sm:$0xff]  ;;  %v2514_v42 = vld [vmem:[#allocation5 + $0xd0] sm:$0xff] }
 0xdb7   :  { %3862 = vmatmul.mubr.msk.f32.vlgmr.msra.gmra.mxu0 %vm504_vm2, %v1927_v43  ;;  %v2513_v43 = vld [vmem:[#allocation5 + $0xc8] sm:$0xff] }
 0xdb8   :  { %3865 = vmatpush3.xpose.msk.msra.mxu0 %vm427_vm1, %v2004_v44  ;;  %3866 = vmatprep.mubr.msk.f32.mxu0 %vm4318_vm0, %v4317_v56  ;;  %v2512_v44 = vld [vmem:[#allocation5 + $0xc0] sm:$0xff] }
 0xdb9   :  { %3869 = vmatprep.subr.mxu0 %v4317_v56 }
 0xdbb   :  { %3867 = vmatmul.mubr.msk.f32.vlgmr.msra.gmra.mxu0 %vm427_vm1, %v2002_v47  ;;  %v2511_v47 = vld [vmem:[#allocation5 + $0xb8] sm:$0xff] }
 0xdbc   :  { %3871 = vmatprep.mubr.msk.f32.mxu0 %vm4318_vm0, %v4317_v56 }
 0xe77   :  { %v4720_v50 = vpop.f32.mrf.mxu0 }
 0xe79   :  { %v3863_v52 = vpop.f32.mrf.mxu0 }
 0xe7a   :  { %v2510_v52 = vld [vmem:[#allocation5 + $0xb0] sm:$0xff] }
 0xe7b   :  { %v2075_v53 = vpop.f32.mrf.mxu0 }
 0xe7c   :  { %v2076_v58 = vadd.f32 %v2075_v53, %v4562_v39  ;;  %v2509_v53 = vld [vmem:[#allocation5 + $0xa8] sm:$0xff] }
 0xe7d   :  { %v3868_v59 = vpop.f32.mrf.mxu0 }
 0xe7e   :  { %v2079_v60 = vsel %vm504_vm2, %v2076_v58, -inf  ;;  %v2507_v59 = vld [vmem:[#allocation5 + $0x98] sm:$0xff] }
 0xe7f   :  { %2080 = vmax.xlane.f32.xlu1 %v2079_v60  ;;  %v2506_v60 = vld [vmem:[#allocation5 + $0x90] sm:$0xff] }
 0xe90   :  { %2091 = vrot.lane.b32.xlu1 %v1831_v31, %s4319_s29 }
 0xe94   :  { %2332 = vrot.lane.b32.xlu1 %v1840_v62, %s4319_s29 }
 0xf08   :  { %v2081_v63 = vpop.xlane.xlu1 %2080 }
 0xf09   :  { %v2082_v0 = vsub.f32 %v2076_v58, %v2081_v63  ;;  %v2508_v58 = vld [vmem:[#allocation5 + $0xa0] sm:$0xff] }
 0xf0b   :  { %v2083_v57 = vmul.f32 1.442695, %v2082_v0 }
 0xf0c   :  { %v2092_v2 = vpop.permute.xlu1 %2091 }
 0xf0d   :  { %4109 = vpow2.f32 %v2083_v57  ;;  %3870 = vmatpush3.msra.mxu0 %v2092_v2 }
 0xf0e   :  { %3874 = vmatprep.subr.mxu0 %v4317_v56 }
 0xf10   :  { %v2333_v24 = vpop.permute.xlu1 %2332 }
 0xf1a   :  { %v4110_v54 = vpop.eup %4109 }
 0xf1b   :  { %v2085_v39 = vsel %vm504_vm2, %v4110_v54, 0.0 }
 0xf1c   :  { %2086 = vadd.xlane.f32.xlu0 %v2085_v39 }
 0xfa5   :  { %v2087_v51 = vpop.xlane.xlu0 %2086 }
 0xfa6   :  { %4111 = vrcp.f32 %v2087_v51 }
 0xfb3   :  { %v4112_v3 = vpop.eup %4111 }
 0xfb4   :  { %v2089_v4 = vmul.f32 %v4112_v3, %v4110_v54 }
 0xfb6   :  { %3872 = vmatmul.mubr.msk.f32.vlgmr.msra.gmra.mxu0 %vm504_vm2, %v2089_v4  ;;  %v3461_v4 = vld [vmem:[%s5025_s28 + $0x1] ss:$0 sm:$0xff]  ;;  %s4321_s28 = smov [#allocation13]  }
 0xfb7   :  { %3875 = vmatpush3.xpose.msk.msra.mxu0 %vm427_vm1, %v1762_v5  ;;  %3876 = vmatprep.mubr.msk.f32.mxu0 %vm4318_vm0, %v4317_v56  ;;  %s3415_s8 = sshll.u32 %s4321_s28, 4  ;;  %s3416_s8 = int_to_ptr.vmem [resolvable:$true] %s3415_s8 }
 0xfb8   :  { %3879 = vmatprep.subr.mxu0 %v4317_v56  ;;  %s4275_s12 = scalar_lea.vmem %s3416_s8, 32  ;;  %p4280_p3 = scmp.lt.s32.totalorder %s3416_s8, %s3416_s8 }
 0xfb9   :  { %p4276_p2 = scmp.ne.s32.totalorder %s3416_s8, %s4275_s12  ;;  %p4281_p4 = scmp.lt.s32.totalorder %s4275_s12, %s4275_s12 }
 0xfba   :  { %3877 = vmatmul.mubr.msk.f32.vlgmr.msra.gmra.mxu0 %vm427_vm1, %v1840_v62  ;;  %v2504_v62 = vld [vmem:[#allocation5 + $0x80] sm:$0xff] }
 0xfbb   :  { %3880 = vmatpush3.msra.mxu0 %v4704_v29  ;;  %3881 = vmatprep.mubr.msk.f32.mxu0 %vm4318_vm0, %v4317_v56  ;;  %p4282_p5 = por %p4281_p4, %p4280_p3 }
 0xfbc   :  { %3884 = vmatprep.subr.mxu0 %v4317_v56 }
 0xfbd   :  { %p4283_p6 = pnand %p4282_p5, %p4276_p2 }
0x1076   :  { %v4739_v1 = vpop.f32.mrf.mxu0 }
0x1078   :  { %v3873_v6 = vpop.f32.mrf.mxu0 }
0x107a   :  { %v2244_v8 = vpop.f32.mrf.mxu0 }
0x107b   :  { %v2245_v48 = vadd.f32 %v2244_v8, %v4568_v46 }
0x107c   :  { %v3878_v9 = vpop.f32.mrf.mxu0 }
0x107d   :  { %v2248_v11 = vsel %vm504_vm2, %v2245_v48, -inf }
0x107e   :  { %2249 = vmax.xlane.f32.xlu0 %v2248_v11  ;;  %v2678_v11 = vld [vmem:[#allocation7 + $0x1f0] sm:$0xff] }
0x1107   :  { %v2250_v14 = vpop.xlane.xlu0 %2249 }
0x1108   :  { %v2251_v49 = vsub.f32 %v2245_v48, %v2250_v14  ;;  %v2677_v14 = vld [vmem:[#allocation7 + $0x1e8] sm:$0xff] }
0x110a   :  { %v2252_v16 = vmul.f32 1.442695, %v2251_v49  ;;  %v2676_v49 = vld [vmem:[#allocation7 + $0x1e0] sm:$0xff] }
0x110c   :  { %4113 = vpow2.f32 %v2252_v16  ;;  %v2675_v16 = vld [vmem:[#allocation7 + $0x1d8] sm:$0xff] }
0x1119   :  { %v4114_v18 = vpop.eup %4113 }
0x111a   :  { %v2254_v20 = vsel %vm504_vm2, %v4114_v18, 0.0 }
0x111b   :  { %2255 = vadd.xlane.f32.xlu0 %v2254_v20  ;;  %v2673_v20 = vld [vmem:[#allocation7 + $0x1c8] sm:$0xff] }
0x1131   :  { %2334 = vrot.lane.b32.xlu0 %v1762_v5, %s4319_s29 }
0x11a4   :  { %v2256_v21 = vpop.xlane.xlu0 %2255 }
0x11a5   :  { %4115 = vrcp.f32 %v2256_v21  ;;  %v2672_v21 = vld [vmem:[#allocation7 + $0x1c0] sm:$0xff] }
0x11a8   :  { %v2335_v45 = vpop.permute.xlu0 %2334 }
0x11b2   :  { %v4116_v22 = vpop.eup %4115 }
0x11b3   :  { %v2258_v23 = vmul.f32 %v4116_v22, %v4114_v18  ;;  %v2674_v18 = vld [vmem:[#allocation7 + $0x1d0] sm:$0xff] }
0x11b5   :  { %3882 = vmatmul.mubr.msk.f32.vlgmr.msra.gmra.mxu0 %vm504_vm2, %v2258_v23 }
0x11b6   :  { %3885 = vmatpush3.xpose.msk.msra.mxu0 %vm427_vm1, %v2335_v45  ;;  %3886 = vmatprep.mubr.msk.f32.mxu0 %vm4318_vm0, %v4317_v56 }
0x11b7   :  { %3894 = vmatprep.subr.mxu0 %v2519_v37 }
0x11b9   :  { %3887 = vmatmul.mubr.msk.f32.vlgmr.msra.gmra.mxu0 %vm427_vm1, %v2333_v24 }
0x11ba   :  { %3895 = vmatpush3.msra.mxu0 %v2519_v37  ;;  %v2658_v37 = vld [vmem:[#allocation7 + $0x150] sm:$0xff] }
0x1275   :  { %v4750_v7 = vpop.f32.mrf.mxu0 }
0x1277   :  { %v3883_v25 = vpop.f32.mrf.mxu0 }
0x1279   :  { %v2406_v26 = vpop.f32.mrf.mxu0 }
0x127a   :  { %v2407_v28 = vadd.f32 %v2406_v26, %v4568_v46  ;;  %v2671_v26 = vld [vmem:[#allocation7 + $0x1b8] sm:$0xff] }
0x127b   :  { %v3888_v30 = vpop.f32.mrf.mxu0 }
0x127c   :  { %v2410_v31 = vsel %vm504_vm2, %v2407_v28, -inf  ;;  %v2669_v30 = vld [vmem:[#allocation7 + $0x1a8] sm:$0xff] }
0x127d   :  { %2411 = vmax.xlane.f32.xlu1 %v2410_v31  ;;  %v2668_v31 = vld [vmem:[#allocation7 + $0x1a0] sm:$0xff] }
0x128e   :  { %2422 = vrot.lane.b32.xlu1 %v4704_v29, %s4319_s29  ;;  %v2518_v29 = vld [vmem:[#allocation5 + $0xf0] sm:$0xff] }
0x128f   :  { %3896 = vmatprep.subr.mxu0 %v2518_v29 }
0x1290   :  { %3897 = vmatpush3.msra.mxu0 %v2518_v29  ;;  %v2657_v29 = vld [vmem:[#allocation7 + $0x148] sm:$0xff] }
0x1291   :  { %3898 = vmatprep.subr.mxu0 %v2517_v38 }
0x1292   :  { %3899 = vmatpush3.msra.mxu0 %v2517_v38  ;;  %v2656_v38 = vld [vmem:[#allocation7 + $0x140] sm:$0xff] }
0x1293   :  { %3900 = vmatprep.subr.mxu0 %v2516_v40 }
0x1294   :  { %3901 = vmatpush3.msra.mxu0 %v2516_v40  ;;  %v2655_v40 = vld [vmem:[#allocation7 + $0x138] sm:$0xff] }
0x1295   :  { %3902 = vmatprep.subr.mxu0 %v2515_v41 }
0x1296   :  { %3903 = vmatpush3.msra.mxu0 %v2515_v41  ;;  %v2654_v41 = vld [vmem:[#allocation7 + $0x130] sm:$0xff] }
0x1297   :  { %3904 = vmatprep.subr.mxu0 %v2514_v42 }
0x1298   :  { %3905 = vmatpush3.msra.mxu0 %v2514_v42  ;;  %v2653_v42 = vld [vmem:[#allocation7 + $0x128] sm:$0xff] }
0x1299   :  { %3906 = vmatprep.subr.mxu0 %v2513_v43 }
0x129a   :  { %3907 = vmatpush3.msra.mxu0 %v2513_v43  ;;  %v2652_v43 = vld [vmem:[#allocation7 + $0x120] sm:$0xff] }
0x129b   :  { %3908 = vmatprep.subr.mxu0 %v2512_v44 }
0x129c   :  { %3909 = vmatpush3.msra.mxu0 %v2512_v44  ;;  %v2651_v44 = vld [vmem:[#allocation7 + $0x118] sm:$0xff] }
0x129d   :  { %3910 = vmatprep.subr.mxu0 %v2511_v47 }
0x129e   :  { %3911 = vmatpush3.msra.mxu0 %v2511_v47  ;;  %v2650_v47 = vld [vmem:[#allocation7 + $0x110] sm:$0xff] }
0x129f   :  { %3912 = vmatprep.subr.mxu0 %v2510_v52 }
0x12a0   :  { %3913 = vmatpush3.msra.mxu0 %v2510_v52  ;;  %v2649_v52 = vld [vmem:[#allocation7 + $0x108] sm:$0xff] }
0x12a1   :  { %3914 = vmatprep.subr.mxu0 %v2509_v53 }
0x12a2   :  { %3915 = vmatpush3.msra.mxu0 %v2509_v53  ;;  %v2648_v53 = vld [vmem:[#allocation7 + $0x100] sm:$0xff] }
0x12a3   :  { %3916 = vmatprep.subr.mxu0 %v2508_v58 }
0x12a4   :  { %3917 = vmatpush3.msra.mxu0 %v2508_v58 }
0x12a5   :  { %3918 = vmatprep.subr.mxu0 %v2507_v59 }
0x12a6   :  { %3919 = vmatpush3.msra.mxu0 %v2507_v59 }
0x12a7   :  { %3920 = vmatprep.subr.mxu0 %v2506_v60 }
0x12a8   :  { %3921 = vmatpush3.msra.mxu0 %v2506_v60 }
0x12a9   :  { %3922 = vmatprep.subr.mxu0 %v2505_v61 }
0x12aa   :  { %3923 = vmatpush3.msra.mxu0 %v2505_v61 }
0x12ab   :  { %3924 = vmatprep.subr.mxu0 %v2504_v62 }
0x12ac   :  { %3925 = vmatpush3.msra.mxu0 %v2504_v62 }
0x1306   :  { %v2412_v32 = vpop.xlane.xlu1 %2411 }
0x1307   :  { %v2413_v33 = vsub.f32 %v2407_v28, %v2412_v32  ;;  %v2670_v28 = vld [vmem:[#allocation7 + $0x1b0] sm:$0xff]  ;;  %v2667_v32 = vld [vmem:[#allocation7 + $0x198] sm:$0xff] }
0x1309   :  { %v2414_v34 = vmul.f32 1.442695, %v2413_v33  ;;  %v2666_v33 = vld [vmem:[#allocation7 + $0x190] sm:$0xff] }
0x130a   :  { %v2423_v27 = vpop.permute.xlu1 %2422 }
0x130b   :  { %4117 = vpow2.f32 %v2414_v34  ;;  %3890 = vmatpush3.msra.mxu1 %v2423_v27  ;;  %v2665_v34 = vld [vmem:[#allocation7 + $0x188] sm:$0xff]  ;;  %v2664_v27 = vld [vmem:[#allocation7 + $0x180] sm:$0xff] }
0x1318   :  { %v4118_v36 = vpop.eup %4117 }
0x1319   :  { %v2416_v10 = vsel %vm504_vm2, %v4118_v36, 0.0 }
0x131a   :  { %2417 = vadd.xlane.f32.xlu0 %v2416_v10  ;;  %v2662_v10 = vld [vmem:[#allocation7 + $0x170] sm:$0xff] }
0x13a3   :  { %v2418_v12 = vpop.xlane.xlu0 %2417 }
0x13a4   :  { %4119 = vrcp.f32 %v2418_v12  ;;  %v2661_v12 = vld [vmem:[#allocation7 + $0x168] sm:$0xff] }
0x13b1   :  { %v4120_v46 = vpop.eup %4119 }
0x13b2   :  { %v2420_v17 = vmul.f32 %v4120_v46, %v4118_v36  ;;  %v2663_v36 = vld [vmem:[#allocation7 + $0x178] sm:$0xff]  ;;  %v2660_v46 = vld [vmem:[#allocation7 + $0x160] sm:$0xff] }
0x13b4   :  { %3892 = vmatmul.mubr.msk.f32.vlgmr.msra.gmra.mxu1 %vm504_vm2, %v2420_v17  ;;  %v2659_v17 = vld [vmem:[#allocation7 + $0x158] sm:$0xff] }
0x13b5   :  { %2757 = vmatprep.mubr.f32.mxu1 %v4317_v56 }
0x1474   :  { %v2494_v63 = vpop.f32.mrf.mxu1 }
0x1475   :  { %v4056_v0 = vpack.i.bf16 %v2494_v63, %v4739_v1 }
0x1476   :  { %v3893_v57 = vpop.f32.mrf.mxu1 }
0x1477   :  { %4057 = vrot.lane.b32.xlu0 %v4056_v0, %s4319_s29  ;;  %v3464_v57 = vld [vmem:[%s5026_s30 + $0x1] ss:$0 sm:$0xff] }
0x14e9   :  { %v4058_v2 = vpop.permute.xlu0 %4057 }
0x14ea   :  { %v4060_v54 = vunpack.i.h.bf16 %v4058_v2  ;;  %v4059_v39 = vunpack.i.l.bf16 %v4058_v2 }
0x14ec   :  { %v2171_v51 = vsel %vm427_vm1, %v4720_v50, %v4059_v39  ;;  %v2502_v3 = vsel %vm427_vm1, %v4750_v7, %v4060_v54  ;;  %v2679_v50 = vld [vmem:[#allocation7 + $0x1f8] sm:$0xff]  ;;  %v3465_v54 = vld [vmem:[%s4986_s9 + $0x1] ss:$0 sm:$0xff] }
0x14ed   :  { %3926 = vmatprep.mubr.f32.mxu0 %v2171_v51  ;;  %2693 = vmatprep.subr.mxu1 %v2679_v50  ;;  %v2908_v50 = vld [vmem:[#allocation8 + $0x1e8] sm:$0xff] }
0x14ee   :  { %3927 = vmatmul.mubr.f32.vlgmr.msra.gmra.mxu0 %v2502_v3  ;;  %2694 = vmatpush1.msra.mxu1 %v2678_v11  ;;  %v2892_v11 = vld [vmem:[#allocation8 + $0x168] sm:$0xff] }
0x14ef   :  { %2695 = vmatprep.subr.mxu1 %v2677_v14  ;;  %v2907_v14 = vld [vmem:[#allocation8 + $0x1e0] sm:$0xff] }
0x14f0   :  { %2696 = vmatpush1.msra.mxu1 %v2676_v49  ;;  %v2891_v49 = vld [vmem:[#allocation8 + $0x160] sm:$0xff] }
0x14f1   :  { %2697 = vmatprep.subr.mxu1 %v2675_v16  ;;  %v2906_v16 = vld [vmem:[#allocation8 + $0x1d8] sm:$0xff] }
0x14f2   :  { %2698 = vmatpush1.msra.mxu1 %v2674_v18  ;;  %v2890_v18 = vld [vmem:[#allocation8 + $0x158] sm:$0xff] }
0x14f3   :  { %2699 = vmatprep.subr.mxu1 %v2673_v20  ;;  %v2905_v20 = vld [vmem:[#allocation8 + $0x1d0] sm:$0xff] }
0x14f4   :  { %2700 = vmatpush1.msra.mxu1 %v2672_v21  ;;  %v2889_v21 = vld [vmem:[#allocation8 + $0x150] sm:$0xff] }
0x14f5   :  { %2701 = vmatprep.subr.mxu1 %v2671_v26  ;;  %v2900_v26 = vld [vmem:[#allocation8 + $0x1a8] sm:$0xff] }
0x14f6   :  { %2702 = vmatpush1.msra.mxu1 %v2670_v28  ;;  %v2884_v28 = vld [vmem:[#allocation8 + $0x128] sm:$0xff] }
0x14f7   :  { %2703 = vmatprep.subr.mxu1 %v2669_v30  ;;  %v2899_v30 = vld [vmem:[#allocation8 + $0x1a0] sm:$0xff] }
0x14f8   :  { %2704 = vmatpush1.msra.mxu1 %v2668_v31  ;;  %v2883_v31 = vld [vmem:[#allocation8 + $0x120] sm:$0xff] }
0x14f9   :  { %2705 = vmatprep.subr.mxu1 %v2667_v32  ;;  %v2898_v32 = vld [vmem:[#allocation8 + $0x198] sm:$0xff] }
0x14fa   :  { %2706 = vmatpush1.msra.mxu1 %v2666_v33  ;;  %v2882_v33 = vld [vmem:[#allocation8 + $0x118] sm:$0xff] }
0x14fb   :  { %2707 = vmatprep.subr.mxu1 %v2665_v34  ;;  %v2897_v34 = vld [vmem:[#allocation8 + $0x190] sm:$0xff] }
0x14fc   :  { %2708 = vmatpush1.msra.mxu1 %v2664_v27  ;;  %v2881_v27 = vld [vmem:[#allocation8 + $0x110] sm:$0xff] }
0x14fd   :  { %2709 = vmatprep.subr.mxu1 %v2663_v36  ;;  %v2896_v36 = vld [vmem:[#allocation8 + $0x188] sm:$0xff] }
0x14fe   :  { %2710 = vmatpush1.msra.mxu1 %v2662_v10  ;;  %v2880_v10 = vld [vmem:[#allocation8 + $0x108] sm:$0xff] }
0x14ff   :  { %2711 = vmatprep.subr.mxu1 %v2661_v12  ;;  %v2895_v12 = vld [vmem:[#allocation8 + $0x180] sm:$0xff] }
0x1500   :  { %2712 = vmatpush1.msra.mxu1 %v2660_v46  ;;  %v2879_v46 = vld [vmem:[#allocation8 + $0x100] sm:$0xff] }
0x1501   :  { %2713 = vmatprep.subr.mxu1 %v2659_v17  ;;  %v3466_v17 = vld [vmem:[%s4988_s11 + $0x2] sm:$0x3] }
0x1502   :  { %2714 = vmatpush1.msra.mxu1 %v2658_v37  ;;  %v2686_v37 = vrot.slane %v3466_v17, %v4518_v13 }
0x1503   :  { %2715 = vmatprep.subr.mxu1 %v2657_v29  ;;  %v2690_v29 = vrot.slane %v3466_v17, %v4524_v15 }
0x1504   :  { %2716 = vmatpush1.msra.mxu1 %v2656_v38 }
0x1505   :  { %2717 = vmatprep.subr.mxu1 %v2655_v40 }
0x1506   :  { %2718 = vmatpush1.msra.mxu1 %v2654_v41 }
0x1507   :  { %2719 = vmatprep.subr.mxu1 %v2653_v42 }
0x1508   :  { %2720 = vmatpush1.msra.mxu1 %v2652_v43 }
0x1509   :  { %2721 = vmatprep.subr.mxu1 %v2651_v44 }
0x150a   :  { %2722 = vmatpush1.msra.mxu1 %v2650_v47 }
0x150b   :  { %2723 = vmatprep.subr.mxu1 %v2649_v52 }
0x150c   :  { %2724 = vmatpush1.msra.mxu1 %v2648_v53 }
0x150d   :  { %3929 = vmatprep.subr.mxu1 %v4317_v56 }
0x15ae   :  { %v3928_v5 = vpop.f32.mrf.mxu0 }
0x15af   :  { %v2600_v1 = vadd.f32 %v3928_v5, %v3461_v4 }
0x15b0   :  { %v2594_v6 = vpop.f32.mrf.mxu0 }
0x15b1   :  { %v2595_v8 = vadd.f32 %v3461_v4, %v2594_v6  ;;  %v2604_v48 = vadd.f32 %v2600_v1, %v4681_v19  ;;  %v2910_v6 = vld [vmem:[#allocation8 + $0x1f8] sm:$0xff] }
0x15b2   :  { %3620 = vmatprep.subr.mxu0 %v2910_v6 }
0x15b3   :  { %2611 = vadd.xlane.f32.xlu0 %v2604_v48  ;;  %v2603_v9 = vadd.f32 %v2595_v8, %v4675_v55  ;;  %v2894_v8 = vld [vmem:[#allocation8 + $0x178] sm:$0xff] }
0x15b4   :  { %3621 = vmatpush3.msra.mxu0 %v2894_v8 }
0x15b5   :  { %2609 = vadd.xlane.f32.xlu1 %v2603_v9 }
0x163c   :  { %v2612_v19 = vpop.xlane.xlu0 %2611 }
0x163d   :  { %v2614_v55 = vmul.f32 0.0078125, %v2612_v19  ;;  %v2904_v19 = vld [vmem:[#allocation8 + $0x1c8] sm:$0xff] }
0x163e   :  { %v2610_v22 = vpop.xlane.xlu1 %2609 }
0x163f   :  { %v2613_v23 = vmul.f32 0.0078125, %v2610_v22  ;;  %v4772_v24 = vsub.f32 %v2604_v48, %v2614_v55  ;;  %v2909_v48 = vld [vmem:[#allocation8 + $0x1f0] sm:$0xff]  ;;  %v2888_v22 = vld [vmem:[#allocation8 + $0x148] sm:$0xff]  ;;  %v2903_v55 = vld [vmem:[#allocation8 + $0x1c0] sm:$0xff] }
0x1640   :  { %3622 = vmatprep.subr.mxu0 %v2909_v48 }
0x1641   :  { %v4770_v45 = vsub.f32 %v2603_v9, %v2613_v23  ;;  %v2618_v25 = vmul.f32 %v4772_v24, %v4772_v24  ;;  %v2893_v9 = vld [vmem:[#allocation8 + $0x170] sm:$0xff]  ;;  %v2887_v23 = vld [vmem:[#allocation8 + $0x140] sm:$0xff] }
0x1642   :  { %3623 = vmatpush3.msra.mxu0 %v2893_v9 }
0x1643   :  { %v2617_v7 = vmul.f32 %v4770_v45, %v4770_v45  ;;  %3624 = vmatprep.subr.mxu0 %v2908_v50 }
0x1644   :  { %3625 = vmatpush3.msra.mxu0 %v2892_v11 }
0x1645   :  { %2619 = vadd.xlane.f32.xlu1 %v2617_v7  ;;  %3626 = vmatprep.subr.mxu0 %v2907_v14  ;;  %v2901_v7 = vld [vmem:[#allocation8 + $0x1b0] sm:$0xff] }
0x1646   :  { %3627 = vmatpush3.msra.mxu0 %v2891_v49 }
0x1647   :  { %3628 = vmatprep.subr.mxu0 %v2906_v16 }
0x1648   :  { %3629 = vmatpush3.msra.mxu0 %v2890_v18 }
0x1649   :  { %2621 = vadd.xlane.f32.xlu1 %v2618_v25  ;;  %3630 = vmatprep.subr.mxu0 %v2905_v20  ;;  %v2885_v25 = vld [vmem:[#allocation8 + $0x130] sm:$0xff] }
0x164a   :  { %3631 = vmatpush3.msra.mxu0 %v2889_v21 }
0x164b   :  { %3632 = vmatprep.subr.mxu0 %v2904_v19 }
0x164c   :  { %3633 = vmatpush3.msra.mxu0 %v2888_v22 }
0x164d   :  { %3634 = vmatprep.subr.mxu0 %v2903_v55 }
0x164e   :  { %3635 = vmatpush3.msra.mxu0 %v2887_v23 }
0x16ce   :  { %v2620_v58 = vpop.xlane.xlu1 %2619 }
0x16cf   :  { %v2623_v59 = vmul.f32 0.0078125, %v2620_v58 }
0x16d1   :  { %v2625_v60 = vadd.f32 1e-12, %v2623_v59 }
0x16d2   :  { %v2622_v61 = vpop.xlane.xlu1 %2621 }
0x16d3   :  { %4121 = vrsqrt.f32 %v2625_v60  ;;  %v2624_v62 = vmul.f32 0.0078125, %v2622_v61 }
0x16d5   :  { %v2626_v63 = vadd.f32 1e-12, %v2624_v62 }
0x16d7   :  { %4123 = vrsqrt.f32 %v2626_v63 }
0x16e0   :  { %v4122_v0 = vpop.eup %4121 }
0x16e1   :  { %v2629_v2 = vmul.f32 %v4122_v0, %v4770_v45  ;;  %v2902_v45 = vld [vmem:[#allocation8 + $0x1b8] sm:$0xff] }
0x16e2   :  { %3636 = vmatprep.subr.mxu0 %v2902_v45 }
0x16e3   :  { %v2637_v39 = vmul.f32 %v3464_v57, %v2629_v2 }
0x16e4   :  { %v4124_v51 = vpop.eup %4123 }
0x16e5   :  { %v4786_v3 = vadd.f32 %v3465_v54, %v2637_v39  ;;  %v2630_v4 = vmul.f32 %v4124_v51, %v4772_v24  ;;  %v2886_v24 = vld [vmem:[#allocation8 + $0x138] sm:$0xff] }
0x16e6   :  { %3637 = vmatpush3.msra.mxu0 %v2886_v24 }
0x16e7   :  { %2758 = vmatmul.mubr.f32.vlgmr.msra.gmra.mxu1 %v4786_v3  ;;  %v2638_v5 = vmul.f32 %v3464_v57, %v2630_v4  ;;  %3638 = vmatprep.subr.mxu0 %v2901_v7 }
0x16e8   :  { %2763 = vmatprep.mubr.f32.mxu1 %v4317_v56  ;;  %3639 = vmatpush3.msra.mxu0 %v2885_v25 }
0x16e9   :  { %v4791_v1 = vadd.f32 %v3465_v54, %v2638_v5  ;;  %3640 = vmatprep.subr.mxu0 %v2900_v26 }
0x16ea   :  { %3641 = vmatpush3.msra.mxu0 %v2884_v28 }
0x16eb   :  { %2764 = vmatmul.mubr.f32.gmra.mxu1 %v4791_v1  ;;  %3642 = vmatprep.subr.mxu0 %v2899_v30 }
0x16ec   :  { %3961 = vmatprep.mubr.msk.f32.mxu1 %vm4318_vm0, %v4317_v56  ;;  %3643 = vmatpush3.msra.mxu0 %v2883_v31 }
0x16ed   :  { %3644 = vmatprep.subr.mxu0 %v2898_v32 }
0x16ee   :  { %3645 = vmatpush3.msra.mxu0 %v2882_v33 }
0x16ef   :  { %3646 = vmatprep.subr.mxu0 %v2897_v34 }
0x16f0   :  { %3647 = vmatpush3.msra.mxu0 %v2881_v27 }
0x16f1   :  { %3648 = vmatprep.subr.mxu0 %v2896_v36 }
0x16f2   :  { %3649 = vmatpush3.msra.mxu0 %v2880_v10 }
0x16f3   :  { %3650 = vmatprep.subr.mxu0 %v2895_v12 }
0x16f4   :  { %3651 = vmatpush3.msra.mxu0 %v2879_v46 }
0x16f5   :  { %3964 = vmatprep.subr.mxu0 %v4317_v56 }
0x17a7   :  { %v2759_v38 = vpop.f32.mrf.mxu1 }
0x17a8   :  { %v4802_v40 = vadd.f32 %v2759_v38, %v2686_v37 }
0x17a9   :  { %v2761_v41 = vpop.f32.mrf.mxu1 }
0x17aa   :  { %v4805_v42 = vmul.f32 0.70710677, %v4802_v40  ;;  %v4807_v43 = vadd.f32 %v2761_v41, %v2690_v29 }
0x17ab   :  { %v2765_v44 = vpop.f32.mrf.mxu1 }
0x17ac   :  { %v2786_v47 = vand.u32 2147483647, %v4805_v42  ;;  %v4811_v52 = vmul.f32 0.70710677, %v4807_v43  ;;  %v4813_v53 = vadd.f32 %v2765_v44, %v2686_v37  ;;  %vm2778_vm7 = vcmp.ge.f32.partialorder %v4805_v42, 0.0 }
0x17ad   :  { %v2767_v13 = vpop.f32.mrf.mxu1 }
0x17ae   :  { %v2790_v58 = vmul.f32 0.3275911, %v2786_v47  ;;  %v2787_v15 = vand.u32 2147483647, %v4811_v52  ;;  %v4817_v59 = vmul.f32 0.70710677, %v4813_v53  ;;  %v4819_v60 = vadd.f32 %v2767_v13, %v2690_v29 }
0x17af   :  { %v2842_v4 = vsub.f32 0.0, %v2786_v47  ;;  %vm2779_vm8 = vcmp.ge.f32.partialorder %v4811_v52, 0.0 }
0x17b0   :  { %v2794_v61 = vadd.f32 1.0, %v2790_v58  ;;  %v2791_v62 = vmul.f32 0.3275911, %v2787_v15  ;;  %v2788_v63 = vand.u32 2147483647, %v4817_v59  ;;  %v2843_v6 = vsub.f32 0.0, %v2787_v15 }
0x17b1   :  { %v4823_v0 = vmul.f32 0.70710677, %v4819_v60  ;;  %v2846_v8 = vmul.f32 %v2842_v4, %v2786_v47  ;;  %vm2780_vm9 = vcmp.ge.f32.partialorder %v4817_v59, 0.0  ;;  %v2770_v59 = vmul.f32 0.5, %v4802_v40 }
0x17b2   :  { %4125 = vrcp.f32 %v2794_v61  ;;  %v2795_v57 = vadd.f32 1.0, %v2791_v62  ;;  %v2792_v2 = vmul.f32 0.3275911, %v2788_v63  ;;  %v2844_v48 = vsub.f32 0.0, %v2788_v63 }
0x17b3   :  { %v2789_v54 = vand.u32 2147483647, %v4823_v0  ;;  %v2847_v50 = vmul.f32 %v2843_v6, %v2787_v15  ;;  %v2850_v14 = vmul.f32 1.442695, %v2846_v8  ;;  %v2782_v6 = vsel %vm2778_vm7, 1.0, %v4320_v35 }
0x17b4   :  { %4127 = vrcp.f32 %v2795_v57  ;;  %v2796_v39 = vadd.f32 1.0, %v2792_v2  ;;  %v2848_v16 = vmul.f32 %v2844_v48, %v2788_v63  ;;  %vm2781_vm10 = vcmp.ge.f32.partialorder %v4823_v0, 0.0 }
0x17b5   :  { %v2793_v51 = vmul.f32 0.3275911, %v2789_v54  ;;  %v2845_v49 = vsub.f32 0.0, %v2789_v54  ;;  %v2852_v21 = vmul.f32 1.442695, %v2847_v50  ;;  %v2772_v0 = vmul.f32 0.5, %v4813_v53 }
0x17b6   :  { %4129 = vrcp.f32 %v2796_v39  ;;  %v2854_v45 = vmul.f32 1.442695, %v2848_v16 }
0x17b7   :  { %v2797_v5 = vadd.f32 1.0, %v2793_v51  ;;  %v2849_v23 = vmul.f32 %v2845_v49, %v2789_v54  ;;  %v2783_v49 = vsel %vm2779_vm8, 1.0, %v4320_v35 }
0x17b9   :  { %4131 = vrcp.f32 %v2797_v5  ;;  %v2856_v32 = vmul.f32 1.442695, %v2849_v23 }
0x17ba   :  { %4133 = vpow2.f32 %v2850_v14 }
0x17bb   :  { %4135 = vpow2.f32 %v2852_v21 }
0x17bc   :  { %4137 = vpow2.f32 %v2854_v45 }
0x17bd   :  { %4139 = vpow2.f32 %v2856_v32 }
0x17bf   :  { %v4126_v9 = vpop.eup %4125 }
0x17c0   :  { %v2806_v11 = vmul.f32 1.0614054, %v4126_v9 }
0x17c1   :  { %v4128_v18 = vpop.eup %4127 }
0x17c2   :  { %v2810_v20 = vadd.f32 -1.4531521, %v2806_v11  ;;  %v2807_v19 = vmul.f32 1.0614054, %v4128_v18 }
0x17c3   :  { %v4130_v22 = vpop.eup %4129 }
0x17c4   :  { %v2814_v55 = vmul.f32 %v4126_v9, %v2810_v20  ;;  %v2811_v24 = vadd.f32 -1.4531521, %v2807_v19  ;;  %v2808_v7 = vmul.f32 1.0614054, %v4130_v22 }
0x17c6   :  { %v2818_v25 = vadd.f32 1.4214138, %v2814_v55  ;;  %v4132_v26 = vpop.eup %4131  ;;  %v2815_v28 = vmul.f32 %v4128_v18, %v2811_v24  ;;  %v2812_v30 = vadd.f32 -1.4531521, %v2808_v7  ;;  %v2784_v55 = vsel %vm2780_vm9, 1.0, %v4320_v35 }
0x17c7   :  { %v2809_v33 = vmul.f32 1.0614054, %v4132_v26  ;;  %v4134_v61 = vpop.eup %4133  ;;  %v2785_v7 = vsel %vm2781_vm10, 1.0, %v4320_v35 }
0x17c8   :  { %v2822_v31 = vmul.f32 %v4126_v9, %v2818_v25  ;;  %v2819_v34 = vadd.f32 1.4214138, %v2815_v28  ;;  %v2816_v27 = vmul.f32 %v4130_v22, %v2812_v30  ;;  %v4136_v51 = vpop.eup %4135 }
0x17c9   :  { %v2813_v10 = vadd.f32 -1.4531521, %v2809_v33 }
0x17ca   :  { %v2826_v36 = vadd.f32 -0.28449672, %v2822_v31  ;;  %v2823_v12 = vmul.f32 %v4128_v18, %v2819_v34  ;;  %v2820_v46 = vadd.f32 1.4214138, %v2816_v27  ;;  %v2773_v31 = vmul.f32 0.5, %v4819_v60 }
0x17cb   :  { %v2817_v37 = vmul.f32 %v4132_v26, %v2813_v10  ;;  %v3468_v34 = vld [vmem:[%s4990_s13 + $0x1] ss:$0 sm:$0xff] }
0x17cc   :  { %v2830_v17 = vmul.f32 %v4126_v9, %v2826_v36  ;;  %v2827_v29 = vadd.f32 -0.28449672, %v2823_v12  ;;  %v2824_v38 = vmul.f32 %v4130_v22, %v2820_v46 }
0x17cd   :  { %v2821_v44 = vadd.f32 1.4214138, %v2817_v37 }
0x17ce   :  { %v2834_v41 = vadd.f32 0.2548296, %v2830_v17  ;;  %v2831_v47 = vmul.f32 %v4128_v18, %v2827_v29  ;;  %v2828_v13 = vadd.f32 -0.28449672, %v2824_v38 }
0x17cf   :  { %v2825_v15 = vmul.f32 %v4132_v26, %v2821_v44 }
0x17d0   :  { %v2838_v58 = vmul.f32 %v4126_v9, %v2834_v41  ;;  %v2835_v62 = vadd.f32 0.2548296, %v2831_v47  ;;  %v2832_v63 = vmul.f32 %v4130_v22, %v2828_v13  ;;  %v4138_v9 = vpop.eup %4137 }
0x17d1   :  { %v2829_v2 = vadd.f32 -0.28449672, %v2825_v15 }
0x17d2   :  { %v2858_v57 = vmul.f32 %v4134_v61, %v2838_v58  ;;  %v2839_v54 = vmul.f32 %v4128_v18, %v2835_v62  ;;  %v2836_v39 = vadd.f32 0.2548296, %v2832_v63  ;;  %v4140_v18 = vpop.eup %4139 }
0x17d3   :  { %v2833_v5 = vmul.f32 %v4132_v26, %v2829_v2 }
0x17d4   :  { %v2862_v4 = vsub.f32 1.0, %v2858_v57  ;;  %v2859_v8 = vmul.f32 %v4136_v51, %v2839_v54  ;;  %v2840_v48 = vmul.f32 %v4130_v22, %v2836_v39  ;;  %v2771_v22 = vmul.f32 0.5, %v4807_v43  ;;  %v3471_v51 = vld [vmem:[%s4991_s14 + $0x1] ss:$0 sm:$0xff] }
0x17d5   :  { %v2837_v11 = vadd.f32 0.2548296, %v2833_v5 }
0x17d6   :  { %v2866_v50 = vmul.f32 %v2862_v4, %v2782_v6  ;;  %v2863_v14 = vsub.f32 1.0, %v2859_v8  ;;  %v2860_v42 = vmul.f32 %v4138_v9, %v2840_v48  ;;  %v3472_v8 = vld [vmem:[%s4992_s15 + $0x1] ss:$0 sm:$0xff] }
0x17d7   :  { %v2841_v16 = vmul.f32 %v4132_v26, %v2837_v11 }
0x17d8   :  { %v2867_v20 = vmul.f32 %v2863_v14, %v2783_v49  ;;  %v2864_v21 = vsub.f32 1.0, %v2860_v42  ;;  %v2870_v19 = vadd.f32 1.0, %v2866_v50  ;;  %v3088_v42 = vld [vmem:[%s4995_s18 + $0x78] sm:$0xff]  ;;  %v3087_v49 = vld [vmem:[%s4995_s18 + $0x70] sm:$0xff] }
0x17d9   :  { %v2861_v52 = vmul.f32 %v4140_v18, %v2841_v16  ;;  %3930 = vmatpush3.msra.mxu1 %v3088_v42  ;;  %v3086_v16 = vld [vmem:[%s4995_s18 + $0x68] sm:$0xff]  ;;  %v3085_v18 = vld [vmem:[%s4995_s18 + $0x60] sm:$0xff] }
0x17da   :  { %v2871_v23 = vadd.f32 1.0, %v2867_v20  ;;  %v2868_v45 = vmul.f32 %v2864_v21, %v2784_v55  ;;  %v2874_v26 = vmul.f32 %v2870_v19, %v2770_v59  ;;  %3931 = vmatprep.subr.mxu1 %v4317_v56  ;;  %v3081_v59 = vld [vmem:[%s4995_s18 + $0x40] sm:$0xff] }
0x17db   :  { %v2865_v24 = vsub.f32 1.0, %v2861_v52  ;;  %3932 = vmatpush3.msra.mxu1 %v3087_v49 }
0x17dc   :  { %v2875_v25 = vmul.f32 %v2871_v23, %v2771_v22  ;;  %v2872_v30 = vadd.f32 1.0, %v2868_v45  ;;  %3933 = vmatprep.subr.mxu1 %v4317_v56  ;;  %v3084_v22 = vld [vmem:[%s4995_s18 + $0x58] sm:$0xff]  ;;  %v3083_v23 = vld [vmem:[%s4995_s18 + $0x50] sm:$0xff]  ;;  %v3082_v45 = vld [vmem:[%s4995_s18 + $0x48] sm:$0xff] }
0x17dd   :  { %v2869_v28 = vmul.f32 %v2865_v24, %v2785_v7  ;;  %3934 = vmatpush3.msra.mxu1 %v3086_v16  ;;  %v3080_v24 = vld [vmem:[%s4995_s18 + $0x38] sm:$0xff]  ;;  %v3079_v7 = vld [vmem:[%s4995_s18 + $0x30] sm:$0xff] }
0x17de   :  { %2983 = vmatprep.mubr.f32.mxu0 %v2875_v25  ;;  %v2876_v43 = vmul.f32 %v2872_v30, %v2772_v0  ;;  %3935 = vmatprep.subr.mxu1 %v4317_v56  ;;  %v3078_v25 = vld [vmem:[%s4995_s18 + $0x28] sm:$0xff]  ;;  %v3075_v30 = vld [vmem:[%s4995_s18 + $0x10] sm:$0xff] }
0x17df   :  { %2984 = vmatmul.mubr.f32.vlgmr.msra.gmra.mxu0 %v2874_v26  ;;  %v2873_v32 = vadd.f32 1.0, %v2869_v28  ;;  %3936 = vmatpush3.msra.mxu1 %v3085_v18  ;;  %v3077_v26 = vld [vmem:[%s4995_s18 + $0x20] sm:$0xff]  ;;  %v3076_v28 = vld [vmem:[%s4995_s18 + $0x18] sm:$0xff] }
0x17e0   :  { %3937 = vmatprep.subr.mxu1 %v4317_v56 }
0x17e1   :  { %v2877_v33 = vmul.f32 %v2873_v32, %v2773_v31  ;;  %3938 = vmatpush3.msra.mxu1 %v3084_v22  ;;  %v3074_v31 = vld [vmem:[%s4995_s18 + $0x8] sm:$0xff]  ;;  %v3073_v32 = vld [vmem:[%s4995_s18] sm:$0xff] }
0x17e2   :  { %3939 = vmatprep.subr.mxu1 %v4317_v56 }
0x17e3   :  { %2988 = vmatprep.mubr.f32.mxu0 %v2877_v33  ;;  %3940 = vmatpush3.msra.mxu1 %v3083_v23 }
0x17e4   :  { %2989 = vmatmul.mubr.f32.gmra.mxu0 %v2876_v43  ;;  %3941 = vmatprep.subr.mxu1 %v4317_v56 }
0x17e5   :  { %3996 = vmatprep.mubr.msk.f32.mxu0 %vm4318_vm0, %v4317_v56  ;;  %3942 = vmatpush3.msra.mxu1 %v3082_v45 }
0x17e6   :  { %3943 = vmatprep.subr.mxu1 %v4317_v56 }
0x17e7   :  { %3944 = vmatpush3.msra.mxu1 %v3081_v59 }
0x17e8   :  { %3945 = vmatprep.subr.mxu1 %v4317_v56 }
0x17e9   :  { %3946 = vmatpush3.msra.mxu1 %v3080_v24 }
0x17ea   :  { %3947 = vmatprep.subr.mxu1 %v4317_v56 }
0x17eb   :  { %3948 = vmatpush3.msra.mxu1 %v3079_v7  ;;  %v3330_v7 = vld [vmem:[#allocation11 + $0x78] sm:$0xff] }
0x17ec   :  { %3949 = vmatprep.subr.mxu1 %v4317_v56 }
0x17ed   :  { %3950 = vmatpush3.msra.mxu1 %v3078_v25  ;;  %v3329_v25 = vld [vmem:[#allocation11 + $0x70] sm:$0xff] }
0x17ee   :  { %3951 = vmatprep.subr.mxu1 %v4317_v56 }
0x17ef   :  { %3952 = vmatpush3.msra.mxu1 %v3077_v26  ;;  %v3328_v26 = vld [vmem:[#allocation11 + $0x68] sm:$0xff] }
0x17f0   :  { %3953 = vmatprep.subr.mxu1 %v4317_v56 }
0x17f1   :  { %3954 = vmatpush3.msra.mxu1 %v3076_v28  ;;  %v3327_v28 = vld [vmem:[#allocation11 + $0x60] sm:$0xff] }
0x17f2   :  { %3955 = vmatprep.subr.mxu1 %v4317_v56 }
0x17f3   :  { %3956 = vmatpush3.msra.mxu1 %v3075_v30  ;;  %v3326_v30 = vld [vmem:[#allocation11 + $0x58] sm:$0xff] }
0x17f4   :  { %3957 = vmatprep.subr.mxu1 %v4317_v56 }
0x17f5   :  { %3958 = vmatpush3.msra.mxu1 %v3074_v31  ;;  %v3325_v31 = vld [vmem:[#allocation11 + $0x50] sm:$0xff] }
0x17f6   :  { %3959 = vmatprep.subr.mxu1 %v4317_v56 }
0x17f7   :  { %3960 = vmatpush3.msra.mxu1 %v3073_v32  ;;  %v3324_v32 = vld [vmem:[#allocation11 + $0x48] sm:$0xff] }
0x17f8   :  { %3999 = vmatprep.subr.mxu1 %v4317_v56 }
0x189f   :  { %v3652_v40 = vpop.f32.mrf.mxu0 }
0x18a1   :  { %v3653_v27 = vpop.f32.mrf.mxu0 }
0x18a2   :  { %v3654_v36 = vadd.f32 %v3653_v27, %v3652_v40 }
0x18a4   :  { %v2986_v10 = vadd.f32 %v3654_v36, %v3468_v34  ;;  %v3655_v60 = vpop.f32.mrf.mxu0  ;;  %v3474_v36 = vld [vmem:[%s4994_s17] ss:$0 sm:$0xff] }
0x18a6   :  { %v3656_v12 = vpop.f32.mrf.mxu0  ;;  %v2994_v46 = vadd.f32 %v2986_v10, %v4786_v3 }
0x18a7   :  { %v3657_v53 = vadd.f32 %v3656_v12, %v3655_v60  ;;  %v3209_v12 = vld [vmem:[#allocation10 + $0x78] sm:$0xff] }
0x18a8   :  { %3000 = vadd.xlane.f32.xlu1 %v2994_v46  ;;  %3965 = vmatpush3.msra.mxu0 %v3209_v12  ;;  %v3476_v12 = vld [vmem:[%s4998_s21] ss:$0 sm:$0xff] }
0x18a9   :  { %v2991_v17 = vadd.f32 %v3657_v53, %v3468_v34  ;;  %v3473_v34 = vld [vmem:[%s4993_s16] ss:$0 sm:$0xff]  ;;  %3966 = vmatprep.subr.mxu0 %v4317_v56  ;;  %v3207_v53 = vld [vmem:[#allocation10 + $0x68] sm:$0xff] }
0x18ab   :  { %v2995_v37 = vadd.f32 %v2991_v17, %v4791_v1  ;;  %v3206_v17 = vld [vmem:[#allocation10 + $0x60] sm:$0xff] }
0x18ad   :  { %3002 = vadd.xlane.f32.xlu0 %v2995_v37 }
0x1931   :  { %v3001_v29 = vpop.xlane.xlu1 %3000 }
0x1932   :  { %v3004_v38 = vmul.f32 0.0078125, %v3001_v29  ;;  %v3204_v29 = vld [vmem:[#allocation10 + $0x50] sm:$0xff] }
0x1934   :  { %v3006_v41 = vsub.f32 %v2994_v46, %v3004_v38  ;;  %v3208_v46 = vld [vmem:[#allocation10 + $0x70] sm:$0xff]  ;;  %v3203_v38 = vld [vmem:[#allocation10 + $0x48] sm:$0xff] }
0x1935   :  { %3967 = vmatpush3.msra.mxu0 %v3208_v46 }
0x1936   :  { %v3003_v44 = vpop.xlane.xlu0 %3002  ;;  %v3008_v47 = vmul.f32 %v3006_v41, %v3006_v41  ;;  %3968 = vmatprep.subr.mxu0 %v4317_v56 }
0x1937   :  { %v3005_v13 = vmul.f32 0.0078125, %v3003_v44  ;;  %3969 = vmatpush3.msra.mxu0 %v3207_v53  ;;  %v3201_v44 = vld [vmem:[#allocation10 + $0x38] sm:$0xff] }
0x1938   :  { %3010 = vadd.xlane.f32.xlu1 %v3008_v47  ;;  %3970 = vmatprep.subr.mxu0 %v4317_v56  ;;  %v3200_v47 = vld [vmem:[#allocation10 + $0x30] sm:$0xff] }
0x1939   :  { %v3007_v58 = vsub.f32 %v2995_v37, %v3005_v13  ;;  %3971 = vmatpush3.msra.mxu0 %v3206_v17  ;;  %v3205_v37 = vld [vmem:[#allocation10 + $0x58] sm:$0xff]  ;;  %v3199_v13 = vld [vmem:[#allocation10 + $0x28] sm:$0xff] }
0x193a   :  { %3972 = vmatprep.subr.mxu0 %v4317_v56 }
0x193b   :  { %v3009_v15 = vmul.f32 %v3007_v58, %v3007_v58  ;;  %3973 = vmatpush3.msra.mxu0 %v3205_v37 }
0x193c   :  { %3974 = vmatprep.subr.mxu0 %v4317_v56 }
0x193d   :  { %3012 = vadd.xlane.f32.xlu0 %v3009_v15  ;;  %3975 = vmatpush3.msra.mxu0 %v3204_v29  ;;  %v3197_v15 = vld [vmem:[#allocation10 + $0x18] sm:$0xff] }
0x193e   :  { %3976 = vmatprep.subr.mxu0 %v4317_v56 }
0x193f   :  { %3977 = vmatpush3.msra.mxu0 %v3203_v38 }
0x1940   :  { %3978 = vmatprep.subr.mxu0 %v4317_v56 }
0x19c1   :  { %v3011_v61 = vpop.xlane.xlu1 %3010 }
0x19c2   :  { %v3014_v62 = vmul.f32 0.0078125, %v3011_v61  ;;  %v3196_v61 = vld [vmem:[#allocation10 + $0x10] sm:$0xff] }
0x19c4   :  { %v3016_v63 = vadd.f32 1e-12, %v3014_v62  ;;  %v3195_v62 = vld [vmem:[#allocation10 + $0x8] sm:$0xff] }
0x19c6   :  { %v3013_v3 = vpop.xlane.xlu0 %3012  ;;  %4141 = vrsqrt.f32 %v3016_v63  ;;  %v3194_v63 = vld [vmem:[#allocation10] sm:$0xff] }
0x19c7   :  { %v3015_v57 = vmul.f32 0.0078125, %v3013_v3  ;;  %v3475_v3 = vld [vmem:[%s4996_s19] ss:$0 sm:$0xff] }
0x19c9   :  { %v3017_v2 = vadd.f32 1e-12, %v3015_v57 }
0x19cb   :  { %4143 = vrsqrt.f32 %v3017_v2 }
0x19d3   :  { %v4142_v1 = vpop.eup %4141 }
0x19d4   :  { %v3020_v54 = vmul.f32 %v4142_v1, %v3006_v41  ;;  %v3202_v41 = vld [vmem:[#allocation10 + $0x40] sm:$0xff] }
0x19d5   :  { %3979 = vmatpush3.msra.mxu0 %v3202_v41 }
0x19d6   :  { %v3028_v5 = vmul.f32 %v3471_v51, %v3020_v54  ;;  %3980 = vmatprep.subr.mxu0 %v4317_v56 }
0x19d7   :  { %3981 = vmatpush3.msra.mxu0 %v3201_v44 }
0x19d8   :  { %v4144_v39 = vpop.eup %4143  ;;  %v3036_v9 = vadd.f32 %v3472_v8, %v3028_v5  ;;  %3982 = vmatprep.subr.mxu0 %v4317_v56 }
0x19d9   :  { %v3021_v4 = vmul.f32 %v4144_v39, %v3007_v58  ;;  %3983 = vmatpush3.msra.mxu0 %v3200_v47  ;;  %v3198_v58 = vld [vmem:[#allocation10 + $0x20] sm:$0xff] }
0x19da   :  { %3984 = vmatprep.subr.mxu0 %v4317_v56 }
0x19db   :  { %v3029_v6 = vmul.f32 %v3471_v51, %v3021_v4  ;;  %3985 = vmatpush3.msra.mxu0 %v3199_v13 }
0x19dc   :  { %3986 = vmatprep.subr.mxu0 %v4317_v56 }
0x19dd   :  { %v3037_v48 = vadd.f32 %v3472_v8, %v3029_v6  ;;  %3987 = vmatpush3.msra.mxu0 %v3198_v58 }
0x19de   :  { %3988 = vmatprep.subr.mxu0 %v4317_v56 }
0x19df   :  { %v3039_v50 = vrot.slane %v3037_v48, 7  ;;  %3989 = vmatpush3.msra.mxu0 %v3197_v15 }
0x19e0   :  { %3990 = vmatprep.subr.mxu0 %v4317_v56 }
0x19e1   :  { %v3042_v11 = vsel %vm3041_vm11, %v3036_v9, %v3039_v50  ;;  %3991 = vmatpush3.msra.mxu0 %v3196_v61 }
0x19e2   :  { %v3046_v14 = vsel %vm3045_vm12, %v3042_v11, 0.0  ;;  %3992 = vmatprep.subr.mxu0 %v4317_v56 }
0x19e3   :  { %3047 = vadd.xlane.f32.xlu0 %v3046_v14  ;;  %3993 = vmatpush3.msra.mxu0 %v3195_v62 }
0x19e4   :  { %3994 = vmatprep.subr.mxu0 %v4317_v56 }
0x19e5   :  { %3995 = vmatpush3.msra.mxu0 %v3194_v63 }
0x1a6c   :  { %v3048_v20 = vpop.xlane.xlu0 %3047 }
0x1a6d   :  { %v3049_v21 = vmul.f32 0.0078125, %v3048_v20 }
0x1a6f   :  { %v3050_v19 = vsub.f32 %v3042_v11, %v3049_v21 }
0x1a71   :  { %v3051_v55 = vmul.f32 %v3050_v19, %v3050_v19 }
0x1a73   :  { %v3052_v52 = vsel %vm3045_vm12, %v3051_v55, 0.0 }
0x1a74   :  { %3053 = vadd.xlane.f32.xlu1 %v3052_v52 }
0x1afd   :  { %v3054_v0 = vpop.xlane.xlu1 %3053 }
0x1afe   :  { %v3055_v33 = vmul.f32 0.0078125, %v3054_v0  ;;  %v3323_v0 = vld [vmem:[#allocation11 + $0x40] sm:$0xff] }
0x1b00   :  { %v3056_v43 = vadd.f32 1e-05, %v3055_v33  ;;  %v3322_v33 = vld [vmem:[#allocation11 + $0x38] sm:$0xff] }
0x1b02   :  { %4145 = vrsqrt.f32 %v3056_v43  ;;  %v3321_v43 = vld [vmem:[#allocation11 + $0x30] sm:$0xff] }
0x1b0f   :  { %v4146_v40 = vpop.eup %4145 }
0x1b10   :  { %v3058_v27 = vmul.f32 %v4146_v40, %v3050_v19  ;;  %v3320_v40 = vld [vmem:[#allocation11 + $0x28] sm:$0xff] }
0x1b12   :  { %v3065_v10 = vmul.f32 %v3473_v34, %v3058_v27  ;;  %v3319_v34 = vld [vmem:[#allocation11 + $0x20] sm:$0xff]  ;;  %v3318_v27 = vld [vmem:[#allocation11 + $0x18] sm:$0xff] }
0x1b14   :  { %v4923_v60 = vadd.f32 %v3474_v36, %v3065_v10  ;;  %v3317_v36 = vld [vmem:[#allocation11 + $0x10] sm:$0xff]  ;;  %v3316_v10 = vld [vmem:[#allocation11 + $0x8] sm:$0xff] }
0x1b16   :  { %3962 = vmatmul.mubr.f32.vlgmr.msra.gmra.mxu1 %v4923_v60 }
0x1b17   :  { %4031 = vmatprep.mubr.msk.f32.mxu1 %vm4318_vm0, %v4317_v56  ;;  %4000 = vmatpush3.msra.mxu1 %v3330_v7 }
0x1b18   :  { %4001 = vmatprep.subr.mxu1 %v4317_v56 }
0x1b19   :  { %4002 = vmatpush3.msra.mxu1 %v3329_v25 }
0x1b1a   :  { %4003 = vmatprep.subr.mxu1 %v4317_v56 }
0x1b1b   :  { %4004 = vmatpush3.msra.mxu1 %v3328_v26 }
0x1b1c   :  { %4005 = vmatprep.subr.mxu1 %v4317_v56 }
0x1b1d   :  { %4006 = vmatpush3.msra.mxu1 %v3327_v28 }
0x1b1e   :  { %4007 = vmatprep.subr.mxu1 %v4317_v56 }
0x1b1f   :  { %4008 = vmatpush3.msra.mxu1 %v3326_v30 }
0x1b20   :  { %4009 = vmatprep.subr.mxu1 %v4317_v56 }
0x1b21   :  { %4010 = vmatpush3.msra.mxu1 %v3325_v31 }
0x1b22   :  { %4011 = vmatprep.subr.mxu1 %v4317_v56 }
0x1b23   :  { %4012 = vmatpush3.msra.mxu1 %v3324_v32 }
0x1b24   :  { %4013 = vmatprep.subr.mxu1 %v4317_v56 }
0x1b25   :  { %4014 = vmatpush3.msra.mxu1 %v3323_v0 }
0x1b26   :  { %4015 = vmatprep.subr.mxu1 %v4317_v56 }
0x1b27   :  { %4016 = vmatpush3.msra.mxu1 %v3322_v33 }
0x1b28   :  { %4017 = vmatprep.subr.mxu1 %v4317_v56 }
0x1b29   :  { %4018 = vmatpush3.msra.mxu1 %v3321_v43 }
0x1b2a   :  { %4019 = vmatprep.subr.mxu1 %v4317_v56 }
0x1b2b   :  { %4020 = vmatpush3.msra.mxu1 %v3320_v40 }
0x1b2c   :  { %4021 = vmatprep.subr.mxu1 %v4317_v56 }
0x1b2d   :  { %4022 = vmatpush3.msra.mxu1 %v3319_v34 }
0x1b2e   :  { %4023 = vmatprep.subr.mxu1 %v4317_v56 }
0x1b2f   :  { %4024 = vmatpush3.msra.mxu1 %v3318_v27 }
0x1b30   :  { %4025 = vmatprep.subr.mxu1 %v4317_v56 }
0x1b31   :  { %4026 = vmatpush3.msra.mxu1 %v3317_v36 }
0x1b32   :  { %4027 = vmatprep.subr.mxu1 %v4317_v56 }
0x1b33   :  { %4028 = vmatpush3.msra.mxu1 %v3316_v10 }
0x1b34   :  { %4029 = vmatprep.subr.mxu1 %v4317_v56 }
0x1bd6   :  { %v3162_v57 = vpop.f32.mrf.mxu1 }
0x1bd7   :  { %v3163_v2 = vadd.f32 %v3475_v3, %v3162_v57 }
0x1bd8   :  { %v3963_v1 = vpop.f32.mrf.mxu1 }
0x1bd9   :  { %v3167_v54 = vmul.f32 0.70710677, %v3163_v2  ;;  %v3166_v23 = vmul.f32 0.5, %v3163_v2 }
0x1bdb   :  { %v3170_v39 = vand.u32 2147483647, %v3167_v54  ;;  %vm3168_vm13 = vcmp.ge.f32.partialorder %v3167_v54, 0.0 }
0x1bdc   :  { %v3169_v52 = vsel %vm3168_vm13, 1.0, %v4320_v35 }
0x1bdd   :  { %v3171_v51 = vmul.f32 0.3275911, %v3170_v39  ;;  %v3184_v5 = vsub.f32 0.0, %v3170_v39 }
0x1bdf   :  { %v3172_v4 = vadd.f32 1.0, %v3171_v51  ;;  %v3185_v6 = vmul.f32 %v3184_v5, %v3170_v39 }
0x1be1   :  { %4147 = vrcp.f32 %v3172_v4  ;;  %v3186_v9 = vmul.f32 1.442695, %v3185_v6 }
0x1be3   :  { %4149 = vpow2.f32 %v3186_v9 }
0x1bee   :  { %v4148_v8 = vpop.eup %4147 }
0x1bef   :  { %v3175_v48 = vmul.f32 1.0614054, %v4148_v8 }
0x1bf0   :  { %v4150_v21 = vpop.eup %4149 }
0x1bf1   :  { %v3176_v50 = vadd.f32 -1.4531521, %v3175_v48 }
0x1bf3   :  { %v3177_v11 = vmul.f32 %v4148_v8, %v3176_v50  ;;  %v3477_v50 = vld [vmem:[%s5000_s23] ss:$0 sm:$0xff] }
0x1bf5   :  { %v3178_v14 = vadd.f32 1.4214138, %v3177_v11 }
0x1bf7   :  { %v3179_v42 = vmul.f32 %v4148_v8, %v3178_v14 }
0x1bf9   :  { %v3180_v49 = vadd.f32 -0.28449672, %v3179_v42 }
0x1bfb   :  { %v3181_v16 = vmul.f32 %v4148_v8, %v3180_v49 }
0x1bfd   :  { %v3182_v18 = vadd.f32 0.2548296, %v3181_v16 }
0x1bff   :  { %v3183_v20 = vmul.f32 %v4148_v8, %v3182_v18 }
0x1c01   :  { %v3188_v19 = vmul.f32 %v4150_v21, %v3183_v20 }
0x1c03   :  { %v3189_v55 = vsub.f32 1.0, %v3188_v19 }
0x1c05   :  { %v3190_v22 = vmul.f32 %v3189_v55, %v3169_v52 }
0x1c07   :  { %v3191_v45 = vadd.f32 1.0, %v3190_v22 }
0x1c09   :  { %v3192_v59 = vmul.f32 %v3191_v45, %v3166_v23 }
0x1c0b   :  { %v4948_v24 = vadd.f32 %v3192_v59, %v4923_v60  ;;  %v3315_v60 = vld [vmem:[#allocation11] sm:$0xff] }
0x1c0c   :  { %4030 = vmatpush3.msra.mxu1 %v3315_v60 }
0x1c0d   :  { %3997 = vmatmul.mubr.f32.vlgmr.msra.gmra.mxu0 %v4948_v24 }
0x1ccd   :  { %v3283_v46 = vpop.f32.mrf.mxu0 }
0x1cce   :  { %v3284_v53 = vadd.f32 %v3476_v12, %v3283_v46 }
0x1ccf   :  { %v3998_v17 = vpop.f32.mrf.mxu0 }
0x1cd0   :  { %v3288_v37 = vmul.f32 0.70710677, %v3284_v53  ;;  %v3287_v6 = vmul.f32 0.5, %v3284_v53 }
0x1cd2   :  { %v3291_v29 = vand.u32 2147483647, %v3288_v37  ;;  %vm3289_vm14 = vcmp.ge.f32.partialorder %v3288_v37, 0.0 }
0x1cd3   :  { %v3290_v4 = vsel %vm3289_vm14, 1.0, %v4320_v35 }
0x1cd4   :  { %v3292_v38 = vmul.f32 0.3275911, %v3291_v29  ;;  %v3305_v44 = vsub.f32 0.0, %v3291_v29 }
0x1cd6   :  { %v3293_v41 = vadd.f32 1.0, %v3292_v38  ;;  %v3306_v47 = vmul.f32 %v3305_v44, %v3291_v29 }
0x1cd8   :  { %4151 = vrcp.f32 %v3293_v41  ;;  %v3307_v15 = vmul.f32 1.442695, %v3306_v47 }
0x1cda   :  { %4153 = vpow2.f32 %v3307_v15 }
0x1ce5   :  { %v4152_v13 = vpop.eup %4151 }
0x1ce6   :  { %v3296_v58 = vmul.f32 1.0614054, %v4152_v13 }
0x1ce7   :  { %v4154_v54 = vpop.eup %4153 }
0x1ce8   :  { %v3297_v56 = vadd.f32 -1.4531521, %v3296_v58 }
0x1cea   :  { %v3298_v61 = vmul.f32 %v4152_v13, %v3297_v56 }
0x1cec   :  { %v3299_v62 = vadd.f32 1.4214138, %v3298_v61 }
0x1cee   :  { %v3300_v63 = vmul.f32 %v4152_v13, %v3299_v62 }
0x1cf0   :  { %v3301_v3 = vadd.f32 -0.28449672, %v3300_v63 }
0x1cf2   :  { %v3302_v57 = vmul.f32 %v4152_v13, %v3301_v3 }
0x1cf4   :  { %v3303_v2 = vadd.f32 0.2548296, %v3302_v57 }
0x1cf6   :  { %v3304_v1 = vmul.f32 %v4152_v13, %v3303_v2 }
0x1cf8   :  { %v3309_v39 = vmul.f32 %v4154_v54, %v3304_v1 }
0x1cfa   :  { %v3310_v51 = vsub.f32 1.0, %v3309_v39 }
0x1cfc   :  { %v3311_v5 = vmul.f32 %v3310_v51, %v3290_v4 }
0x1cfe   :  { %v3312_v8 = vadd.f32 1.0, %v3311_v5 }
0x1d00   :  { %v3313_v48 = vmul.f32 %v3312_v8, %v3287_v6 }
0x1d02   :  { %v3314_v9 = vadd.f32 %v3313_v48, %v4948_v24 }
0x1d04   :  { %4032 = vmatmul.mubr.f32.vlgmr.msra.gmra.mxu1 %v3314_v9 }
0x1dc4   :  { %v3404_v11 = vpop.f32.mrf.mxu1 }
0x1dc5   :  { %v3405_v14 = vadd.f32 %v3477_v50, %v3404_v11 }
0x1dc6   :  { %v4033_v42 = vpop.f32.mrf.mxu1 }
0x1dc7   :  { %3408 = vst [vmem:[#allocation13] sm:$0x3] %v3405_v14 }
0x1dc8   :  { %4286 = shalt.err (!%p4283_p6)
}
0x1dc9   :  { %3418 = dma.vmem_to_hbm [thread:$0]  %s3416_s8, 32, %s5001_s24, [#allocation4]  }
0x1dca   :  { %4303 = dma.done.wait [#allocation4], 32  }
0x1dcb   :  { %4304 = vsyncadd [#allocation4], 4294967264 }
0x1dcc   :  { %3422 = vsyncpa [#allocation3], 1 }
0x1dcd   :  { %3423 = vsyncpa [#allocation6], 1 }
0x1dce   :  { %3424 = vsyncpa [#allocation9], 1 }
0x1dcf   :  { %3425 = vsyncpa [#allocation12], 1 }
0x1dd0   :  { %3426 = vsyncpa [#allocation4], 1 }

</bundles_post_ra>
